<compile_context>
chip_gen: v5e
topology: v5e:2x2
jax: 0.10.0
libtpu: 0.0.40
codegen_flags: <defaults>
</compile_context>

<pallas_src>
import functools

import numpy as np
import jax
import jax.numpy as jnp
from jax.experimental import pallas as pl
from jax.experimental.pallas import tpu as pltpu


SIZE_OPTIONS = np.array([2, 4, 8, 16, 32], dtype=np.int64)
PLANES = [3, 12, 24, 48, 96, 192]


def _round_up(v, m):
    return ((v + m - 1) // m) * m


# ----------------------------------------------------------------------------
# Pallas kernel: out = [relu]( (x @ w) * bn_scale + bn_shift [+ res] )
# x / w / res are bf16 (MXU-friendly); the epilogue runs in f32.
# ----------------------------------------------------------------------------
def _dense_kernel(x_ref, w_ref, scale_ref, shift_ref, *rest, relu, has_res):
    if has_res:
        res_ref, o_ref = rest
    else:
        (o_ref,) = rest
    y = jnp.dot(x_ref[...], w_ref[...], preferred_element_type=jnp.float32)
    y = y * scale_ref[...] + shift_ref[...]
    if has_res:
        y = y + res_ref[...].astype(jnp.float32)
    if relu:
        y = jnp.maximum(y, 0.0)
    o_ref[...] = y.astype(o_ref.dtype)


def pallas_dense(x, pw, n_out, res=None, relu=False, out_dtype=jnp.bfloat16):
    """Fused matmul + folded BN/bias (+ optional residual) + ReLU.

    `pw` holds constants pre-padded at init:
        w: (Kp, Np) bf16    scale, shift: (1, Np) f32
    Only the activation x (M, K real) is padded here (to bf16 (Mp, Kp)).
    """
    M, K = x.shape
    Kp, Np = pw['w'].shape

    tile_m = 512 if M > 512 else _round_up(max(M, 8), 8)
    Mp = _round_up(M, tile_m)

    xp = jnp.zeros((Mp, Kp), jnp.bfloat16).at[:M, :K].set(x.astype(jnp.bfloat16))

    args = [xp, pw['w'], pw['scale'], pw['shift']]
    in_specs = [
        pl.BlockSpec((tile_m, Kp), lambda i: (i, 0)),
        pl.BlockSpec((Kp, Np), lambda i: (0, 0)),
        pl.BlockSpec((1, Np), lambda i: (0, 0)),
        pl.BlockSpec((1, Np), lambda i: (0, 0)),
    ]
    has_res = res is not None
    if has_res:
        rp = jnp.zeros((Mp, Np), jnp.bfloat16).at[:M, :n_out].set(res.astype(jnp.bfloat16))
        args.append(rp)
        in_specs.append(pl.BlockSpec((tile_m, Np), lambda i: (i, 0)))

    out = pl.pallas_call(
        functools.partial(_dense_kernel, relu=relu, has_res=has_res),
        out_shape=jax.ShapeDtypeStruct((Mp, Np), out_dtype),
        grid=(Mp // tile_m,),
        in_specs=in_specs,
        out_specs=pl.BlockSpec((tile_m, Np), lambda i: (i, 0)),
        compiler_params=pltpu.CompilerParams(dimension_semantics=("parallel",)),
    )(*args)
    return out[:M, :n_out]


# ----------------------------------------------------------------------------
# Conv lowering glue (im2col / space-to-depth, bf16, fused under jit)
# ----------------------------------------------------------------------------
def im2col_3x3(x_nhwc):
    """3x3, stride 1, pad 1 conv -> rows (N*H*W, 9*C); column order (dy, dx, cin)."""
    N, H, W, C = x_nhwc.shape
    xp = jnp.pad(x_nhwc, ((0, 0), (1, 1), (1, 1), (0, 0)))
    cols = []
    for dy in range(3):
        for dx in range(3):
            cols.append(xp[:, dy:dy + H, dx:dx + W, :])
    return jnp.concatenate(cols, axis=-1).reshape(N * H * W, 9 * C)


def space_to_depth2(x_nhwc):
    """2x2, stride 2 conv -> rows (N*H/2*W/2, 4*C); column order (dy, dx, cin)."""
    N, H, W, C = x_nhwc.shape
    x = x_nhwc.reshape(N, H // 2, 2, W // 2, 2, C)
    x = jnp.transpose(x, (0, 1, 3, 2, 4, 5))
    return x.reshape(N * (H // 2) * (W // 2), 4 * C)


def res_layer(x_nhwc, lp, cout):
    """BasicBlock(C->C) -> Conv2d(C->cout, k=2, s=2) -> BN -> ReLU. Halves spatial size."""
    N, H, W, C = x_nhwc.shape
    # BasicBlock: conv3x3 -> BN -> ReLU
    h = pallas_dense(im2col_3x3(x_nhwc), lp['c1'], C, relu=True)
    # conv3x3 -> BN -> +skip -> ReLU   (only this conv carries a residual input)
    out = pallas_dense(im2col_3x3(h.reshape(N, H, W, C)), lp['c2'], C,
                       res=x_nhwc.reshape(N * H * W, C), relu=True)
    # downsampling conv 2x2 stride 2 (with bias) -> BN -> ReLU
    y = pallas_dense(space_to_depth2(out.reshape(N, H, W, C)), lp['cd'], cout, relu=True)
    return y.reshape(N, H // 2, W // 2, cout)


# ----------------------------------------------------------------------------
# Parameter init: fold BN/bias, reshape and zero-pad every weight ONCE (bf16).
# ----------------------------------------------------------------------------
def _prep_dense(w, bias=None, bn_scale=None, bn_shift=None):
    w = jnp.asarray(w, jnp.float32)
    K, N = w.shape
    Kp = _round_up(max(K, 128), 128)
    Np = _round_up(max(N, 128), 128)
    scale = jnp.ones((N,), jnp.float32) if bn_scale is None else jnp.asarray(bn_scale, jnp.float32)
    shift = jnp.zeros((N,), jnp.float32) if bn_shift is None else jnp.asarray(bn_shift, jnp.float32)
    if bias is not None:
        shift = shift + jnp.asarray(bias, jnp.float32) * scale
    wp = jnp.zeros((Kp, Np), jnp.bfloat16).at[:K, :N].set(w.astype(jnp.bfloat16))
    sp = jnp.zeros((1, Np), jnp.float32).at[0, :N].set(scale)
    bp = jnp.zeros((1, Np), jnp.float32).at[0, :N].set(shift)
    return dict(w=wp, scale=sp, shift=bp)


def init_params(key, h_g, h_l, h_s):
    keys = iter(jax.random.split(key, 512))

    def conv_w(kh, kw, cin, cout):
        return jax.random.normal(next(keys), (kh, kw, cin, cout), jnp.float32) / np.sqrt(kh * kw * cin)

    def lin(cin, cout):
        w = jax.random.normal(next(keys), (cin, cout), jnp.float32) / np.sqrt(cin)
        b = jax.random.normal(next(keys), (cout,), jnp.float32) * 0.01
        return w, b

    def bn(c):
        eps = 1e-5  # gamma=1, beta=0, running_mean=0, running_var=1 (eval mode)
        return (jnp.full((c,), 1.0 / np.sqrt(1.0 + eps), jnp.float32),
                jnp.zeros((c,), jnp.float32))

    extractors = {}
    for idx, sz in enumerate(SIZE_OPTIONS.tolist()):
        num_layers = idx + 1            # size 2 -> 1 layer ... size 32 -> 5 layers
        layers = []
        for j in range(num_layers):
            cin, cout = PLANES[j], PLANES[j + 1]
            s1, b1 = bn(cin)
            s2, b2 = bn(cin)
            sd, bd = bn(cout)
            layers.append(dict(
                c1=_prep_dense(conv_w(3, 3, cin, cin).reshape(9 * cin, cin),
                               bn_scale=s1, bn_shift=b1),
                c2=_prep_dense(conv_w(3, 3, cin, cin).reshape(9 * cin, cin),
                               bn_scale=s2, bn_shift=b2),
                cd=_prep_dense(conv_w(2, 2, cin, cout).reshape(4 * cin, cout),
                               bias=jax.random.normal(next(keys), (cout,), jnp.float32) * 0.01,
                               bn_scale=sd, bn_shift=bd)))
        enc_w, enc_b = lin(PLANES[num_layers], h_g)
        extractors[sz] = dict(layers=layers, enc=_prep_dense(enc_w, bias=enc_b))

    Ht = h_g + h_l + h_s
    fc1_w, fc1_b = lin(2, h_l)
    fc2_w, fc2_b = lin(5, h_s)
    what_w, what_b = lin(h_g, Ht)
    where_w, where_b = lin(h_l, Ht)
    size_w, size_b = lin(h_s, Ht)
    # Fused "what + where + size" head: vstack the three weight matrices once.
    head = _prep_dense(jnp.concatenate([what_w, where_w, size_w], axis=0),
                       bias=what_b + where_b + size_b)
    return dict(extractors=extractors,
                fc1_w=fc1_w, fc1_b=fc1_b, fc2_w=fc2_w, fc2_b=fc2_b, head=head)


# ----------------------------------------------------------------------------
# Full forward (on-device, jitted; compile cache keyed on the group composition)
# ----------------------------------------------------------------------------
@functools.partial(jax.jit, static_argnums=(0, 1))
def _forward_jit(groups, dims, params, x, l, s, perm):
    h_g, h_l, h_s = dims
    T = x.shape[2]
    # torch .long() truncation; coords are non-negative here so trunc == floor.
    coords = (0.5 * ((l + 1.0) * T)).astype(jnp.int32)

    feats = []
    off = 0
    for size, cnt in groups:
        idx = perm[off:off + cnt]
        off += cnt
        pad = size // 2 + 1
        # Always padding by size//2+1 and shifting the offsets is equivalent to the
        # original's conditional boundary padding (zero border, same interior pixels).
        ims = jnp.pad(jnp.take(x, idx, axis=0), ((0, 0), (0, 0), (pad, pad), (pad, pad)))
        cc = jnp.take(coords, idx, axis=0)

        def slice_one(im, c, size=size, pad=pad):
            fy = c[1] - size // 2 + pad
            fx = c[0] - size // 2 + pad
            p1 = jax.lax.dynamic_slice_in_dim(im, fy, size, axis=1)
            return jax.lax.dynamic_slice_in_dim(p1, fx, size, axis=2)

        patch = jax.vmap(slice_one)(ims, cc)                          # (cnt, C, size, size)
        h = jnp.transpose(patch, (0, 2, 3, 1)).astype(jnp.bfloat16)   # NCHW -> NHWC, bf16

        ep = params['extractors'][size]
        for j, lp in enumerate(ep['layers']):
            h = res_layer(h, lp, PLANES[j + 1])
        f = h.reshape(h.shape[0], -1)                                 # spatial is 1x1
        feats.append(pallas_dense(f, ep['enc'], h_g, relu=True))

    # NOTE: rows are grouped by patch size (exactly torch.cat(feature_batch, 0)),
    # while l_out / s_out remain in batch order — the original's row-mixing quirk.
    feature_batch = jnp.concatenate(feats, axis=0).astype(jnp.float32)

    # Tiny fc layers (K=2 / K=5): a dedicated pallas_call would be pure overhead.
    l_out = jax.nn.relu(l @ params['fc1_w'] + params['fc1_b'])
    s_out = jax.nn.relu(s @ params['fc2_w'] + params['fc2_b'])

    # g_t = relu(f@what_w + l_out@where_w + s_out@size_w + biases)  — one fused matmul.
    z = jnp.concatenate([feature_batch, l_out, s_out], axis=1)
    Ht = h_g + h_l + h_s
    return pallas_dense(z, params['head'], Ht, relu=True, out_dtype=jnp.float32)


def glimpse_forward(params, dims, x, l_t_prev, size_t_prev):
    # Only the per-sample size choice (B ints) is synced to host: it determines the
    # static group shapes, exactly like the original data-dependent torch grouping.
    size_idx = np.asarray(jax.device_get(jnp.argmax(size_t_prev, axis=1)))
    sizes = SIZE_OPTIONS[size_idx]
    groups, perm = [], []
    for num in (32, 16, 8, 4, 2):                 # same grouping order as the torch code
        gidx = np.flatnonzero(sizes == num)
        if gidx.size:
            groups.append((int(num), int(gidx.size)))
            perm.append(gidx)
    perm = jnp.asarray(np.concatenate(perm).astype(np.int32))
    return _forward_jit(tuple(groups), tuple(dims), params, x, l_t_prev, size_t_prev, perm)


if __name__ == "__main__":
    key = jax.random.PRNGKey(0)
    k_img, k_loc, k_size, k_par = jax.random.split(key, 4)

    B, C, H, W = 4, 3, 32, 32                 # planes[0] == 3  ->  c = 3
    h_g, h_l, h_s = 32, 16, 16                # hidden = h_g + h_l + h_s = 64

    x = jax.random.normal(k_img, (B, C, H, W), jnp.float32)
    l_t_prev = jax.random.uniform(k_loc, (B, 2), jnp.float32, minval=-1.0, maxval=1.0)
    size_t_prev = jax.random.normal(k_size, (B, 5), jnp.float32)

    params = init_params(k_par, h_g, h_l, h_s)

    g_t = glimpse_forward(params, (h_g, h_l, h_s), x, l_t_prev, size_t_prev)
    g_t = jax.block_until_ready(g_t)

    assert g_t.shape == (B, h_g + h_l + h_s), g_t.shape
    assert bool(jnp.all(jnp.isfinite(g_t)))
    assert bool(jnp.all(g_t >= 0.0))          # final ReLU
    print("KERNEL_OK")
</pallas_src>

<mosaic_0001>
module attributes {stable_mosaic.version = 11 : i64} {
  func.func @_dense_kernel(%arg0: i32, %arg1: memref<256x128xbf16, #tpu.memory_space<vmem>>, %arg2: memref<128x128xbf16, #tpu.memory_space<vmem>>, %arg3: memref<1x128xf32, #tpu.memory_space<vmem>>, %arg4: memref<1x128xf32, #tpu.memory_space<vmem>>, %arg5: memref<256x128xbf16, #tpu.memory_space<vmem>>) attributes {dimension_semantics = [#tpu.dimension_semantics<parallel>], iteration_bounds = array<i64: 1>, scalar_prefetch = 0 : i64, scratch_operands = 0 : i64, tpu.core_type = #tpu.core_type<tc>, window_params = [{transform_indices = @transform_0, window_bounds = array<i64: 256, 128>}, {pipeline_mode = #tpu.pipeline_mode<synchronous>, transform_indices = @transform_1, window_bounds = array<i64: 128, 128>}, {pipeline_mode = #tpu.pipeline_mode<synchronous>, transform_indices = @transform_2, window_bounds = array<i64: 1, 128>}, {pipeline_mode = #tpu.pipeline_mode<synchronous>, transform_indices = @transform_3, window_bounds = array<i64: 1, 128>}, {transform_indices = @transform_4, window_bounds = array<i64: 256, 128>}]} {
    %c0 = arith.constant 0 : index
    %c0_0 = arith.constant 0 : index
    %0 = vector.load %arg1[%c0, %c0_0] : memref<256x128xbf16, #tpu.memory_space<vmem>>, vector<256x128xbf16>
    %c0_1 = arith.constant 0 : index
    %c0_2 = arith.constant 0 : index
    %1 = vector.load %arg2[%c0_1, %c0_2] : memref<128x128xbf16, #tpu.memory_space<vmem>>, vector<128x128xbf16>
    %cst = arith.constant dense<0.000000e+00> : vector<256x128xf32>
    %2 = tpu.matmul %0, %1, %cst {dimension_numbers = #tpu.dot_dimension_numbers<[1], [0], [0], [1], [0, 0, 1, 1], [], []>} : vector<256x128xbf16>, vector<128x128xbf16>, vector<256x128xf32> -> vector<256x128xf32>
    %c0_3 = arith.constant 0 : index
    %c0_4 = arith.constant 0 : index
    %3 = vector.load %arg3[%c0_3, %c0_4] : memref<1x128xf32, #tpu.memory_space<vmem>>, vector<1x128xf32>
    %4 = vector.broadcast %3 : vector<1x128xf32> to vector<256x128xf32>
    %5 = arith.mulf %2, %4 : vector<256x128xf32>
    %c0_5 = arith.constant 0 : index
    %c0_6 = arith.constant 0 : index
    %6 = vector.load %arg4[%c0_5, %c0_6] : memref<1x128xf32, #tpu.memory_space<vmem>>, vector<1x128xf32>
    %7 = vector.broadcast %6 : vector<1x128xf32> to vector<256x128xf32>
    %8 = arith.addf %5, %7 : vector<256x128xf32>
    %cst_7 = arith.constant 0.000000e+00 : f32
    %9 = vector.broadcast %cst_7 : f32 to vector<256x128xf32>
    %10 = arith.maximumf %8, %9 : vector<256x128xf32>
    %11 = arith.truncf %10 : vector<256x128xf32> to vector<256x128xbf16>
    %c0_8 = arith.constant 0 : index
    %c0_9 = arith.constant 0 : index
    %12 = vector.load %arg5[%c0_8, %c0_9] : memref<256x128xbf16, #tpu.memory_space<vmem>>, vector<256x128xbf16>
    tpu.vector_store %arg5[%c0_8, %c0_9], %11 {strides = array<i32>} : memref<256x128xbf16, #tpu.memory_space<vmem>>, vector<256x128xbf16>,
    return
  }
  func.func @transform_0(%arg0: i32) -> (i32, i32) {
    %c0_i32 = arith.constant 0 : i32
    %c0_i32_0 = arith.constant 0 : i32
    return %arg0, %c0_i32 : i32, i32
  }
  func.func @transform_1(%arg0: i32) -> (i32, i32) {
    %c0_i32 = arith.constant 0 : i32
    %c0_i32_0 = arith.constant 0 : i32
    %c0_i32_1 = arith.constant 0 : i32
    return %c0_i32, %c0_i32_0 : i32, i32
  }
  func.func @transform_2(%arg0: i32) -> (i32, i32) {
    %c0_i32 = arith.constant 0 : i32
    %c0_i32_0 = arith.constant 0 : i32
    %c0_i32_1 = arith.constant 0 : i32
    return %c0_i32, %c0_i32_0 : i32, i32
  }
  func.func @transform_3(%arg0: i32) -> (i32, i32) {
    %c0_i32 = arith.constant 0 : i32
    %c0_i32_0 = arith.constant 0 : i32
    %c0_i32_1 = arith.constant 0 : i32
    return %c0_i32, %c0_i32_0 : i32, i32
  }
  func.func @transform_4(%arg0: i32) -> (i32, i32) {
    %c0_i32 = arith.constant 0 : i32
    %c0_i32_0 = arith.constant 0 : i32
    return %arg0, %c0_i32 : i32, i32
  }
}

module attributes {stable_mosaic.version = 11 : i64} {
  func.func @_dense_kernel(%arg0: i32, %arg1: memref<256x128xbf16, #tpu.memory_space<vmem>>, %arg2: memref<128x128xbf16, #tpu.memory_space<vmem>>, %arg3: memref<1x128xf32, #tpu.memory_space<vmem>>, %arg4: memref<1x128xf32, #tpu.memory_space<vmem>>, %arg5: memref<256x128xbf16, #tpu.memory_space<vmem>>, %arg6: memref<256x128xbf16, #tpu.memory_space<vmem>>) attributes {dimension_semantics = [#tpu.dimension_semantics<parallel>], iteration_bounds = array<i64: 1>, scalar_prefetch = 0 : i64, scratch_operands = 0 : i64, tpu.core_type = #tpu.core_type<tc>, window_params = [{transform_indices = @transform_0, window_bounds = array<i64: 256, 128>}, {pipeline_mode = #tpu.pipeline_mode<synchronous>, transform_indices = @transform_1, window_bounds = array<i64: 128, 128>}, {pipeline_mode = #tpu.pipeline_mode<synchronous>, transform_indices = @transform_2, window_bounds = array<i64: 1, 128>}, {pipeline_mode = #tpu.pipeline_mode<synchronous>, transform_indices = @transform_3, window_bounds = array<i64: 1, 128>}, {transform_indices = @transform_4, window_bounds = array<i64: 256, 128>}, {transform_indices = @transform_5, window_bounds = array<i64: 256, 128>}]} {
    %c0 = arith.constant 0 : index
    %c0_0 = arith.constant 0 : index
    %0 = vector.load %arg1[%c0, %c0_0] : memref<256x128xbf16, #tpu.memory_space<vmem>>, vector<256x128xbf16>
    %c0_1 = arith.constant 0 : index
    %c0_2 = arith.constant 0 : index
    %1 = vector.load %arg2[%c0_1, %c0_2] : memref<128x128xbf16, #tpu.memory_space<vmem>>, vector<128x128xbf16>
    %cst = arith.constant dense<0.000000e+00> : vector<256x128xf32>
    %2 = tpu.matmul %0, %1, %cst {dimension_numbers = #tpu.dot_dimension_numbers<[1], [0], [0], [1], [0, 0, 1, 1], [], []>} : vector<256x128xbf16>, vector<128x128xbf16>, vector<256x128xf32> -> vector<256x128xf32>
    %c0_3 = arith.constant 0 : index
    %c0_4 = arith.constant 0 : index
    %3 = vector.load %arg3[%c0_3, %c0_4] : memref<1x128xf32, #tpu.memory_space<vmem>>, vector<1x128xf32>
    %4 = vector.broadcast %3 : vector<1x128xf32> to vector<256x128xf32>
    %5 = arith.mulf %2, %4 : vector<256x128xf32>
    %c0_5 = arith.constant 0 : index
    %c0_6 = arith.constant 0 : index
    %6 = vector.load %arg4[%c0_5, %c0_6] : memref<1x128xf32, #tpu.memory_space<vmem>>, vector<1x128xf32>
    %7 = vector.broadcast %6 : vector<1x128xf32> to vector<256x128xf32>
    %8 = arith.addf %5, %7 : vector<256x128xf32>
    %c0_7 = arith.constant 0 : index
    %c0_8 = arith.constant 0 : index
    %9 = vector.load %arg5[%c0_7, %c0_8] : memref<256x128xbf16, #tpu.memory_space<vmem>>, vector<256x128xbf16>
    %10 = arith.extf %9 : vector<256x128xbf16> to vector<256x128xf32>
    %11 = arith.addf %8, %10 : vector<256x128xf32>
    %cst_9 = arith.constant 0.000000e+00 : f32
    %12 = vector.broadcast %cst_9 : f32 to vector<256x128xf32>
    %13 = arith.maximumf %11, %12 : vector<256x128xf32>
    %14 = arith.truncf %13 : vector<256x128xf32> to vector<256x128xbf16>
    %c0_10 = arith.constant 0 : index
    %c0_11 = arith.constant 0 : index
    %15 = vector.load %arg6[%c0_10, %c0_11] : memref<256x128xbf16, #tpu.memory_space<vmem>>, vector<256x128xbf16>
    tpu.vector_store %arg6[%c0_10, %c0_11], %14 {strides = array<i32>} : memref<256x128xbf16, #tpu.memory_space<vmem>>, vector<256x128xbf16>,
    return
  }
  func.func @transform_0(%arg0: i32) -> (i32, i32) {
    %c0_i32 = arith.constant 0 : i32
    %c0_i32_0 = arith.constant 0 : i32
    return %arg0, %c0_i32 : i32, i32
  }
  func.func @transform_1(%arg0: i32) -> (i32, i32) {
    %c0_i32 = arith.constant 0 : i32
    %c0_i32_0 = arith.constant 0 : i32
    %c0_i32_1 = arith.constant 0 : i32
    return %c0_i32, %c0_i32_0 : i32, i32
  }
  func.func @transform_2(%arg0: i32) -> (i32, i32) {
    %c0_i32 = arith.constant 0 : i32
    %c0_i32_0 = arith.constant 0 : i32
    %c0_i32_1 = arith.constant 0 : i32
    return %c0_i32, %c0_i32_0 : i32, i32
  }
  func.func @transform_3(%arg0: i32) -> (i32, i32) {
    %c0_i32 = arith.constant 0 : i32
    %c0_i32_0 = arith.constant 0 : i32
    %c0_i32_1 = arith.constant 0 : i32
    return %c0_i32, %c0_i32_0 : i32, i32
  }
  func.func @transform_4(%arg0: i32) -> (i32, i32) {
    %c0_i32 = arith.constant 0 : i32
    %c0_i32_0 = arith.constant 0 : i32
    return %arg0, %c0_i32 : i32, i32
  }
  func.func @transform_5(%arg0: i32) -> (i32, i32) {
    %c0_i32 = arith.constant 0 : i32
    %c0_i32_0 = arith.constant 0 : i32
    return %arg0, %c0_i32 : i32, i32
  }
}

module attributes {stable_mosaic.version = 11 : i64} {
  func.func @_dense_kernel(%arg0: i32, %arg1: memref<64x128xbf16, #tpu.memory_space<vmem>>, %arg2: memref<128x128xbf16, #tpu.memory_space<vmem>>, %arg3: memref<1x128xf32, #tpu.memory_space<vmem>>, %arg4: memref<1x128xf32, #tpu.memory_space<vmem>>, %arg5: memref<64x128xbf16, #tpu.memory_space<vmem>>) attributes {dimension_semantics = [#tpu.dimension_semantics<parallel>], iteration_bounds = array<i64: 1>, scalar_prefetch = 0 : i64, scratch_operands = 0 : i64, tpu.core_type = #tpu.core_type<tc>, window_params = [{transform_indices = @transform_0, window_bounds = array<i64: 64, 128>}, {pipeline_mode = #tpu.pipeline_mode<synchronous>, transform_indices = @transform_1, window_bounds = array<i64: 128, 128>}, {pipeline_mode = #tpu.pipeline_mode<synchronous>, transform_indices = @transform_2, window_bounds = array<i64: 1, 128>}, {pipeline_mode = #tpu.pipeline_mode<synchronous>, transform_indices = @transform_3, window_bounds = array<i64: 1, 128>}, {transform_indices = @transform_4, window_bounds = array<i64: 64, 128>}]} {
    %c0 = arith.constant 0 : index
    %c0_0 = arith.constant 0 : index
    %0 = vector.load %arg1[%c0, %c0_0] : memref<64x128xbf16, #tpu.memory_space<vmem>>, vector<64x128xbf16>
    %c0_1 = arith.constant 0 : index
    %c0_2 = arith.constant 0 : index
    %1 = vector.load %arg2[%c0_1, %c0_2] : memref<128x128xbf16, #tpu.memory_space<vmem>>, vector<128x128xbf16>
    %cst = arith.constant dense<0.000000e+00> : vector<64x128xf32>
    %2 = tpu.matmul %0, %1, %cst {dimension_numbers = #tpu.dot_dimension_numbers<[1], [0], [0], [1], [0, 0, 1, 1], [], []>} : vector<64x128xbf16>, vector<128x128xbf16>, vector<64x128xf32> -> vector<64x128xf32>
    %c0_3 = arith.constant 0 : index
    %c0_4 = arith.constant 0 : index
    %3 = vector.load %arg3[%c0_3, %c0_4] : memref<1x128xf32, #tpu.memory_space<vmem>>, vector<1x128xf32>
    %4 = vector.broadcast %3 : vector<1x128xf32> to vector<64x128xf32>
    %5 = arith.mulf %2, %4 : vector<64x128xf32>
    %c0_5 = arith.constant 0 : index
    %c0_6 = arith.constant 0 : index
    %6 = vector.load %arg4[%c0_5, %c0_6] : memref<1x128xf32, #tpu.memory_space<vmem>>, vector<1x128xf32>
    %7 = vector.broadcast %6 : vector<1x128xf32> to vector<64x128xf32>
    %8 = arith.addf %5, %7 : vector<64x128xf32>
    %cst_7 = arith.constant 0.000000e+00 : f32
    %9 = vector.broadcast %cst_7 : f32 to vector<64x128xf32>
    %10 = arith.maximumf %8, %9 : vector<64x128xf32>
    %11 = arith.truncf %10 : vector<64x128xf32> to vector<64x128xbf16>
    %c0_8 = arith.constant 0 : index
    %c0_9 = arith.constant 0 : index
    %12 = vector.load %arg5[%c0_8, %c0_9] : memref<64x128xbf16, #tpu.memory_space<vmem>>, vector<64x128xbf16>
    tpu.vector_store %arg5[%c0_8, %c0_9], %11 {strides = array<i32>} : memref<64x128xbf16, #tpu.memory_space<vmem>>, vector<64x128xbf16>,
    return
  }
  func.func @transform_0(%arg0: i32) -> (i32, i32) {
    %c0_i32 = arith.constant 0 : i32
    %c0_i32_0 = arith.constant 0 : i32
    return %arg0, %c0_i32 : i32, i32
  }
  func.func @transform_1(%arg0: i32) -> (i32, i32) {
    %c0_i32 = arith.constant 0 : i32
    %c0_i32_0 = arith.constant 0 : i32
    %c0_i32_1 = arith.constant 0 : i32
    return %c0_i32, %c0_i32_0 : i32, i32
  }
  func.func @transform_2(%arg0: i32) -> (i32, i32) {
    %c0_i32 = arith.constant 0 : i32
    %c0_i32_0 = arith.constant 0 : i32
    %c0_i32_1 = arith.constant 0 : i32
    return %c0_i32, %c0_i32_0 : i32, i32
  }
  func.func @transform_3(%arg0: i32) -> (i32, i32) {
    %c0_i32 = arith.constant 0 : i32
    %c0_i32_0 = arith.constant 0 : i32
    %c0_i32_1 = arith.constant 0 : i32
    return %c0_i32, %c0_i32_0 : i32, i32
  }
  func.func @transform_4(%arg0: i32) -> (i32, i32) {
    %c0_i32 = arith.constant 0 : i32
    %c0_i32_0 = arith.constant 0 : i32
    return %arg0, %c0_i32 : i32, i32
  }
}

module attributes {stable_mosaic.version = 11 : i64} {
  func.func @_dense_kernel(%arg0: i32, %arg1: memref<64x128xbf16, #tpu.memory_space<vmem>>, %arg2: memref<128x128xbf16, #tpu.memory_space<vmem>>, %arg3: memref<1x128xf32, #tpu.memory_space<vmem>>, %arg4: memref<1x128xf32, #tpu.memory_space<vmem>>, %arg5: memref<64x128xbf16, #tpu.memory_space<vmem>>, %arg6: memref<64x128xbf16, #tpu.memory_space<vmem>>) attributes {dimension_semantics = [#tpu.dimension_semantics<parallel>], iteration_bounds = array<i64: 1>, scalar_prefetch = 0 : i64, scratch_operands = 0 : i64, tpu.core_type = #tpu.core_type<tc>, window_params = [{transform_indices = @transform_0, window_bounds = array<i64: 64, 128>}, {pipeline_mode = #tpu.pipeline_mode<synchronous>, transform_indices = @transform_1, window_bounds = array<i64: 128, 128>}, {pipeline_mode = #tpu.pipeline_mode<synchronous>, transform_indices = @transform_2, window_bounds = array<i64: 1, 128>}, {pipeline_mode = #tpu.pipeline_mode<synchronous>, transform_indices = @transform_3, window_bounds = array<i64: 1, 128>}, {transform_indices = @transform_4, window_bounds = array<i64: 64, 128>}, {transform_indices = @transform_5, window_bounds = array<i64: 64, 128>}]} {
    %c0 = arith.constant 0 : index
    %c0_0 = arith.constant 0 : index
    %0 = vector.load %arg1[%c0, %c0_0] : memref<64x128xbf16, #tpu.memory_space<vmem>>, vector<64x128xbf16>
    %c0_1 = arith.constant 0 : index
    %c0_2 = arith.constant 0 : index
    %1 = vector.load %arg2[%c0_1, %c0_2] : memref<128x128xbf16, #tpu.memory_space<vmem>>, vector<128x128xbf16>
    %cst = arith.constant dense<0.000000e+00> : vector<64x128xf32>
    %2 = tpu.matmul %0, %1, %cst {dimension_numbers = #tpu.dot_dimension_numbers<[1], [0], [0], [1], [0, 0, 1, 1], [], []>} : vector<64x128xbf16>, vector<128x128xbf16>, vector<64x128xf32> -> vector<64x128xf32>
    %c0_3 = arith.constant 0 : index
    %c0_4 = arith.constant 0 : index
    %3 = vector.load %arg3[%c0_3, %c0_4] : memref<1x128xf32, #tpu.memory_space<vmem>>, vector<1x128xf32>
    %4 = vector.broadcast %3 : vector<1x128xf32> to vector<64x128xf32>
    %5 = arith.mulf %2, %4 : vector<64x128xf32>
    %c0_5 = arith.constant 0 : index
    %c0_6 = arith.constant 0 : index
    %6 = vector.load %arg4[%c0_5, %c0_6] : memref<1x128xf32, #tpu.memory_space<vmem>>, vector<1x128xf32>
    %7 = vector.broadcast %6 : vector<1x128xf32> to vector<64x128xf32>
    %8 = arith.addf %5, %7 : vector<64x128xf32>
    %c0_7 = arith.constant 0 : index
    %c0_8 = arith.constant 0 : index
    %9 = vector.load %arg5[%c0_7, %c0_8] : memref<64x128xbf16, #tpu.memory_space<vmem>>, vector<64x128xbf16>
    %10 = arith.extf %9 : vector<64x128xbf16> to vector<64x128xf32>
    %11 = arith.addf %8, %10 : vector<64x128xf32>
    %cst_9 = arith.constant 0.000000e+00 : f32
    %12 = vector.broadcast %cst_9 : f32 to vector<64x128xf32>
    %13 = arith.maximumf %11, %12 : vector<64x128xf32>
    %14 = arith.truncf %13 : vector<64x128xf32> to vector<64x128xbf16>
    %c0_10 = arith.constant 0 : index
    %c0_11 = arith.constant 0 : index
    %15 = vector.load %arg6[%c0_10, %c0_11] : memref<64x128xbf16, #tpu.memory_space<vmem>>, vector<64x128xbf16>
    tpu.vector_store %arg6[%c0_10, %c0_11], %14 {strides = array<i32>} : memref<64x128xbf16, #tpu.memory_space<vmem>>, vector<64x128xbf16>,
    return
  }
  func.func @transform_0(%arg0: i32) -> (i32, i32) {
    %c0_i32 = arith.constant 0 : i32
    %c0_i32_0 = arith.constant 0 : i32
    return %arg0, %c0_i32 : i32, i32
  }
  func.func @transform_1(%arg0: i32) -> (i32, i32) {
    %c0_i32 = arith.constant 0 : i32
    %c0_i32_0 = arith.constant 0 : i32
    %c0_i32_1 = arith.constant 0 : i32
    return %c0_i32, %c0_i32_0 : i32, i32
  }
  func.func @transform_2(%arg0: i32) -> (i32, i32) {
    %c0_i32 = arith.constant 0 : i32
    %c0_i32_0 = arith.constant 0 : i32
    %c0_i32_1 = arith.constant 0 : i32
    return %c0_i32, %c0_i32_0 : i32, i32
  }
  func.func @transform_3(%arg0: i32) -> (i32, i32) {
    %c0_i32 = arith.constant 0 : i32
    %c0_i32_0 = arith.constant 0 : i32
    %c0_i32_1 = arith.constant 0 : i32
    return %c0_i32, %c0_i32_0 : i32, i32
  }
  func.func @transform_4(%arg0: i32) -> (i32, i32) {
    %c0_i32 = arith.constant 0 : i32
    %c0_i32_0 = arith.constant 0 : i32
    return %arg0, %c0_i32 : i32, i32
  }
  func.func @transform_5(%arg0: i32) -> (i32, i32) {
    %c0_i32 = arith.constant 0 : i32
    %c0_i32_0 = arith.constant 0 : i32
    return %arg0, %c0_i32 : i32, i32
  }
}

module attributes {stable_mosaic.version = 11 : i64} {
  func.func @_dense_kernel(%arg0: i32, %arg1: memref<16x128xbf16, #tpu.memory_space<vmem>>, %arg2: memref<128x128xbf16, #tpu.memory_space<vmem>>, %arg3: memref<1x128xf32, #tpu.memory_space<vmem>>, %arg4: memref<1x128xf32, #tpu.memory_space<vmem>>, %arg5: memref<16x128xbf16, #tpu.memory_space<vmem>>) attributes {dimension_semantics = [#tpu.dimension_semantics<parallel>], iteration_bounds = array<i64: 1>, scalar_prefetch = 0 : i64, scratch_operands = 0 : i64, tpu.core_type = #tpu.core_type<tc>, window_params = [{transform_indices = @transform_0, window_bounds = array<i64: 16, 128>}, {pipeline_mode = #tpu.pipeline_mode<synchronous>, transform_indices = @transform_1, window_bounds = array<i64: 128, 128>}, {pipeline_mode = #tpu.pipeline_mode<synchronous>, transform_indices = @transform_2, window_bounds = array<i64: 1, 128>}, {pipeline_mode = #tpu.pipeline_mode<synchronous>, transform_indices = @transform_3, window_bounds = array<i64: 1, 128>}, {transform_indices = @transform_4, window_bounds = array<i64: 16, 128>}]} {
    %c0 = arith.constant 0 : index
    %c0_0 = arith.constant 0 : index
    %0 = vector.load %arg1[%c0, %c0_0] : memref<16x128xbf16, #tpu.memory_space<vmem>>, vector<16x128xbf16>
    %c0_1 = arith.constant 0 : index
    %c0_2 = arith.constant 0 : index
    %1 = vector.load %arg2[%c0_1, %c0_2] : memref<128x128xbf16, #tpu.memory_space<vmem>>, vector<128x128xbf16>
    %cst = arith.constant dense<0.000000e+00> : vector<16x128xf32>
    %2 = tpu.matmul %0, %1, %cst {dimension_numbers = #tpu.dot_dimension_numbers<[1], [0], [0], [1], [0, 0, 1, 1], [], []>} : vector<16x128xbf16>, vector<128x128xbf16>, vector<16x128xf32> -> vector<16x128xf32>
    %c0_3 = arith.constant 0 : index
    %c0_4 = arith.constant 0 : index
    %3 = vector.load %arg3[%c0_3, %c0_4] : memref<1x128xf32, #tpu.memory_space<vmem>>, vector<1x128xf32>
    %4 = vector.broadcast %3 : vector<1x128xf32> to vector<16x128xf32>
    %5 = arith.mulf %2, %4 : vector<16x128xf32>
    %c0_5 = arith.constant 0 : index
    %c0_6 = arith.constant 0 : index
    %6 = vector.load %arg4[%c0_5, %c0_6] : memref<1x128xf32, #tpu.memory_space<vmem>>, vector<1x128xf32>
    %7 = vector.broadcast %6 : vector<1x128xf32> to vector<16x128xf32>
    %8 = arith.addf %5, %7 : vector<16x128xf32>
    %cst_7 = arith.constant 0.000000e+00 : f32
    %9 = vector.broadcast %cst_7 : f32 to vector<16x128xf32>
    %10 = arith.maximumf %8, %9 : vector<16x128xf32>
    %11 = arith.truncf %10 : vector<16x128xf32> to vector<16x128xbf16>
    %c0_8 = arith.constant 0 : index
    %c0_9 = arith.constant 0 : index
    %12 = vector.load %arg5[%c0_8, %c0_9] : memref<16x128xbf16, #tpu.memory_space<vmem>>, vector<16x128xbf16>
    tpu.vector_store %arg5[%c0_8, %c0_9], %11 {strides = array<i32>} : memref<16x128xbf16, #tpu.memory_space<vmem>>, vector<16x128xbf16>,
    return
  }
  func.func @transform_0(%arg0: i32) -> (i32, i32) {
    %c0_i32 = arith.constant 0 : i32
    %c0_i32_0 = arith.constant 0 : i32
    return %arg0, %c0_i32 : i32, i32
  }
  func.func @transform_1(%arg0: i32) -> (i32, i32) {
    %c0_i32 = arith.constant 0 : i32
    %c0_i32_0 = arith.constant 0 : i32
    %c0_i32_1 = arith.constant 0 : i32
    return %c0_i32, %c0_i32_0 : i32, i32
  }
  func.func @transform_2(%arg0: i32) -> (i32, i32) {
    %c0_i32 = arith.constant 0 : i32
    %c0_i32_0 = arith.constant 0 : i32
    %c0_i32_1 = arith.constant 0 : i32
    return %c0_i32, %c0_i32_0 : i32, i32
  }
  func.func @transform_3(%arg0: i32) -> (i32, i32) {
    %c0_i32 = arith.constant 0 : i32
    %c0_i32_0 = arith.constant 0 : i32
    %c0_i32_1 = arith.constant 0 : i32
    return %c0_i32, %c0_i32_0 : i32, i32
  }
  func.func @transform_4(%arg0: i32) -> (i32, i32) {
    %c0_i32 = arith.constant 0 : i32
    %c0_i32_0 = arith.constant 0 : i32
    return %arg0, %c0_i32 : i32, i32
  }
}

module attributes {stable_mosaic.version = 11 : i64} {
  func.func @_dense_kernel(%arg0: i32, %arg1: memref<16x256xbf16, #tpu.memory_space<vmem>>, %arg2: memref<256x128xbf16, #tpu.memory_space<vmem>>, %arg3: memref<1x128xf32, #tpu.memory_space<vmem>>, %arg4: memref<1x128xf32, #tpu.memory_space<vmem>>, %arg5: memref<16x128xbf16, #tpu.memory_space<vmem>>) attributes {dimension_semantics = [#tpu.dimension_semantics<parallel>], iteration_bounds = array<i64: 1>, scalar_prefetch = 0 : i64, scratch_operands = 0 : i64, tpu.core_type = #tpu.core_type<tc>, window_params = [{transform_indices = @transform_0, window_bounds = array<i64: 16, 256>}, {pipeline_mode = #tpu.pipeline_mode<synchronous>, transform_indices = @transform_1, window_bounds = array<i64: 256, 128>}, {pipeline_mode = #tpu.pipeline_mode<synchronous>, transform_indices = @transform_2, window_bounds = array<i64: 1, 128>}, {pipeline_mode = #tpu.pipeline_mode<synchronous>, transform_indices = @transform_3, window_bounds = array<i64: 1, 128>}, {transform_indices = @transform_4, window_bounds = array<i64: 16, 128>}]} {
    %c0 = arith.constant 0 : index
    %c0_0 = arith.constant 0 : index
    %0 = vector.load %arg1[%c0, %c0_0] : memref<16x256xbf16, #tpu.memory_space<vmem>>, vector<16x256xbf16>
    %c0_1 = arith.constant 0 : index
    %c0_2 = arith.constant 0 : index
    %1 = vector.load %arg2[%c0_1, %c0_2] : memref<256x128xbf16, #tpu.memory_space<vmem>>, vector<256x128xbf16>
    %cst = arith.constant dense<0.000000e+00> : vector<16x128xf32>
    %2 = tpu.matmul %0, %1, %cst {dimension_numbers = #tpu.dot_dimension_numbers<[1], [0], [0], [1], [0, 0, 1, 1], [], []>} : vector<16x256xbf16>, vector<256x128xbf16>, vector<16x128xf32> -> vector<16x128xf32>
    %c0_3 = arith.constant 0 : index
    %c0_4 = arith.constant 0 : index
    %3 = vector.load %arg3[%c0_3, %c0_4] : memref<1x128xf32, #tpu.memory_space<vmem>>, vector<1x128xf32>
    %4 = vector.broadcast %3 : vector<1x128xf32> to vector<16x128xf32>
    %5 = arith.mulf %2, %4 : vector<16x128xf32>
    %c0_5 = arith.constant 0 : index
    %c0_6 = arith.constant 0 : index
    %6 = vector.load %arg4[%c0_5, %c0_6] : memref<1x128xf32, #tpu.memory_space<vmem>>, vector<1x128xf32>
    %7 = vector.broadcast %6 : vector<1x128xf32> to vector<16x128xf32>
    %8 = arith.addf %5, %7 : vector<16x128xf32>
    %cst_7 = arith.constant 0.000000e+00 : f32
    %9 = vector.broadcast %cst_7 : f32 to vector<16x128xf32>
    %10 = arith.maximumf %8, %9 : vector<16x128xf32>
    %11 = arith.truncf %10 : vector<16x128xf32> to vector<16x128xbf16>
    %c0_8 = arith.constant 0 : index
    %c0_9 = arith.constant 0 : index
    %12 = vector.load %arg5[%c0_8, %c0_9] : memref<16x128xbf16, #tpu.memory_space<vmem>>, vector<16x128xbf16>
    tpu.vector_store %arg5[%c0_8, %c0_9], %11 {strides = array<i32>} : memref<16x128xbf16, #tpu.memory_space<vmem>>, vector<16x128xbf16>,
    return
  }
  func.func @transform_0(%arg0: i32) -> (i32, i32) {
    %c0_i32 = arith.constant 0 : i32
    %c0_i32_0 = arith.constant 0 : i32
    return %arg0, %c0_i32 : i32, i32
  }
  func.func @transform_1(%arg0: i32) -> (i32, i32) {
    %c0_i32 = arith.constant 0 : i32
    %c0_i32_0 = arith.constant 0 : i32
    %c0_i32_1 = arith.constant 0 : i32
    return %c0_i32, %c0_i32_0 : i32, i32
  }
  func.func @transform_2(%arg0: i32) -> (i32, i32) {
    %c0_i32 = arith.constant 0 : i32
    %c0_i32_0 = arith.constant 0 : i32
    %c0_i32_1 = arith.constant 0 : i32
    return %c0_i32, %c0_i32_0 : i32, i32
  }
  func.func @transform_3(%arg0: i32) -> (i32, i32) {
    %c0_i32 = arith.constant 0 : i32
    %c0_i32_0 = arith.constant 0 : i32
    %c0_i32_1 = arith.constant 0 : i32
    return %c0_i32, %c0_i32_0 : i32, i32
  }
  func.func @transform_4(%arg0: i32) -> (i32, i32) {
    %c0_i32 = arith.constant 0 : i32
    %c0_i32_0 = arith.constant 0 : i32
    return %arg0, %c0_i32 : i32, i32
  }
}

module attributes {stable_mosaic.version = 11 : i64} {
  func.func @_dense_kernel(%arg0: i32, %arg1: memref<8x128xbf16, #tpu.memory_space<vmem>>, %arg2: memref<128x128xbf16, #tpu.memory_space<vmem>>, %arg3: memref<1x128xf32, #tpu.memory_space<vmem>>, %arg4: memref<1x128xf32, #tpu.memory_space<vmem>>, %arg5: memref<8x128xbf16, #tpu.memory_space<vmem>>) attributes {dimension_semantics = [#tpu.dimension_semantics<parallel>], iteration_bounds = array<i64: 1>, scalar_prefetch = 0 : i64, scratch_operands = 0 : i64, tpu.core_type = #tpu.core_type<tc>, window_params = [{transform_indices = @transform_0, window_bounds = array<i64: 8, 128>}, {pipeline_mode = #tpu.pipeline_mode<synchronous>, transform_indices = @transform_1, window_bounds = array<i64: 128, 128>}, {pipeline_mode = #tpu.pipeline_mode<synchronous>, transform_indices = @transform_2, window_bounds = array<i64: 1, 128>}, {pipeline_mode = #tpu.pipeline_mode<synchronous>, transform_indices = @transform_3, window_bounds = array<i64: 1, 128>}, {transform_indices = @transform_4, window_bounds = array<i64: 8, 128>}]} {
    %c0 = arith.constant 0 : index
    %c0_0 = arith.constant 0 : index
    %0 = vector.load %arg1[%c0, %c0_0] : memref<8x128xbf16, #tpu.memory_space<vmem>>, vector<8x128xbf16>
    %c0_1 = arith.constant 0 : index
    %c0_2 = arith.constant 0 : index
    %1 = vector.load %arg2[%c0_1, %c0_2] : memref<128x128xbf16, #tpu.memory_space<vmem>>, vector<128x128xbf16>
    %cst = arith.constant dense<0.000000e+00> : vector<8x128xf32>
    %2 = tpu.matmul %0, %1, %cst {dimension_numbers = #tpu.dot_dimension_numbers<[1], [0], [0], [1], [0, 0, 1, 1], [], []>} : vector<8x128xbf16>, vector<128x128xbf16>, vector<8x128xf32> -> vector<8x128xf32>
    %c0_3 = arith.constant 0 : index
    %c0_4 = arith.constant 0 : index
    %3 = vector.load %arg3[%c0_3, %c0_4] : memref<1x128xf32, #tpu.memory_space<vmem>>, vector<1x128xf32>
    %4 = vector.broadcast %3 : vector<1x128xf32> to vector<8x128xf32>
    %5 = arith.mulf %2, %4 : vector<8x128xf32>
    %c0_5 = arith.constant 0 : index
    %c0_6 = arith.constant 0 : index
    %6 = vector.load %arg4[%c0_5, %c0_6] : memref<1x128xf32, #tpu.memory_space<vmem>>, vector<1x128xf32>
    %7 = vector.broadcast %6 : vector<1x128xf32> to vector<8x128xf32>
    %8 = arith.addf %5, %7 : vector<8x128xf32>
    %cst_7 = arith.constant 0.000000e+00 : f32
    %9 = vector.broadcast %cst_7 : f32 to vector<8x128xf32>
    %10 = arith.maximumf %8, %9 : vector<8x128xf32>
    %11 = arith.truncf %10 : vector<8x128xf32> to vector<8x128xbf16>
    %c0_8 = arith.constant 0 : index
    %c0_9 = arith.constant 0 : index
    %12 = vector.load %arg5[%c0_8, %c0_9] : memref<8x128xbf16, #tpu.memory_space<vmem>>, vector<8x128xbf16>
    tpu.vector_store %arg5[%c0_8, %c0_9], %11 {strides = array<i32>} : memref<8x128xbf16, #tpu.memory_space<vmem>>, vector<8x128xbf16>,
    return
  }
  func.func @transform_0(%arg0: i32) -> (i32, i32) {
    %c0_i32 = arith.constant 0 : i32
    %c0_i32_0 = arith.constant 0 : i32
    return %arg0, %c0_i32 : i32, i32
  }
  func.func @transform_1(%arg0: i32) -> (i32, i32) {
    %c0_i32 = arith.constant 0 : i32
    %c0_i32_0 = arith.constant 0 : i32
    %c0_i32_1 = arith.constant 0 : i32
    return %c0_i32, %c0_i32_0 : i32, i32
  }
  func.func @transform_2(%arg0: i32) -> (i32, i32) {
    %c0_i32 = arith.constant 0 : i32
    %c0_i32_0 = arith.constant 0 : i32
    %c0_i32_1 = arith.constant 0 : i32
    return %c0_i32, %c0_i32_0 : i32, i32
  }
  func.func @transform_3(%arg0: i32) -> (i32, i32) {
    %c0_i32 = arith.constant 0 : i32
    %c0_i32_0 = arith.constant 0 : i32
    %c0_i32_1 = arith.constant 0 : i32
    return %c0_i32, %c0_i32_0 : i32, i32
  }
  func.func @transform_4(%arg0: i32) -> (i32, i32) {
    %c0_i32 = arith.constant 0 : i32
    %c0_i32_0 = arith.constant 0 : i32
    return %arg0, %c0_i32 : i32, i32
  }
}

module attributes {stable_mosaic.version = 11 : i64} {
  func.func @_dense_kernel(%arg0: i32, %arg1: memref<16x256xbf16, #tpu.memory_space<vmem>>, %arg2: memref<256x128xbf16, #tpu.memory_space<vmem>>, %arg3: memref<1x128xf32, #tpu.memory_space<vmem>>, %arg4: memref<1x128xf32, #tpu.memory_space<vmem>>, %arg5: memref<16x128xbf16, #tpu.memory_space<vmem>>, %arg6: memref<16x128xbf16, #tpu.memory_space<vmem>>) attributes {dimension_semantics = [#tpu.dimension_semantics<parallel>], iteration_bounds = array<i64: 1>, scalar_prefetch = 0 : i64, scratch_operands = 0 : i64, tpu.core_type = #tpu.core_type<tc>, window_params = [{transform_indices = @transform_0, window_bounds = array<i64: 16, 256>}, {pipeline_mode = #tpu.pipeline_mode<synchronous>, transform_indices = @transform_1, window_bounds = array<i64: 256, 128>}, {pipeline_mode = #tpu.pipeline_mode<synchronous>, transform_indices = @transform_2, window_bounds = array<i64: 1, 128>}, {pipeline_mode = #tpu.pipeline_mode<synchronous>, transform_indices = @transform_3, window_bounds = array<i64: 1, 128>}, {transform_indices = @transform_4, window_bounds = array<i64: 16, 128>}, {transform_indices = @transform_5, window_bounds = array<i64: 16, 128>}]} {
    %c0 = arith.constant 0 : index
    %c0_0 = arith.constant 0 : index
    %0 = vector.load %arg1[%c0, %c0_0] : memref<16x256xbf16, #tpu.memory_space<vmem>>, vector<16x256xbf16>
    %c0_1 = arith.constant 0 : index
    %c0_2 = arith.constant 0 : index
    %1 = vector.load %arg2[%c0_1, %c0_2] : memref<256x128xbf16, #tpu.memory_space<vmem>>, vector<256x128xbf16>
    %cst = arith.constant dense<0.000000e+00> : vector<16x128xf32>
    %2 = tpu.matmul %0, %1, %cst {dimension_numbers = #tpu.dot_dimension_numbers<[1], [0], [0], [1], [0, 0, 1, 1], [], []>} : vector<16x256xbf16>, vector<256x128xbf16>, vector<16x128xf32> -> vector<16x128xf32>
    %c0_3 = arith.constant 0 : index
    %c0_4 = arith.constant 0 : index
    %3 = vector.load %arg3[%c0_3, %c0_4] : memref<1x128xf32, #tpu.memory_space<vmem>>, vector<1x128xf32>
    %4 = vector.broadcast %3 : vector<1x128xf32> to vector<16x128xf32>
    %5 = arith.mulf %2, %4 : vector<16x128xf32>
    %c0_5 = arith.constant 0 : index
    %c0_6 = arith.constant 0 : index
    %6 = vector.load %arg4[%c0_5, %c0_6] : memref<1x128xf32, #tpu.memory_space<vmem>>, vector<1x128xf32>
    %7 = vector.broadcast %6 : vector<1x128xf32> to vector<16x128xf32>
    %8 = arith.addf %5, %7 : vector<16x128xf32>
    %c0_7 = arith.constant 0 : index
    %c0_8 = arith.constant 0 : index
    %9 = vector.load %arg5[%c0_7, %c0_8] : memref<16x128xbf16, #tpu.memory_space<vmem>>, vector<16x128xbf16>
    %10 = arith.extf %9 : vector<16x128xbf16> to vector<16x128xf32>
    %11 = arith.addf %8, %10 : vector<16x128xf32>
    %cst_9 = arith.constant 0.000000e+00 : f32
    %12 = vector.broadcast %cst_9 : f32 to vector<16x128xf32>
    %13 = arith.maximumf %11, %12 : vector<16x128xf32>
    %14 = arith.truncf %13 : vector<16x128xf32> to vector<16x128xbf16>
    %c0_10 = arith.constant 0 : index
    %c0_11 = arith.constant 0 : index
    %15 = vector.load %arg6[%c0_10, %c0_11] : memref<16x128xbf16, #tpu.memory_space<vmem>>, vector<16x128xbf16>
    tpu.vector_store %arg6[%c0_10, %c0_11], %14 {strides = array<i32>} : memref<16x128xbf16, #tpu.memory_space<vmem>>, vector<16x128xbf16>,
    return
  }
  func.func @transform_0(%arg0: i32) -> (i32, i32) {
    %c0_i32 = arith.constant 0 : i32
    %c0_i32_0 = arith.constant 0 : i32
    return %arg0, %c0_i32 : i32, i32
  }
  func.func @transform_1(%arg0: i32) -> (i32, i32) {
    %c0_i32 = arith.constant 0 : i32
    %c0_i32_0 = arith.constant 0 : i32
    %c0_i32_1 = arith.constant 0 : i32
    return %c0_i32, %c0_i32_0 : i32, i32
  }
  func.func @transform_2(%arg0: i32) -> (i32, i32) {
    %c0_i32 = arith.constant 0 : i32
    %c0_i32_0 = arith.constant 0 : i32
    %c0_i32_1 = arith.constant 0 : i32
    return %c0_i32, %c0_i32_0 : i32, i32
  }
  func.func @transform_3(%arg0: i32) -> (i32, i32) {
    %c0_i32 = arith.constant 0 : i32
    %c0_i32_0 = arith.constant 0 : i32
    %c0_i32_1 = arith.constant 0 : i32
    return %c0_i32, %c0_i32_0 : i32, i32
  }
  func.func @transform_4(%arg0: i32) -> (i32, i32) {
    %c0_i32 = arith.constant 0 : i32
    %c0_i32_0 = arith.constant 0 : i32
    return %arg0, %c0_i32 : i32, i32
  }
  func.func @transform_5(%arg0: i32) -> (i32, i32) {
    %c0_i32 = arith.constant 0 : i32
    %c0_i32_0 = arith.constant 0 : i32
    return %arg0, %c0_i32 : i32, i32
  }
}

module attributes {stable_mosaic.version = 11 : i64} {
  func.func @_dense_kernel(%arg0: i32, %arg1: memref<8x512xbf16, #tpu.memory_space<vmem>>, %arg2: memref<512x128xbf16, #tpu.memory_space<vmem>>, %arg3: memref<1x128xf32, #tpu.memory_space<vmem>>, %arg4: memref<1x128xf32, #tpu.memory_space<vmem>>, %arg5: memref<8x128xbf16, #tpu.memory_space<vmem>>) attributes {dimension_semantics = [#tpu.dimension_semantics<parallel>], iteration_bounds = array<i64: 1>, scalar_prefetch = 0 : i64, scratch_operands = 0 : i64, tpu.core_type = #tpu.core_type<tc>, window_params = [{transform_indices = @transform_0, window_bounds = array<i64: 8, 512>}, {pipeline_mode = #tpu.pipeline_mode<synchronous>, transform_indices = @transform_1, window_bounds = array<i64: 512, 128>}, {pipeline_mode = #tpu.pipeline_mode<synchronous>, transform_indices = @transform_2, window_bounds = array<i64: 1, 128>}, {pipeline_mode = #tpu.pipeline_mode<synchronous>, transform_indices = @transform_3, window_bounds = array<i64: 1, 128>}, {transform_indices = @transform_4, window_bounds = array<i64: 8, 128>}]} {
    %c0 = arith.constant 0 : index
    %c0_0 = arith.constant 0 : index
    %0 = vector.load %arg1[%c0, %c0_0] : memref<8x512xbf16, #tpu.memory_space<vmem>>, vector<8x512xbf16>
    %c0_1 = arith.constant 0 : index
    %c0_2 = arith.constant 0 : index
    %1 = vector.load %arg2[%c0_1, %c0_2] : memref<512x128xbf16, #tpu.memory_space<vmem>>, vector<512x128xbf16>
    %cst = arith.constant dense<0.000000e+00> : vector<8x128xf32>
    %2 = tpu.matmul %0, %1, %cst {dimension_numbers = #tpu.dot_dimension_numbers<[1], [0], [0], [1], [0, 0, 1, 1], [], []>} : vector<8x512xbf16>, vector<512x128xbf16>, vector<8x128xf32> -> vector<8x128xf32>
    %c0_3 = arith.constant 0 : index
    %c0_4 = arith.constant 0 : index
    %3 = vector.load %arg3[%c0_3, %c0_4] : memref<1x128xf32, #tpu.memory_space<vmem>>, vector<1x128xf32>
    %4 = vector.broadcast %3 : vector<1x128xf32> to vector<8x128xf32>
    %5 = arith.mulf %2, %4 : vector<8x128xf32>
    %c0_5 = arith.constant 0 : index
    %c0_6 = arith.constant 0 : index
    %6 = vector.load %arg4[%c0_5, %c0_6] : memref<1x128xf32, #tpu.memory_space<vmem>>, vector<1x128xf32>
    %7 = vector.broadcast %6 : vector<1x128xf32> to vector<8x128xf32>
    %8 = arith.addf %5, %7 : vector<8x128xf32>
    %cst_7 = arith.constant 0.000000e+00 : f32
    %9 = vector.broadcast %cst_7 : f32 to vector<8x128xf32>
    %10 = arith.maximumf %8, %9 : vector<8x128xf32>
    %11 = arith.truncf %10 : vector<8x128xf32> to vector<8x128xbf16>
    %c0_8 = arith.constant 0 : index
    %c0_9 = arith.constant 0 : index
    %12 = vector.load %arg5[%c0_8, %c0_9] : memref<8x128xbf16, #tpu.memory_space<vmem>>, vector<8x128xbf16>
    tpu.vector_store %arg5[%c0_8, %c0_9], %11 {strides = array<i32>} : memref<8x128xbf16, #tpu.memory_space<vmem>>, vector<8x128xbf16>,
    return
  }
  func.func @transform_0(%arg0: i32) -> (i32, i32) {
    %c0_i32 = arith.constant 0 : i32
    %c0_i32_0 = arith.constant 0 : i32
    return %arg0, %c0_i32 : i32, i32
  }
  func.func @transform_1(%arg0: i32) -> (i32, i32) {
    %c0_i32 = arith.constant 0 : i32
    %c0_i32_0 = arith.constant 0 : i32
    %c0_i32_1 = arith.constant 0 : i32
    return %c0_i32, %c0_i32_0 : i32, i32
  }
  func.func @transform_2(%arg0: i32) -> (i32, i32) {
    %c0_i32 = arith.constant 0 : i32
    %c0_i32_0 = arith.constant 0 : i32
    %c0_i32_1 = arith.constant 0 : i32
    return %c0_i32, %c0_i32_0 : i32, i32
  }
  func.func @transform_3(%arg0: i32) -> (i32, i32) {
    %c0_i32 = arith.constant 0 : i32
    %c0_i32_0 = arith.constant 0 : i32
    %c0_i32_1 = arith.constant 0 : i32
    return %c0_i32, %c0_i32_0 : i32, i32
  }
  func.func @transform_4(%arg0: i32) -> (i32, i32) {
    %c0_i32 = arith.constant 0 : i32
    %c0_i32_0 = arith.constant 0 : i32
    return %arg0, %c0_i32 : i32, i32
  }
}

module attributes {stable_mosaic.version = 11 : i64} {
  func.func @_dense_kernel(%arg0: i32, %arg1: memref<8x512xbf16, #tpu.memory_space<vmem>>, %arg2: memref<512x128xbf16, #tpu.memory_space<vmem>>, %arg3: memref<1x128xf32, #tpu.memory_space<vmem>>, %arg4: memref<1x128xf32, #tpu.memory_space<vmem>>, %arg5: memref<8x128xbf16, #tpu.memory_space<vmem>>, %arg6: memref<8x128xbf16, #tpu.memory_space<vmem>>) attributes {dimension_semantics = [#tpu.dimension_semantics<parallel>], iteration_bounds = array<i64: 1>, scalar_prefetch = 0 : i64, scratch_operands = 0 : i64, tpu.core_type = #tpu.core_type<tc>, window_params = [{transform_indices = @transform_0, window_bounds = array<i64: 8, 512>}, {pipeline_mode = #tpu.pipeline_mode<synchronous>, transform_indices = @transform_1, window_bounds = array<i64: 512, 128>}, {pipeline_mode = #tpu.pipeline_mode<synchronous>, transform_indices = @transform_2, window_bounds = array<i64: 1, 128>}, {pipeline_mode = #tpu.pipeline_mode<synchronous>, transform_indices = @transform_3, window_bounds = array<i64: 1, 128>}, {transform_indices = @transform_4, window_bounds = array<i64: 8, 128>}, {transform_indices = @transform_5, window_bounds = array<i64: 8, 128>}]} {
    %c0 = arith.constant 0 : index
    %c0_0 = arith.constant 0 : index
    %0 = vector.load %arg1[%c0, %c0_0] : memref<8x512xbf16, #tpu.memory_space<vmem>>, vector<8x512xbf16>
    %c0_1 = arith.constant 0 : index
    %c0_2 = arith.constant 0 : index
    %1 = vector.load %arg2[%c0_1, %c0_2] : memref<512x128xbf16, #tpu.memory_space<vmem>>, vector<512x128xbf16>
    %cst = arith.constant dense<0.000000e+00> : vector<8x128xf32>
    %2 = tpu.matmul %0, %1, %cst {dimension_numbers = #tpu.dot_dimension_numbers<[1], [0], [0], [1], [0, 0, 1, 1], [], []>} : vector<8x512xbf16>, vector<512x128xbf16>, vector<8x128xf32> -> vector<8x128xf32>
    %c0_3 = arith.constant 0 : index
    %c0_4 = arith.constant 0 : index
    %3 = vector.load %arg3[%c0_3, %c0_4] : memref<1x128xf32, #tpu.memory_space<vmem>>, vector<1x128xf32>
    %4 = vector.broadcast %3 : vector<1x128xf32> to vector<8x128xf32>
    %5 = arith.mulf %2, %4 : vector<8x128xf32>
    %c0_5 = arith.constant 0 : index
    %c0_6 = arith.constant 0 : index
    %6 = vector.load %arg4[%c0_5, %c0_6] : memref<1x128xf32, #tpu.memory_space<vmem>>, vector<1x128xf32>
    %7 = vector.broadcast %6 : vector<1x128xf32> to vector<8x128xf32>
    %8 = arith.addf %5, %7 : vector<8x128xf32>
    %c0_7 = arith.constant 0 : index
    %c0_8 = arith.constant 0 : index
    %9 = vector.load %arg5[%c0_7, %c0_8] : memref<8x128xbf16, #tpu.memory_space<vmem>>, vector<8x128xbf16>
    %10 = arith.extf %9 : vector<8x128xbf16> to vector<8x128xf32>
    %11 = arith.addf %8, %10 : vector<8x128xf32>
    %cst_9 = arith.constant 0.000000e+00 : f32
    %12 = vector.broadcast %cst_9 : f32 to vector<8x128xf32>
    %13 = arith.maximumf %11, %12 : vector<8x128xf32>
    %14 = arith.truncf %13 : vector<8x128xf32> to vector<8x128xbf16>
    %c0_10 = arith.constant 0 : index
    %c0_11 = arith.constant 0 : index
    %15 = vector.load %arg6[%c0_10, %c0_11] : memref<8x128xbf16, #tpu.memory_space<vmem>>, vector<8x128xbf16>
    tpu.vector_store %arg6[%c0_10, %c0_11], %14 {strides = array<i32>} : memref<8x128xbf16, #tpu.memory_space<vmem>>, vector<8x128xbf16>,
    return
  }
  func.func @transform_0(%arg0: i32) -> (i32, i32) {
    %c0_i32 = arith.constant 0 : i32
    %c0_i32_0 = arith.constant 0 : i32
    return %arg0, %c0_i32 : i32, i32
  }
  func.func @transform_1(%arg0: i32) -> (i32, i32) {
    %c0_i32 = arith.constant 0 : i32
    %c0_i32_0 = arith.constant 0 : i32
    %c0_i32_1 = arith.constant 0 : i32
    return %c0_i32, %c0_i32_0 : i32, i32
  }
  func.func @transform_2(%arg0: i32) -> (i32, i32) {
    %c0_i32 = arith.constant 0 : i32
    %c0_i32_0 = arith.constant 0 : i32
    %c0_i32_1 = arith.constant 0 : i32
    return %c0_i32, %c0_i32_0 : i32, i32
  }
  func.func @transform_3(%arg0: i32) -> (i32, i32) {
    %c0_i32 = arith.constant 0 : i32
    %c0_i32_0 = arith.constant 0 : i32
    %c0_i32_1 = arith.constant 0 : i32
    return %c0_i32, %c0_i32_0 : i32, i32
  }
  func.func @transform_4(%arg0: i32) -> (i32, i32) {
    %c0_i32 = arith.constant 0 : i32
    %c0_i32_0 = arith.constant 0 : i32
    return %arg0, %c0_i32 : i32, i32
  }
  func.func @transform_5(%arg0: i32) -> (i32, i32) {
    %c0_i32 = arith.constant 0 : i32
    %c0_i32_0 = arith.constant 0 : i32
    return %arg0, %c0_i32 : i32, i32
  }
}

module attributes {stable_mosaic.version = 11 : i64} {
  func.func @_dense_kernel(%arg0: i32, %arg1: memref<8x256xbf16, #tpu.memory_space<vmem>>, %arg2: memref<256x128xbf16, #tpu.memory_space<vmem>>, %arg3: memref<1x128xf32, #tpu.memory_space<vmem>>, %arg4: memref<1x128xf32, #tpu.memory_space<vmem>>, %arg5: memref<8x128xbf16, #tpu.memory_space<vmem>>) attributes {dimension_semantics = [#tpu.dimension_semantics<parallel>], iteration_bounds = array<i64: 1>, scalar_prefetch = 0 : i64, scratch_operands = 0 : i64, tpu.core_type = #tpu.core_type<tc>, window_params = [{transform_indices = @transform_0, window_bounds = array<i64: 8, 256>}, {pipeline_mode = #tpu.pipeline_mode<synchronous>, transform_indices = @transform_1, window_bounds = array<i64: 256, 128>}, {pipeline_mode = #tpu.pipeline_mode<synchronous>, transform_indices = @transform_2, window_bounds = array<i64: 1, 128>}, {pipeline_mode = #tpu.pipeline_mode<synchronous>, transform_indices = @transform_3, window_bounds = array<i64: 1, 128>}, {transform_indices = @transform_4, window_bounds = array<i64: 8, 128>}]} {
    %c0 = arith.constant 0 : index
    %c0_0 = arith.constant 0 : index
    %0 = vector.load %arg1[%c0, %c0_0] : memref<8x256xbf16, #tpu.memory_space<vmem>>, vector<8x256xbf16>
    %c0_1 = arith.constant 0 : index
    %c0_2 = arith.constant 0 : index
    %1 = vector.load %arg2[%c0_1, %c0_2] : memref<256x128xbf16, #tpu.memory_space<vmem>>, vector<256x128xbf16>
    %cst = arith.constant dense<0.000000e+00> : vector<8x128xf32>
    %2 = tpu.matmul %0, %1, %cst {dimension_numbers = #tpu.dot_dimension_numbers<[1], [0], [0], [1], [0, 0, 1, 1], [], []>} : vector<8x256xbf16>, vector<256x128xbf16>, vector<8x128xf32> -> vector<8x128xf32>
    %c0_3 = arith.constant 0 : index
    %c0_4 = arith.constant 0 : index
    %3 = vector.load %arg3[%c0_3, %c0_4] : memref<1x128xf32, #tpu.memory_space<vmem>>, vector<1x128xf32>
    %4 = vector.broadcast %3 : vector<1x128xf32> to vector<8x128xf32>
    %5 = arith.mulf %2, %4 : vector<8x128xf32>
    %c0_5 = arith.constant 0 : index
    %c0_6 = arith.constant 0 : index
    %6 = vector.load %arg4[%c0_5, %c0_6] : memref<1x128xf32, #tpu.memory_space<vmem>>, vector<1x128xf32>
    %7 = vector.broadcast %6 : vector<1x128xf32> to vector<8x128xf32>
    %8 = arith.addf %5, %7 : vector<8x128xf32>
    %cst_7 = arith.constant 0.000000e+00 : f32
    %9 = vector.broadcast %cst_7 : f32 to vector<8x128xf32>
    %10 = arith.maximumf %8, %9 : vector<8x128xf32>
    %11 = arith.truncf %10 : vector<8x128xf32> to vector<8x128xbf16>
    %c0_8 = arith.constant 0 : index
    %c0_9 = arith.constant 0 : index
    %12 = vector.load %arg5[%c0_8, %c0_9] : memref<8x128xbf16, #tpu.memory_space<vmem>>, vector<8x128xbf16>
    tpu.vector_store %arg5[%c0_8, %c0_9], %11 {strides = array<i32>} : memref<8x128xbf16, #tpu.memory_space<vmem>>, vector<8x128xbf16>,
    return
  }
  func.func @transform_0(%arg0: i32) -> (i32, i32) {
    %c0_i32 = arith.constant 0 : i32
    %c0_i32_0 = arith.constant 0 : i32
    return %arg0, %c0_i32 : i32, i32
  }
  func.func @transform_1(%arg0: i32) -> (i32, i32) {
    %c0_i32 = arith.constant 0 : i32
    %c0_i32_0 = arith.constant 0 : i32
    %c0_i32_1 = arith.constant 0 : i32
    return %c0_i32, %c0_i32_0 : i32, i32
  }
  func.func @transform_2(%arg0: i32) -> (i32, i32) {
    %c0_i32 = arith.constant 0 : i32
    %c0_i32_0 = arith.constant 0 : i32
    %c0_i32_1 = arith.constant 0 : i32
    return %c0_i32, %c0_i32_0 : i32, i32
  }
  func.func @transform_3(%arg0: i32) -> (i32, i32) {
    %c0_i32 = arith.constant 0 : i32
    %c0_i32_0 = arith.constant 0 : i32
    %c0_i32_1 = arith.constant 0 : i32
    return %c0_i32, %c0_i32_0 : i32, i32
  }
  func.func @transform_4(%arg0: i32) -> (i32, i32) {
    %c0_i32 = arith.constant 0 : i32
    %c0_i32_0 = arith.constant 0 : i32
    return %arg0, %c0_i32 : i32, i32
  }
}

module attributes {stable_mosaic.version = 11 : i64} {
  func.func @_dense_kernel(%arg0: i32, %arg1: memref<48x128xbf16, #tpu.memory_space<vmem>>, %arg2: memref<128x128xbf16, #tpu.memory_space<vmem>>, %arg3: memref<1x128xf32, #tpu.memory_space<vmem>>, %arg4: memref<1x128xf32, #tpu.memory_space<vmem>>, %arg5: memref<48x128xbf16, #tpu.memory_space<vmem>>) attributes {dimension_semantics = [#tpu.dimension_semantics<parallel>], iteration_bounds = array<i64: 1>, scalar_prefetch = 0 : i64, scratch_operands = 0 : i64, tpu.core_type = #tpu.core_type<tc>, window_params = [{transform_indices = @transform_0, window_bounds = array<i64: 48, 128>}, {pipeline_mode = #tpu.pipeline_mode<synchronous>, transform_indices = @transform_1, window_bounds = array<i64: 128, 128>}, {pipeline_mode = #tpu.pipeline_mode<synchronous>, transform_indices = @transform_2, window_bounds = array<i64: 1, 128>}, {pipeline_mode = #tpu.pipeline_mode<synchronous>, transform_indices = @transform_3, window_bounds = array<i64: 1, 128>}, {transform_indices = @transform_4, window_bounds = array<i64: 48, 128>}]} {
    %c0 = arith.constant 0 : index
    %c0_0 = arith.constant 0 : index
    %0 = vector.load %arg1[%c0, %c0_0] : memref<48x128xbf16, #tpu.memory_space<vmem>>, vector<48x128xbf16>
    %c0_1 = arith.constant 0 : index
    %c0_2 = arith.constant 0 : index
    %1 = vector.load %arg2[%c0_1, %c0_2] : memref<128x128xbf16, #tpu.memory_space<vmem>>, vector<128x128xbf16>
    %cst = arith.constant dense<0.000000e+00> : vector<48x128xf32>
    %2 = tpu.matmul %0, %1, %cst {dimension_numbers = #tpu.dot_dimension_numbers<[1], [0], [0], [1], [0, 0, 1, 1], [], []>} : vector<48x128xbf16>, vector<128x128xbf16>, vector<48x128xf32> -> vector<48x128xf32>
    %c0_3 = arith.constant 0 : index
    %c0_4 = arith.constant 0 : index
    %3 = vector.load %arg3[%c0_3, %c0_4] : memref<1x128xf32, #tpu.memory_space<vmem>>, vector<1x128xf32>
    %4 = vector.broadcast %3 : vector<1x128xf32> to vector<48x128xf32>
    %5 = arith.mulf %2, %4 : vector<48x128xf32>
    %c0_5 = arith.constant 0 : index
    %c0_6 = arith.constant 0 : index
    %6 = vector.load %arg4[%c0_5, %c0_6] : memref<1x128xf32, #tpu.memory_space<vmem>>, vector<1x128xf32>
    %7 = vector.broadcast %6 : vector<1x128xf32> to vector<48x128xf32>
    %8 = arith.addf %5, %7 : vector<48x128xf32>
    %cst_7 = arith.constant 0.000000e+00 : f32
    %9 = vector.broadcast %cst_7 : f32 to vector<48x128xf32>
    %10 = arith.maximumf %8, %9 : vector<48x128xf32>
    %11 = arith.truncf %10 : vector<48x128xf32> to vector<48x128xbf16>
    %c0_8 = arith.constant 0 : index
    %c0_9 = arith.constant 0 : index
    %12 = vector.load %arg5[%c0_8, %c0_9] : memref<48x128xbf16, #tpu.memory_space<vmem>>, vector<48x128xbf16>
    tpu.vector_store %arg5[%c0_8, %c0_9], %11 {strides = array<i32>} : memref<48x128xbf16, #tpu.memory_space<vmem>>, vector<48x128xbf16>,
    return
  }
  func.func @transform_0(%arg0: i32) -> (i32, i32) {
    %c0_i32 = arith.constant 0 : i32
    %c0_i32_0 = arith.constant 0 : i32
    return %arg0, %c0_i32 : i32, i32
  }
  func.func @transform_1(%arg0: i32) -> (i32, i32) {
    %c0_i32 = arith.constant 0 : i32
    %c0_i32_0 = arith.constant 0 : i32
    %c0_i32_1 = arith.constant 0 : i32
    return %c0_i32, %c0_i32_0 : i32, i32
  }
  func.func @transform_2(%arg0: i32) -> (i32, i32) {
    %c0_i32 = arith.constant 0 : i32
    %c0_i32_0 = arith.constant 0 : i32
    %c0_i32_1 = arith.constant 0 : i32
    return %c0_i32, %c0_i32_0 : i32, i32
  }
  func.func @transform_3(%arg0: i32) -> (i32, i32) {
    %c0_i32 = arith.constant 0 : i32
    %c0_i32_0 = arith.constant 0 : i32
    %c0_i32_1 = arith.constant 0 : i32
    return %c0_i32, %c0_i32_0 : i32, i32
  }
  func.func @transform_4(%arg0: i32) -> (i32, i32) {
    %c0_i32 = arith.constant 0 : i32
    %c0_i32_0 = arith.constant 0 : i32
    return %arg0, %c0_i32 : i32, i32
  }
}

module attributes {stable_mosaic.version = 11 : i64} {
  func.func @_dense_kernel(%arg0: i32, %arg1: memref<48x128xbf16, #tpu.memory_space<vmem>>, %arg2: memref<128x128xbf16, #tpu.memory_space<vmem>>, %arg3: memref<1x128xf32, #tpu.memory_space<vmem>>, %arg4: memref<1x128xf32, #tpu.memory_space<vmem>>, %arg5: memref<48x128xbf16, #tpu.memory_space<vmem>>, %arg6: memref<48x128xbf16, #tpu.memory_space<vmem>>) attributes {dimension_semantics = [#tpu.dimension_semantics<parallel>], iteration_bounds = array<i64: 1>, scalar_prefetch = 0 : i64, scratch_operands = 0 : i64, tpu.core_type = #tpu.core_type<tc>, window_params = [{transform_indices = @transform_0, window_bounds = array<i64: 48, 128>}, {pipeline_mode = #tpu.pipeline_mode<synchronous>, transform_indices = @transform_1, window_bounds = array<i64: 128, 128>}, {pipeline_mode = #tpu.pipeline_mode<synchronous>, transform_indices = @transform_2, window_bounds = array<i64: 1, 128>}, {pipeline_mode = #tpu.pipeline_mode<synchronous>, transform_indices = @transform_3, window_bounds = array<i64: 1, 128>}, {transform_indices = @transform_4, window_bounds = array<i64: 48, 128>}, {transform_indices = @transform_5, window_bounds = array<i64: 48, 128>}]} {
    %c0 = arith.constant 0 : index
    %c0_0 = arith.constant 0 : index
    %0 = vector.load %arg1[%c0, %c0_0] : memref<48x128xbf16, #tpu.memory_space<vmem>>, vector<48x128xbf16>
    %c0_1 = arith.constant 0 : index
    %c0_2 = arith.constant 0 : index
    %1 = vector.load %arg2[%c0_1, %c0_2] : memref<128x128xbf16, #tpu.memory_space<vmem>>, vector<128x128xbf16>
    %cst = arith.constant dense<0.000000e+00> : vector<48x128xf32>
    %2 = tpu.matmul %0, %1, %cst {dimension_numbers = #tpu.dot_dimension_numbers<[1], [0], [0], [1], [0, 0, 1, 1], [], []>} : vector<48x128xbf16>, vector<128x128xbf16>, vector<48x128xf32> -> vector<48x128xf32>
    %c0_3 = arith.constant 0 : index
    %c0_4 = arith.constant 0 : index
    %3 = vector.load %arg3[%c0_3, %c0_4] : memref<1x128xf32, #tpu.memory_space<vmem>>, vector<1x128xf32>
    %4 = vector.broadcast %3 : vector<1x128xf32> to vector<48x128xf32>
    %5 = arith.mulf %2, %4 : vector<48x128xf32>
    %c0_5 = arith.constant 0 : index
    %c0_6 = arith.constant 0 : index
    %6 = vector.load %arg4[%c0_5, %c0_6] : memref<1x128xf32, #tpu.memory_space<vmem>>, vector<1x128xf32>
    %7 = vector.broadcast %6 : vector<1x128xf32> to vector<48x128xf32>
    %8 = arith.addf %5, %7 : vector<48x128xf32>
    %c0_7 = arith.constant 0 : index
    %c0_8 = arith.constant 0 : index
    %9 = vector.load %arg5[%c0_7, %c0_8] : memref<48x128xbf16, #tpu.memory_space<vmem>>, vector<48x128xbf16>
    %10 = arith.extf %9 : vector<48x128xbf16> to vector<48x128xf32>
    %11 = arith.addf %8, %10 : vector<48x128xf32>
    %cst_9 = arith.constant 0.000000e+00 : f32
    %12 = vector.broadcast %cst_9 : f32 to vector<48x128xf32>
    %13 = arith.maximumf %11, %12 : vector<48x128xf32>
    %14 = arith.truncf %13 : vector<48x128xf32> to vector<48x128xbf16>
    %c0_10 = arith.constant 0 : index
    %c0_11 = arith.constant 0 : index
    %15 = vector.load %arg6[%c0_10, %c0_11] : memref<48x128xbf16, #tpu.memory_space<vmem>>, vector<48x128xbf16>
    tpu.vector_store %arg6[%c0_10, %c0_11], %14 {strides = array<i32>} : memref<48x128xbf16, #tpu.memory_space<vmem>>, vector<48x128xbf16>,
    return
  }
  func.func @transform_0(%arg0: i32) -> (i32, i32) {
    %c0_i32 = arith.constant 0 : i32
    %c0_i32_0 = arith.constant 0 : i32
    return %arg0, %c0_i32 : i32, i32
  }
  func.func @transform_1(%arg0: i32) -> (i32, i32) {
    %c0_i32 = arith.constant 0 : i32
    %c0_i32_0 = arith.constant 0 : i32
    %c0_i32_1 = arith.constant 0 : i32
    return %c0_i32, %c0_i32_0 : i32, i32
  }
  func.func @transform_2(%arg0: i32) -> (i32, i32) {
    %c0_i32 = arith.constant 0 : i32
    %c0_i32_0 = arith.constant 0 : i32
    %c0_i32_1 = arith.constant 0 : i32
    return %c0_i32, %c0_i32_0 : i32, i32
  }
  func.func @transform_3(%arg0: i32) -> (i32, i32) {
    %c0_i32 = arith.constant 0 : i32
    %c0_i32_0 = arith.constant 0 : i32
    %c0_i32_1 = arith.constant 0 : i32
    return %c0_i32, %c0_i32_0 : i32, i32
  }
  func.func @transform_4(%arg0: i32) -> (i32, i32) {
    %c0_i32 = arith.constant 0 : i32
    %c0_i32_0 = arith.constant 0 : i32
    return %arg0, %c0_i32 : i32, i32
  }
  func.func @transform_5(%arg0: i32) -> (i32, i32) {
    %c0_i32 = arith.constant 0 : i32
    %c0_i32_0 = arith.constant 0 : i32
    return %arg0, %c0_i32 : i32, i32
  }
}

module attributes {stable_mosaic.version = 11 : i64} {
  func.func @_dense_kernel(%arg0: i32, %arg1: memref<16x128xbf16, #tpu.memory_space<vmem>>, %arg2: memref<128x128xbf16, #tpu.memory_space<vmem>>, %arg3: memref<1x128xf32, #tpu.memory_space<vmem>>, %arg4: memref<1x128xf32, #tpu.memory_space<vmem>>, %arg5: memref<16x128xbf16, #tpu.memory_space<vmem>>, %arg6: memref<16x128xbf16, #tpu.memory_space<vmem>>) attributes {dimension_semantics = [#tpu.dimension_semantics<parallel>], iteration_bounds = array<i64: 1>, scalar_prefetch = 0 : i64, scratch_operands = 0 : i64, tpu.core_type = #tpu.core_type<tc>, window_params = [{transform_indices = @transform_0, window_bounds = array<i64: 16, 128>}, {pipeline_mode = #tpu.pipeline_mode<synchronous>, transform_indices = @transform_1, window_bounds = array<i64: 128, 128>}, {pipeline_mode = #tpu.pipeline_mode<synchronous>, transform_indices = @transform_2, window_bounds = array<i64: 1, 128>}, {pipeline_mode = #tpu.pipeline_mode<synchronous>, transform_indices = @transform_3, window_bounds = array<i64: 1, 128>}, {transform_indices = @transform_4, window_bounds = array<i64: 16, 128>}, {transform_indices = @transform_5, window_bounds = array<i64: 16, 128>}]} {
    %c0 = arith.constant 0 : index
    %c0_0 = arith.constant 0 : index
    %0 = vector.load %arg1[%c0, %c0_0] : memref<16x128xbf16, #tpu.memory_space<vmem>>, vector<16x128xbf16>
    %c0_1 = arith.constant 0 : index
    %c0_2 = arith.constant 0 : index
    %1 = vector.load %arg2[%c0_1, %c0_2] : memref<128x128xbf16, #tpu.memory_space<vmem>>, vector<128x128xbf16>
    %cst = arith.constant dense<0.000000e+00> : vector<16x128xf32>
    %2 = tpu.matmul %0, %1, %cst {dimension_numbers = #tpu.dot_dimension_numbers<[1], [0], [0], [1], [0, 0, 1, 1], [], []>} : vector<16x128xbf16>, vector<128x128xbf16>, vector<16x128xf32> -> vector<16x128xf32>
    %c0_3 = arith.constant 0 : index
    %c0_4 = arith.constant 0 : index
    %3 = vector.load %arg3[%c0_3, %c0_4] : memref<1x128xf32, #tpu.memory_space<vmem>>, vector<1x128xf32>
    %4 = vector.broadcast %3 : vector<1x128xf32> to vector<16x128xf32>
    %5 = arith.mulf %2, %4 : vector<16x128xf32>
    %c0_5 = arith.constant 0 : index
    %c0_6 = arith.constant 0 : index
    %6 = vector.load %arg4[%c0_5, %c0_6] : memref<1x128xf32, #tpu.memory_space<vmem>>, vector<1x128xf32>
    %7 = vector.broadcast %6 : vector<1x128xf32> to vector<16x128xf32>
    %8 = arith.addf %5, %7 : vector<16x128xf32>
    %c0_7 = arith.constant 0 : index
    %c0_8 = arith.constant 0 : index
    %9 = vector.load %arg5[%c0_7, %c0_8] : memref<16x128xbf16, #tpu.memory_space<vmem>>, vector<16x128xbf16>
    %10 = arith.extf %9 : vector<16x128xbf16> to vector<16x128xf32>
    %11 = arith.addf %8, %10 : vector<16x128xf32>
    %cst_9 = arith.constant 0.000000e+00 : f32
    %12 = vector.broadcast %cst_9 : f32 to vector<16x128xf32>
    %13 = arith.maximumf %11, %12 : vector<16x128xf32>
    %14 = arith.truncf %13 : vector<16x128xf32> to vector<16x128xbf16>
    %c0_10 = arith.constant 0 : index
    %c0_11 = arith.constant 0 : index
    %15 = vector.load %arg6[%c0_10, %c0_11] : memref<16x128xbf16, #tpu.memory_space<vmem>>, vector<16x128xbf16>
    tpu.vector_store %arg6[%c0_10, %c0_11], %14 {strides = array<i32>} : memref<16x128xbf16, #tpu.memory_space<vmem>>, vector<16x128xbf16>,
    return
  }
  func.func @transform_0(%arg0: i32) -> (i32, i32) {
    %c0_i32 = arith.constant 0 : i32
    %c0_i32_0 = arith.constant 0 : i32
    return %arg0, %c0_i32 : i32, i32
  }
  func.func @transform_1(%arg0: i32) -> (i32, i32) {
    %c0_i32 = arith.constant 0 : i32
    %c0_i32_0 = arith.constant 0 : i32
    %c0_i32_1 = arith.constant 0 : i32
    return %c0_i32, %c0_i32_0 : i32, i32
  }
  func.func @transform_2(%arg0: i32) -> (i32, i32) {
    %c0_i32 = arith.constant 0 : i32
    %c0_i32_0 = arith.constant 0 : i32
    %c0_i32_1 = arith.constant 0 : i32
    return %c0_i32, %c0_i32_0 : i32, i32
  }
  func.func @transform_3(%arg0: i32) -> (i32, i32) {
    %c0_i32 = arith.constant 0 : i32
    %c0_i32_0 = arith.constant 0 : i32
    %c0_i32_1 = arith.constant 0 : i32
    return %c0_i32, %c0_i32_0 : i32, i32
  }
  func.func @transform_4(%arg0: i32) -> (i32, i32) {
    %c0_i32 = arith.constant 0 : i32
    %c0_i32_0 = arith.constant 0 : i32
    return %arg0, %c0_i32 : i32, i32
  }
  func.func @transform_5(%arg0: i32) -> (i32, i32) {
    %c0_i32 = arith.constant 0 : i32
    %c0_i32_0 = arith.constant 0 : i32
    return %arg0, %c0_i32 : i32, i32
  }
}

module attributes {stable_mosaic.version = 11 : i64} {
  func.func @_dense_kernel(%arg0: i32, %arg1: memref<8x128xbf16, #tpu.memory_space<vmem>>, %arg2: memref<128x128xbf16, #tpu.memory_space<vmem>>, %arg3: memref<1x128xf32, #tpu.memory_space<vmem>>, %arg4: memref<1x128xf32, #tpu.memory_space<vmem>>, %arg5: memref<8x128xf32, #tpu.memory_space<vmem>>) attributes {dimension_semantics = [#tpu.dimension_semantics<parallel>], iteration_bounds = array<i64: 1>, scalar_prefetch = 0 : i64, scratch_operands = 0 : i64, tpu.core_type = #tpu.core_type<tc>, window_params = [{transform_indices = @transform_0, window_bounds = array<i64: 8, 128>}, {pipeline_mode = #tpu.pipeline_mode<synchronous>, transform_indices = @transform_1, window_bounds = array<i64: 128, 128>}, {pipeline_mode = #tpu.pipeline_mode<synchronous>, transform_indices = @transform_2, window_bounds = array<i64: 1, 128>}, {pipeline_mode = #tpu.pipeline_mode<synchronous>, transform_indices = @transform_3, window_bounds = array<i64: 1, 128>}, {transform_indices = @transform_4, window_bounds = array<i64: 8, 128>}]} {
    %c0 = arith.constant 0 : index
    %c0_0 = arith.constant 0 : index
    %0 = vector.load %arg1[%c0, %c0_0] : memref<8x128xbf16, #tpu.memory_space<vmem>>, vector<8x128xbf16>
    %c0_1 = arith.constant 0 : index
    %c0_2 = arith.constant 0 : index
    %1 = vector.load %arg2[%c0_1, %c0_2] : memref<128x128xbf16, #tpu.memory_space<vmem>>, vector<128x128xbf16>
    %cst = arith.constant dense<0.000000e+00> : vector<8x128xf32>
    %2 = tpu.matmul %0, %1, %cst {dimension_numbers = #tpu.dot_dimension_numbers<[1], [0], [0], [1], [0, 0, 1, 1], [], []>} : vector<8x128xbf16>, vector<128x128xbf16>, vector<8x128xf32> -> vector<8x128xf32>
    %c0_3 = arith.constant 0 : index
    %c0_4 = arith.constant 0 : index
    %3 = vector.load %arg3[%c0_3, %c0_4] : memref<1x128xf32, #tpu.memory_space<vmem>>, vector<1x128xf32>
    %4 = vector.broadcast %3 : vector<1x128xf32> to vector<8x128xf32>
    %5 = arith.mulf %2, %4 : vector<8x128xf32>
    %c0_5 = arith.constant 0 : index
    %c0_6 = arith.constant 0 : index
    %6 = vector.load %arg4[%c0_5, %c0_6] : memref<1x128xf32, #tpu.memory_space<vmem>>, vector<1x128xf32>
    %7 = vector.broadcast %6 : vector<1x128xf32> to vector<8x128xf32>
    %8 = arith.addf %5, %7 : vector<8x128xf32>
    %cst_7 = arith.constant 0.000000e+00 : f32
    %9 = vector.broadcast %cst_7 : f32 to vector<8x128xf32>
    %10 = arith.maximumf %8, %9 : vector<8x128xf32>
    %c0_8 = arith.constant 0 : index
    %c0_9 = arith.constant 0 : index
    %11 = vector.load %arg5[%c0_8, %c0_9] : memref<8x128xf32, #tpu.memory_space<vmem>>, vector<8x128xf32>
    tpu.vector_store %arg5[%c0_8, %c0_9], %10 {strides = array<i32>} : memref<8x128xf32, #tpu.memory_space<vmem>>, vector<8x128xf32>,
    return
  }
  func.func @transform_0(%arg0: i32) -> (i32, i32) {
    %c0_i32 = arith.constant 0 : i32
    %c0_i32_0 = arith.constant 0 : i32
    return %arg0, %c0_i32 : i32, i32
  }
  func.func @transform_1(%arg0: i32) -> (i32, i32) {
    %c0_i32 = arith.constant 0 : i32
    %c0_i32_0 = arith.constant 0 : i32
    %c0_i32_1 = arith.constant 0 : i32
    return %c0_i32, %c0_i32_0 : i32, i32
  }
  func.func @transform_2(%arg0: i32) -> (i32, i32) {
    %c0_i32 = arith.constant 0 : i32
    %c0_i32_0 = arith.constant 0 : i32
    %c0_i32_1 = arith.constant 0 : i32
    return %c0_i32, %c0_i32_0 : i32, i32
  }
  func.func @transform_3(%arg0: i32) -> (i32, i32) {
    %c0_i32 = arith.constant 0 : i32
    %c0_i32_0 = arith.constant 0 : i32
    %c0_i32_1 = arith.constant 0 : i32
    return %c0_i32, %c0_i32_0 : i32, i32
  }
  func.func @transform_4(%arg0: i32) -> (i32, i32) {
    %c0_i32 = arith.constant 0 : i32
    %c0_i32_0 = arith.constant 0 : i32
    return %arg0, %c0_i32 : i32, i32
  }
}

</mosaic_0001>

<bundles_post_ra>
// kernel: _forward_jit.21
= control target key start
LH: loop header
LB: loop body
LE: loop exit
PB: predicated region body
PF: predicated region fallthrough
CT: control target
= control target key end

     0   :  { %s930_s1 = inlined_call_operand.vmem [shape: bf16[128,128], index: 1, kind: input, shape index: {}]   ;;  %s931_s2 = inlined_call_operand.vmem [shape: f32[1,128], index: 2, kind: input, shape index: {}]   ;;  %s932_s3 = inlined_call_operand.vmem [shape: f32[1,128], index: 3, kind: input, shape index: {}]   ;;  %s933_s0 = inlined_call_operand.vmem [shape: bf16[256,128], index: 0, kind: input, shape index: {}]   ;;  %s934_s4 = inlined_call_operand.vmem [shape: bf16[256,128], index: 4, kind: output, shape index: {}]  }
   0x1   :  { %v589_v0 = vld [vmem:[%s930_s1 + $0x38] sm:$0xff]  ;;  %v588_v1 = vld [vmem:[%s930_s1 + $0x30] sm:$0xff]  ;;  %v587_v2 = vld [vmem:[%s930_s1 + $0x28] sm:$0xff] }
   0x2   :  { %209 = vmatpush.bf16.msra.mxu0 %v589_v0  ;;  %685 = vmatpush.bf16.msra.mxu1 %v589_v0  ;;  %v586_v3 = vld [vmem:[%s930_s1 + $0x20] sm:$0xff]  ;;  %v585_v4 = vld [vmem:[%s930_s1 + $0x18] sm:$0xff]  ;;  %v584_v5 = vld [vmem:[%s930_s1 + $0x10] sm:$0xff] }
   0x3   :  { %686 = vmatpush.bf16.msra.mxu2 %v589_v0  ;;  %687 = vmatpush.bf16.msra.mxu3 %v589_v0  ;;  %v583_v6 = vld [vmem:[%s930_s1 + $0x8] sm:$0xff]  ;;  %v582_v7 = vld [vmem:[%s930_s1] sm:$0xff]  ;;  %v568_v16 = vld [vmem:[%s933_s0 + $0x10] sm:$0xff] }
   0x4   :  { %v566_v8 = vld [vmem:[%s933_s0] sm:$0xff]  ;;  %v567_v12 = vld [vmem:[%s933_s0 + $0x8] sm:$0xff]  ;;  %v572_v17 = vld [vmem:[%s933_s0 + $0x30] sm:$0xff] }
   0x5   :  { %v570_v9 = vld [vmem:[%s933_s0 + $0x20] sm:$0xff]  ;;  %v571_v13 = vld [vmem:[%s933_s0 + $0x28] sm:$0xff]  ;;  %v576_v18 = vld [vmem:[%s933_s0 + $0x50] sm:$0xff] }
   0x6   :  { %210 = vmatpush.bf16.msra.mxu0 %v588_v1  ;;  %688 = vmatpush.bf16.msra.mxu1 %v588_v1  ;;  %v574_v10 = vld [vmem:[%s933_s0 + $0x40] sm:$0xff]  ;;  %v575_v14 = vld [vmem:[%s933_s0 + $0x48] sm:$0xff]  ;;  %v580_v19 = vld [vmem:[%s933_s0 + $0x70] sm:$0xff] }
   0x7   :  { %689 = vmatpush.bf16.msra.mxu2 %v588_v1  ;;  %690 = vmatpush.bf16.msra.mxu3 %v588_v1  ;;  %v578_v11 = vld [vmem:[%s933_s0 + $0x60] sm:$0xff]  ;;  %v579_v15 = vld [vmem:[%s933_s0 + $0x68] sm:$0xff]  ;;  %v569_v20 = vld [vmem:[%s933_s0 + $0x18] sm:$0xff] }
   0x8   :  { %v573_v21 = vld [vmem:[%s933_s0 + $0x38] sm:$0xff]  ;;  %v811_v26 = vld [vmem:[%s931_s2] ss:$0 sm:$0xff] }
   0x9   :  { %v577_v22 = vld [vmem:[%s933_s0 + $0x58] sm:$0xff]  ;;  %v817_v28 = vld [vmem:[%s932_s3] ss:$0 sm:$0xff] }
   0xa   :  { %211 = vmatpush.bf16.msra.mxu0 %v587_v2  ;;  %691 = vmatpush.bf16.msra.mxu1 %v587_v2  ;;  %v581_v23 = vld [vmem:[%s933_s0 + $0x78] sm:$0xff] }
   0xb   :  { %692 = vmatpush.bf16.msra.mxu2 %v587_v2  ;;  %693 = vmatpush.bf16.msra.mxu3 %v587_v2 }
   0xe   :  { %212 = vmatpush.bf16.msra.mxu0 %v586_v3  ;;  %694 = vmatpush.bf16.msra.mxu1 %v586_v3 }
   0xf   :  { %695 = vmatpush.bf16.msra.mxu2 %v586_v3  ;;  %696 = vmatpush.bf16.msra.mxu3 %v586_v3 }
  0x12   :  { %213 = vmatpush.bf16.msra.mxu0 %v585_v4  ;;  %697 = vmatpush.bf16.msra.mxu1 %v585_v4 }
  0x13   :  { %698 = vmatpush.bf16.msra.mxu2 %v585_v4  ;;  %699 = vmatpush.bf16.msra.mxu3 %v585_v4 }
  0x16   :  { %214 = vmatpush.bf16.msra.mxu0 %v584_v5  ;;  %700 = vmatpush.bf16.msra.mxu1 %v584_v5 }
  0x17   :  { %701 = vmatpush.bf16.msra.mxu2 %v584_v5  ;;  %702 = vmatpush.bf16.msra.mxu3 %v584_v5 }
  0x1a   :  { %215 = vmatpush.bf16.msra.mxu0 %v583_v6  ;;  %703 = vmatpush.bf16.msra.mxu1 %v583_v6 }
  0x1b   :  { %704 = vmatpush.bf16.msra.mxu2 %v583_v6  ;;  %705 = vmatpush.bf16.msra.mxu3 %v583_v6 }
  0x1e   :  { %216 = vmatpush.bf16.msra.mxu0 %v582_v7  ;;  %706 = vmatpush.bf16.msra.mxu1 %v582_v7 }
  0x1f   :  { %707 = vmatpush.bf16.msra.mxu2 %v582_v7  ;;  %708 = vmatpush.bf16.msra.mxu3 %v582_v7 }
  0x21   :  { %217 = vmatmul.bf16.vlgmr.msra.gmra.mxu0 %v566_v8  ;;  %237 = vmatmul.bf16.vlgmr.msra.gmra.mxu1 %v570_v9 }
  0x22   :  { %257 = vmatmul.bf16.vlgmr.msra.gmra.mxu2 %v574_v10  ;;  %277 = vmatmul.bf16.vlgmr.msra.gmra.mxu3 %v578_v11 }
  0x31   :  { %222 = vmatmul.bf16.gmra.mxu0 %v567_v12  ;;  %242 = vmatmul.bf16.gmra.mxu1 %v571_v13 }
  0x32   :  { %262 = vmatmul.bf16.gmra.mxu2 %v575_v14  ;;  %282 = vmatmul.bf16.gmra.mxu3 %v579_v15 }
  0x41   :  { %227 = vmatmul.bf16.gmra.mxu0 %v568_v16  ;;  %247 = vmatmul.bf16.gmra.mxu1 %v572_v17 }
  0x42   :  { %267 = vmatmul.bf16.gmra.mxu2 %v576_v18  ;;  %287 = vmatmul.bf16.gmra.mxu3 %v580_v19 }
  0x51   :  { %232 = vmatmul.bf16.gmra.mxu0 %v569_v20  ;;  %252 = vmatmul.bf16.gmra.mxu1 %v573_v21 }
  0x52   :  { %272 = vmatmul.bf16.gmra.mxu2 %v577_v22  ;;  %292 = vmatmul.bf16.gmra.mxu3 %v581_v23 }
  0x9e   :  { %v218_v24 = vpop.f32.mrf.mxu0  ;;  %v238_v25 = vpop.f32.mrf.mxu1 }
  0x9f   :  { %v302_v27 = vmul.f32 %v811_v26, %v218_v24  ;;  %v310_v29 = vmul.f32 %v811_v26, %v238_v25 }
  0xa1   :  { %v338_v34 = vadd.f32 %v817_v28, %v302_v27  ;;  %v346_v35 = vadd.f32 %v817_v28, %v310_v29 }
  0xa3   :  { %v370_v42 = vmax.f32 %v338_v34, 0.0  ;;  %v378_v43 = vmax.f32 %v346_v35, 0.0 }
  0xa5   :  { %v258_v30 = vpop.f32.mrf.mxu2  ;;  %v278_v31 = vpop.f32.mrf.mxu3 }
  0xa6   :  { %v220_v32 = vpop.f32.mrf.mxu0  ;;  %v240_v33 = vpop.f32.mrf.mxu1  ;;  %v318_v40 = vmul.f32 %v811_v26, %v258_v30  ;;  %v326_v41 = vmul.f32 %v811_v26, %v278_v31 }
  0xa7   :  { %v303_v36 = vmul.f32 %v811_v26, %v220_v32  ;;  %v311_v37 = vmul.f32 %v811_v26, %v240_v33 }
  0xa8   :  { %v354_v50 = vadd.f32 %v817_v28, %v318_v40  ;;  %v362_v51 = vadd.f32 %v817_v28, %v326_v41 }
  0xa9   :  { %v339_v38 = vadd.f32 %v817_v28, %v303_v36  ;;  %v347_v39 = vadd.f32 %v817_v28, %v311_v37 }
  0xaa   :  { %v386_v58 = vmax.f32 %v354_v50, 0.0  ;;  %v394_v59 = vmax.f32 %v362_v51, 0.0 }
  0xab   :  { %v371_v44 = vmax.f32 %v339_v38, 0.0  ;;  %v379_v45 = vmax.f32 %v347_v39, 0.0 }
  0xad   :  { %v593_v46 = vpack.c.bf16 %v371_v44, %v370_v42  ;;  %v613_v47 = vpack.c.bf16 %v379_v45, %v378_v43  ;;  %v260_v48 = vpop.f32.mrf.mxu2  ;;  %v280_v49 = vpop.f32.mrf.mxu3 }
  0xae   :  { %v319_v52 = vmul.f32 %v811_v26, %v260_v48  ;;  %v327_v53 = vmul.f32 %v811_v26, %v280_v49  ;;  %v223_v54 = vpop.f32.mrf.mxu0  ;;  %v243_v55 = vpop.f32.mrf.mxu1 }
  0xaf   :  { %594 = vst [vmem:[%s934_s4] sm:$0xff] %v593_v46   ;;  %v304_v62 = vmul.f32 %v811_v26, %v223_v54  ;;  %v312_v63 = vmul.f32 %v811_v26, %v243_v55 }
  0xb0   :  { %673 = vst [vmem:[%s934_s4 + $0x20] sm:$0xff] %v613_v47   ;;  %v355_v56 = vadd.f32 %v817_v28, %v319_v52  ;;  %v363_v57 = vadd.f32 %v817_v28, %v327_v53 }
  0xb1   :  { %v340_v6 = vadd.f32 %v817_v28, %v304_v62  ;;  %v348_v7 = vadd.f32 %v817_v28, %v312_v63 }
  0xb2   :  { %v387_v60 = vmax.f32 %v355_v56, 0.0  ;;  %v395_v61 = vmax.f32 %v363_v57, 0.0 }
  0xb3   :  { %v372_v14 = vmax.f32 %v340_v6, 0.0  ;;  %v380_v15 = vmax.f32 %v348_v7, 0.0 }
  0xb4   :  { %v633_v0 = vpack.c.bf16 %v387_v60, %v386_v58  ;;  %v653_v1 = vpack.c.bf16 %v395_v61, %v394_v59 }
  0xb5   :  { %v263_v2 = vpop.f32.mrf.mxu2  ;;  %v283_v3 = vpop.f32.mrf.mxu3 }
  0xb6   :  { %677 = vst [vmem:[%s934_s4 + $0x40] sm:$0xff] %v633_v0   ;;  %v225_v4 = vpop.f32.mrf.mxu0  ;;  %v245_v5 = vpop.f32.mrf.mxu1  ;;  %v320_v12 = vmul.f32 %v811_v26, %v263_v2  ;;  %v328_v13 = vmul.f32 %v811_v26, %v283_v3 }
  0xb7   :  { %681 = vst [vmem:[%s934_s4 + $0x60] sm:$0xff] %v653_v1   ;;  %v305_v8 = vmul.f32 %v811_v26, %v225_v4  ;;  %v313_v9 = vmul.f32 %v811_v26, %v245_v5 }
  0xb8   :  { %v356_v22 = vadd.f32 %v817_v28, %v320_v12  ;;  %v364_v23 = vadd.f32 %v817_v28, %v328_v13 }
  0xb9   :  { %v341_v10 = vadd.f32 %v817_v28, %v305_v8  ;;  %v349_v11 = vadd.f32 %v817_v28, %v313_v9 }
  0xba   :  { %v388_v32 = vmax.f32 %v356_v22, 0.0  ;;  %v396_v33 = vmax.f32 %v364_v23, 0.0 }
  0xbb   :  { %v373_v16 = vmax.f32 %v341_v10, 0.0  ;;  %v381_v17 = vmax.f32 %v349_v11, 0.0 }
  0xbd   :  { %v598_v18 = vpack.c.bf16 %v373_v16, %v372_v14  ;;  %v618_v19 = vpack.c.bf16 %v381_v17, %v380_v15  ;;  %v265_v20 = vpop.f32.mrf.mxu2  ;;  %v285_v21 = vpop.f32.mrf.mxu3 }
  0xbe   :  { %v321_v24 = vmul.f32 %v811_v26, %v265_v20  ;;  %v329_v25 = vmul.f32 %v811_v26, %v285_v21  ;;  %v228_v27 = vpop.f32.mrf.mxu0  ;;  %v248_v29 = vpop.f32.mrf.mxu1 }
  0xbf   :  { %670 = vst [vmem:[%s934_s4 + $0x8] sm:$0xff] %v598_v18   ;;  %v306_v36 = vmul.f32 %v811_v26, %v228_v27  ;;  %v314_v37 = vmul.f32 %v811_v26, %v248_v29 }
  0xc0   :  { %674 = vst [vmem:[%s934_s4 + $0x28] sm:$0xff] %v618_v19   ;;  %v357_v30 = vadd.f32 %v817_v28, %v321_v24  ;;  %v365_v31 = vadd.f32 %v817_v28, %v329_v25 }
  0xc1   :  { %v342_v44 = vadd.f32 %v817_v28, %v306_v36  ;;  %v350_v45 = vadd.f32 %v817_v28, %v314_v37 }
  0xc2   :  { %v389_v34 = vmax.f32 %v357_v30, 0.0  ;;  %v397_v35 = vmax.f32 %v365_v31, 0.0 }
  0xc3   :  { %v374_v52 = vmax.f32 %v342_v44, 0.0  ;;  %v382_v53 = vmax.f32 %v350_v45, 0.0 }
  0xc4   :  { %v638_v38 = vpack.c.bf16 %v389_v34, %v388_v32  ;;  %v658_v39 = vpack.c.bf16 %v397_v35, %v396_v33 }
  0xc5   :  { %v268_v40 = vpop.f32.mrf.mxu2  ;;  %v288_v41 = vpop.f32.mrf.mxu3 }
  0xc6   :  { %678 = vst [vmem:[%s934_s4 + $0x48] sm:$0xff] %v638_v38   ;;  %v230_v42 = vpop.f32.mrf.mxu0  ;;  %v250_v43 = vpop.f32.mrf.mxu1  ;;  %v322_v50 = vmul.f32 %v811_v26, %v268_v40  ;;  %v330_v51 = vmul.f32 %v811_v26, %v288_v41 }
  0xc7   :  { %682 = vst [vmem:[%s934_s4 + $0x68] sm:$0xff] %v658_v39   ;;  %v307_v46 = vmul.f32 %v811_v26, %v230_v42  ;;  %v315_v47 = vmul.f32 %v811_v26, %v250_v43 }
  0xc8   :  { %v358_v60 = vadd.f32 %v817_v28, %v322_v50  ;;  %v366_v61 = vadd.f32 %v817_v28, %v330_v51 }
  0xc9   :  { %v343_v48 = vadd.f32 %v817_v28, %v307_v46  ;;  %v351_v49 = vadd.f32 %v817_v28, %v315_v47 }
  0xca   :  { %v390_v4 = vmax.f32 %v358_v60, 0.0  ;;  %v398_v5 = vmax.f32 %v366_v61, 0.0 }
  0xcb   :  { %v375_v54 = vmax.f32 %v343_v48, 0.0  ;;  %v383_v55 = vmax.f32 %v351_v49, 0.0 }
  0xcd   :  { %v603_v56 = vpack.c.bf16 %v375_v54, %v374_v52  ;;  %v623_v57 = vpack.c.bf16 %v383_v55, %v382_v53  ;;  %v270_v58 = vpop.f32.mrf.mxu2  ;;  %v290_v59 = vpop.f32.mrf.mxu3 }
  0xce   :  { %v323_v62 = vmul.f32 %v811_v26, %v270_v58  ;;  %v331_v63 = vmul.f32 %v811_v26, %v290_v59  ;;  %v233_v0 = vpop.f32.mrf.mxu0  ;;  %v253_v1 = vpop.f32.mrf.mxu1 }
  0xcf   :  { %671 = vst [vmem:[%s934_s4 + $0x10] sm:$0xff] %v603_v56   ;;  %v308_v8 = vmul.f32 %v811_v26, %v233_v0  ;;  %v316_v9 = vmul.f32 %v811_v26, %v253_v1 }
  0xd0   :  { %675 = vst [vmem:[%s934_s4 + $0x30] sm:$0xff] %v623_v57   ;;  %v359_v2 = vadd.f32 %v817_v28, %v323_v62  ;;  %v367_v3 = vadd.f32 %v817_v28, %v331_v63 }
  0xd1   :  { %v344_v16 = vadd.f32 %v817_v28, %v308_v8  ;;  %v352_v17 = vadd.f32 %v817_v28, %v316_v9 }
  0xd2   :  { %v391_v6 = vmax.f32 %v359_v2, 0.0  ;;  %v399_v7 = vmax.f32 %v367_v3, 0.0 }
  0xd3   :  { %v376_v24 = vmax.f32 %v344_v16, 0.0  ;;  %v384_v25 = vmax.f32 %v352_v17, 0.0 }
  0xd4   :  { %v643_v10 = vpack.c.bf16 %v391_v6, %v390_v4  ;;  %v663_v11 = vpack.c.bf16 %v399_v7, %v398_v5 }
  0xd5   :  { %v273_v12 = vpop.f32.mrf.mxu2  ;;  %v293_v13 = vpop.f32.mrf.mxu3 }
  0xd6   :  { %679 = vst [vmem:[%s934_s4 + $0x50] sm:$0xff] %v643_v10   ;;  %v235_v14 = vpop.f32.mrf.mxu0  ;;  %v255_v15 = vpop.f32.mrf.mxu1  ;;  %v324_v22 = vmul.f32 %v811_v26, %v273_v12  ;;  %v332_v23 = vmul.f32 %v811_v26, %v293_v13 }
  0xd7   :  { %683 = vst [vmem:[%s934_s4 + $0x70] sm:$0xff] %v663_v11   ;;  %v309_v18 = vmul.f32 %v811_v26, %v235_v14  ;;  %v317_v19 = vmul.f32 %v811_v26, %v255_v15 }
  0xd8   :  { %v360_v34 = vadd.f32 %v817_v28, %v324_v22  ;;  %v368_v35 = vadd.f32 %v817_v28, %v332_v23 }
  0xd9   :  { %v345_v20 = vadd.f32 %v817_v28, %v309_v18  ;;  %v353_v21 = vadd.f32 %v817_v28, %v317_v19 }
  0xda   :  { %v392_v40 = vmax.f32 %v360_v34, 0.0  ;;  %v400_v41 = vmax.f32 %v368_v35, 0.0 }
  0xdb   :  { %v377_v27 = vmax.f32 %v345_v20, 0.0  ;;  %v385_v29 = vmax.f32 %v353_v21, 0.0 }
  0xdd   :  { %v608_v30 = vpack.c.bf16 %v377_v27, %v376_v24  ;;  %v628_v31 = vpack.c.bf16 %v385_v29, %v384_v25  ;;  %v275_v32 = vpop.f32.mrf.mxu2  ;;  %v295_v33 = vpop.f32.mrf.mxu3 }
  0xde   :  { %v325_v36 = vmul.f32 %v811_v26, %v275_v32  ;;  %v333_v37 = vmul.f32 %v811_v26, %v295_v33 }
  0xdf   :  { %672 = vst [vmem:[%s934_s4 + $0x18] sm:$0xff] %v608_v30  }
  0xe0   :  { %676 = vst [vmem:[%s934_s4 + $0x38] sm:$0xff] %v628_v31   ;;  %v361_v38 = vadd.f32 %v817_v28, %v325_v36  ;;  %v369_v39 = vadd.f32 %v817_v28, %v333_v37 }
  0xe2   :  { %v393_v42 = vmax.f32 %v361_v38, 0.0  ;;  %v401_v43 = vmax.f32 %v369_v39, 0.0 }
  0xe4   :  { %v648_v44 = vpack.c.bf16 %v393_v42, %v392_v40  ;;  %v668_v45 = vpack.c.bf16 %v401_v43, %v400_v41 }
  0xe6   :  { %680 = vst [vmem:[%s934_s4 + $0x58] sm:$0xff] %v648_v44  }
  0xe7   :  { %684 = vst [vmem:[%s934_s4 + $0x78] sm:$0xff] %v668_v45  }

// kernel: _forward_jit.22
= control target key start
LH: loop header
LB: loop body
LE: loop exit
PB: predicated region body
PF: predicated region fallthrough
CT: control target
= control target key end

     0   :  { %s1161_s1 = inlined_call_operand.vmem [shape: bf16[128,128], index: 1, kind: input, shape index: {}]   ;;  %s1162_s2 = inlined_call_operand.vmem [shape: f32[1,128], index: 2, kind: input, shape index: {}]   ;;  %s1163_s3 = inlined_call_operand.vmem [shape: f32[1,128], index: 3, kind: input, shape index: {}]   ;;  %s1164_s0 = inlined_call_operand.vmem [shape: bf16[256,128], index: 0, kind: input, shape index: {}]   ;;  %s1165_s4 = inlined_call_operand.vmem [shape: bf16[256,128], index: 4, kind: input, shape index: {}]   ;;  %s1166_s5 = inlined_call_operand.vmem [shape: bf16[256,128], index: 5, kind: output, shape index: {}]  }
   0x1   :  { %v688_v0 = vld [vmem:[%s1161_s1 + $0x38] sm:$0xff]  ;;  %v687_v1 = vld [vmem:[%s1161_s1 + $0x30] sm:$0xff]  ;;  %v686_v2 = vld [vmem:[%s1161_s1 + $0x28] sm:$0xff] }
   0x2   :  { %212 = vmatpush.bf16.msra.mxu0 %v688_v0  ;;  %863 = vmatpush.bf16.msra.mxu1 %v688_v0  ;;  %v685_v3 = vld [vmem:[%s1161_s1 + $0x20] sm:$0xff]  ;;  %v684_v4 = vld [vmem:[%s1161_s1 + $0x18] sm:$0xff]  ;;  %v683_v5 = vld [vmem:[%s1161_s1 + $0x10] sm:$0xff] }
   0x3   :  { %864 = vmatpush.bf16.msra.mxu2 %v688_v0  ;;  %865 = vmatpush.bf16.msra.mxu3 %v688_v0  ;;  %v682_v6 = vld [vmem:[%s1161_s1 + $0x8] sm:$0xff]  ;;  %v681_v7 = vld [vmem:[%s1161_s1] sm:$0xff]  ;;  %v667_v16 = vld [vmem:[%s1164_s0 + $0x10] sm:$0xff] }
   0x4   :  { %v665_v8 = vld [vmem:[%s1164_s0] sm:$0xff]  ;;  %v666_v12 = vld [vmem:[%s1164_s0 + $0x8] sm:$0xff]  ;;  %v671_v17 = vld [vmem:[%s1164_s0 + $0x30] sm:$0xff] }
   0x5   :  { %v669_v9 = vld [vmem:[%s1164_s0 + $0x20] sm:$0xff]  ;;  %v670_v13 = vld [vmem:[%s1164_s0 + $0x28] sm:$0xff]  ;;  %v675_v18 = vld [vmem:[%s1164_s0 + $0x50] sm:$0xff] }
   0x6   :  { %213 = vmatpush.bf16.msra.mxu0 %v687_v1  ;;  %866 = vmatpush.bf16.msra.mxu1 %v687_v1  ;;  %v673_v10 = vld [vmem:[%s1164_s0 + $0x40] sm:$0xff]  ;;  %v674_v14 = vld [vmem:[%s1164_s0 + $0x48] sm:$0xff]  ;;  %v679_v19 = vld [vmem:[%s1164_s0 + $0x70] sm:$0xff] }
   0x7   :  { %867 = vmatpush.bf16.msra.mxu2 %v687_v1  ;;  %868 = vmatpush.bf16.msra.mxu3 %v687_v1  ;;  %v677_v11 = vld [vmem:[%s1164_s0 + $0x60] sm:$0xff]  ;;  %v678_v15 = vld [vmem:[%s1164_s0 + $0x68] sm:$0xff]  ;;  %v668_v20 = vld [vmem:[%s1164_s0 + $0x18] sm:$0xff] }
   0x8   :  { %v672_v21 = vld [vmem:[%s1164_s0 + $0x38] sm:$0xff]  ;;  %v994_v24 = vld [vmem:[%s1162_s2] ss:$0 sm:$0xff] }
   0x9   :  { %v676_v22 = vld [vmem:[%s1164_s0 + $0x58] sm:$0xff]  ;;  %v1000_v28 = vld [vmem:[%s1163_s3] ss:$0 sm:$0xff] }
   0xa   :  { %214 = vmatpush.bf16.msra.mxu0 %v686_v2  ;;  %869 = vmatpush.bf16.msra.mxu1 %v686_v2  ;;  %v680_v23 = vld [vmem:[%s1164_s0 + $0x78] sm:$0xff]  ;;  %v690_v30 = vld [vmem:[%s1165_s4] sm:$0xff]  }
   0xb   :  { %870 = vmatpush.bf16.msra.mxu2 %v686_v2  ;;  %871 = vmatpush.bf16.msra.mxu3 %v686_v2  ;;  %v836_v31 = vld [vmem:[%s1165_s4 + $0x20] sm:$0xff]   ;;  %v691_v33 = vunpack.c.l.bf16 %v690_v30  ;;  %v692_v41 = vunpack.c.h.bf16 %v690_v30 }
   0xc   :  { %v707_v35 = vunpack.c.l.bf16 %v836_v31  ;;  %v708_v43 = vunpack.c.h.bf16 %v836_v31  ;;  %v840_v48 = vld [vmem:[%s1165_s4 + $0x40] sm:$0xff]  }
   0xd   :  { %v844_v49 = vld [vmem:[%s1165_s4 + $0x60] sm:$0xff]   ;;  %v723_v55 = vunpack.c.l.bf16 %v840_v48  ;;  %v724_v1 = vunpack.c.h.bf16 %v840_v48 }
   0xe   :  { %215 = vmatpush.bf16.msra.mxu0 %v685_v3  ;;  %872 = vmatpush.bf16.msra.mxu1 %v685_v3  ;;  %v739_v57 = vunpack.c.l.bf16 %v844_v49 }
   0xf   :  { %873 = vmatpush.bf16.msra.mxu2 %v685_v3  ;;  %874 = vmatpush.bf16.msra.mxu3 %v685_v3  ;;  %v740_v3 = vunpack.c.h.bf16 %v844_v49 }
  0x12   :  { %216 = vmatpush.bf16.msra.mxu0 %v684_v4  ;;  %875 = vmatpush.bf16.msra.mxu1 %v684_v4 }
  0x13   :  { %876 = vmatpush.bf16.msra.mxu2 %v684_v4  ;;  %877 = vmatpush.bf16.msra.mxu3 %v684_v4 }
  0x16   :  { %217 = vmatpush.bf16.msra.mxu0 %v683_v5  ;;  %878 = vmatpush.bf16.msra.mxu1 %v683_v5 }
  0x17   :  { %879 = vmatpush.bf16.msra.mxu2 %v683_v5  ;;  %880 = vmatpush.bf16.msra.mxu3 %v683_v5 }
  0x1a   :  { %218 = vmatpush.bf16.msra.mxu0 %v682_v6  ;;  %881 = vmatpush.bf16.msra.mxu1 %v682_v6 }
  0x1b   :  { %882 = vmatpush.bf16.msra.mxu2 %v682_v6  ;;  %883 = vmatpush.bf16.msra.mxu3 %v682_v6 }
  0x1e   :  { %219 = vmatpush.bf16.msra.mxu0 %v681_v7  ;;  %884 = vmatpush.bf16.msra.mxu1 %v681_v7 }
  0x1f   :  { %885 = vmatpush.bf16.msra.mxu2 %v681_v7  ;;  %886 = vmatpush.bf16.msra.mxu3 %v681_v7 }
  0x21   :  { %220 = vmatmul.bf16.vlgmr.msra.gmra.mxu0 %v665_v8  ;;  %240 = vmatmul.bf16.vlgmr.msra.gmra.mxu1 %v669_v9 }
  0x22   :  { %260 = vmatmul.bf16.vlgmr.msra.gmra.mxu2 %v673_v10  ;;  %280 = vmatmul.bf16.vlgmr.msra.gmra.mxu3 %v677_v11 }
  0x31   :  { %225 = vmatmul.bf16.gmra.mxu0 %v666_v12  ;;  %245 = vmatmul.bf16.gmra.mxu1 %v670_v13 }
  0x32   :  { %265 = vmatmul.bf16.gmra.mxu2 %v674_v14  ;;  %285 = vmatmul.bf16.gmra.mxu3 %v678_v15 }
  0x41   :  { %230 = vmatmul.bf16.gmra.mxu0 %v667_v16  ;;  %250 = vmatmul.bf16.gmra.mxu1 %v671_v17  ;;  %v833_v16 = vld [vmem:[%s1165_s4 + $0x8] sm:$0xff]  }
  0x42   :  { %270 = vmatmul.bf16.gmra.mxu2 %v675_v18  ;;  %290 = vmatmul.bf16.gmra.mxu3 %v679_v19  ;;  %v837_v17 = vld [vmem:[%s1165_s4 + $0x28] sm:$0xff]  }
  0x51   :  { %235 = vmatmul.bf16.gmra.mxu0 %v668_v20  ;;  %255 = vmatmul.bf16.gmra.mxu1 %v672_v21 }
  0x52   :  { %275 = vmatmul.bf16.gmra.mxu2 %v676_v22  ;;  %295 = vmatmul.bf16.gmra.mxu3 %v680_v23  ;;  %v695_v23 = vunpack.c.l.bf16 %v833_v16 }
  0x9e   :  { %v221_v25 = vpop.f32.mrf.mxu0  ;;  %v241_v26 = vpop.f32.mrf.mxu1 }
  0x9f   :  { %v305_v27 = vmul.f32 %v994_v24, %v221_v25  ;;  %v313_v29 = vmul.f32 %v994_v24, %v241_v26  ;;  %v711_v26 = vunpack.c.l.bf16 %v837_v17 }
  0xa1   :  { %v341_v32 = vadd.f32 %v1000_v28, %v305_v27  ;;  %v349_v34 = vadd.f32 %v1000_v28, %v313_v29 }
  0xa3   :  { %v437_v46 = vadd.f32 %v691_v33, %v341_v32  ;;  %v445_v47 = vadd.f32 %v707_v35, %v349_v34  ;;  %v696_v35 = vunpack.c.h.bf16 %v833_v16 }
  0xa5   :  { %v261_v36 = vpop.f32.mrf.mxu2  ;;  %v281_v37 = vpop.f32.mrf.mxu3  ;;  %v469_v58 = vmax.f32 %v437_v46, 0.0  ;;  %v477_v59 = vmax.f32 %v445_v47, 0.0 }
  0xa6   :  { %v223_v38 = vpop.f32.mrf.mxu0  ;;  %v243_v39 = vpop.f32.mrf.mxu1  ;;  %v321_v44 = vmul.f32 %v994_v24, %v261_v36  ;;  %v329_v45 = vmul.f32 %v994_v24, %v281_v37  ;;  %v712_v37 = vunpack.c.h.bf16 %v837_v17 }
  0xa7   :  { %v306_v40 = vmul.f32 %v994_v24, %v223_v38  ;;  %v314_v42 = vmul.f32 %v994_v24, %v243_v39 }
  0xa8   :  { %v357_v54 = vadd.f32 %v1000_v28, %v321_v44  ;;  %v365_v56 = vadd.f32 %v1000_v28, %v329_v45 }
  0xa9   :  { %v342_v50 = vadd.f32 %v1000_v28, %v306_v40  ;;  %v350_v51 = vadd.f32 %v1000_v28, %v314_v42  ;;  %v841_v42 = vld [vmem:[%s1165_s4 + $0x48] sm:$0xff]  }
  0xaa   :  { %v453_v8 = vadd.f32 %v723_v55, %v357_v54  ;;  %v461_v9 = vadd.f32 %v739_v57, %v365_v56  ;;  %v727_v49 = vunpack.c.l.bf16 %v841_v42 }
  0xab   :  { %v438_v52 = vadd.f32 %v692_v41, %v342_v50  ;;  %v446_v53 = vadd.f32 %v708_v43, %v350_v51  ;;  %v845_v43 = vld [vmem:[%s1165_s4 + $0x68] sm:$0xff]  }
  0xac   :  { %v485_v18 = vmax.f32 %v453_v8, 0.0  ;;  %v493_v19 = vmax.f32 %v461_v9, 0.0  ;;  %v743_v51 = vunpack.c.l.bf16 %v845_v43 }
  0xad   :  { %v470_v60 = vmax.f32 %v438_v52, 0.0  ;;  %v478_v61 = vmax.f32 %v446_v53, 0.0  ;;  %v263_v62 = vpop.f32.mrf.mxu2  ;;  %v283_v63 = vpop.f32.mrf.mxu3 }
  0xae   :  { %v322_v0 = vmul.f32 %v994_v24, %v263_v62  ;;  %v330_v2 = vmul.f32 %v994_v24, %v283_v63  ;;  %v226_v4 = vpop.f32.mrf.mxu0  ;;  %v246_v5 = vpop.f32.mrf.mxu1 }
  0xaf   :  { %v756_v6 = vpack.c.bf16 %v470_v60, %v469_v58  ;;  %v776_v7 = vpack.c.bf16 %v478_v61, %v477_v59  ;;  %v307_v12 = vmul.f32 %v994_v24, %v226_v4  ;;  %v315_v13 = vmul.f32 %v994_v24, %v246_v5 }
  0xb0   :  { %v358_v10 = vadd.f32 %v1000_v28, %v322_v0  ;;  %v366_v11 = vadd.f32 %v1000_v28, %v330_v2  ;;  %v728_v59 = vunpack.c.h.bf16 %v841_v42  ;;  %v744_v61 = vunpack.c.h.bf16 %v845_v43 }
  0xb1   :  { %757 = vst [vmem:[%s1166_s5] sm:$0xff] %v756_v6   ;;  %v343_v22 = vadd.f32 %v1000_v28, %v307_v12  ;;  %v351_v25 = vadd.f32 %v1000_v28, %v315_v13 }
  0xb2   :  { %851 = vst [vmem:[%s1166_s5 + $0x20] sm:$0xff] %v776_v7   ;;  %v454_v14 = vadd.f32 %v724_v1, %v358_v10  ;;  %v462_v15 = vadd.f32 %v740_v3, %v366_v11  ;;  %v834_v10 = vld [vmem:[%s1165_s4 + $0x10] sm:$0xff]  }
  0xb3   :  { %v439_v40 = vadd.f32 %v695_v23, %v343_v22  ;;  %v447_v41 = vadd.f32 %v711_v26, %v351_v25  ;;  %v838_v11 = vld [vmem:[%s1165_s4 + $0x30] sm:$0xff]   ;;  %v699_v17 = vunpack.c.l.bf16 %v834_v10 }
  0xb4   :  { %v486_v20 = vmax.f32 %v454_v14, 0.0  ;;  %v494_v21 = vmax.f32 %v462_v15, 0.0 }
  0xb5   :  { %v266_v27 = vpop.f32.mrf.mxu2  ;;  %v286_v29 = vpop.f32.mrf.mxu3  ;;  %v471_v52 = vmax.f32 %v439_v40, 0.0  ;;  %v479_v53 = vmax.f32 %v447_v41, 0.0 }
  0xb6   :  { %v796_v30 = vpack.c.bf16 %v486_v20, %v485_v18  ;;  %v816_v31 = vpack.c.bf16 %v494_v21, %v493_v19  ;;  %v228_v32 = vpop.f32.mrf.mxu0  ;;  %v248_v33 = vpop.f32.mrf.mxu1  ;;  %v323_v38 = vmul.f32 %v994_v24, %v266_v27  ;;  %v331_v39 = vmul.f32 %v994_v24, %v286_v29 }
  0xb7   :  { %v308_v34 = vmul.f32 %v994_v24, %v228_v32  ;;  %v316_v36 = vmul.f32 %v994_v24, %v248_v33  ;;  %v715_v19 = vunpack.c.l.bf16 %v838_v11  ;;  %v700_v29 = vunpack.c.h.bf16 %v834_v10 }
  0xb8   :  { %855 = vst [vmem:[%s1166_s5 + $0x40] sm:$0xff] %v796_v30   ;;  %v359_v48 = vadd.f32 %v1000_v28, %v323_v38  ;;  %v367_v50 = vadd.f32 %v1000_v28, %v331_v39 }
  0xb9   :  { %859 = vst [vmem:[%s1166_s5 + $0x60] sm:$0xff] %v816_v31   ;;  %v344_v44 = vadd.f32 %v1000_v28, %v308_v34  ;;  %v352_v45 = vadd.f32 %v1000_v28, %v316_v36  ;;  %v716_v31 = vunpack.c.h.bf16 %v838_v11  ;;  %v842_v36 = vld [vmem:[%s1165_s4 + $0x50] sm:$0xff]  }
  0xba   :  { %v455_v2 = vadd.f32 %v727_v49, %v359_v48  ;;  %v463_v3 = vadd.f32 %v743_v51, %v367_v50  ;;  %v731_v43 = vunpack.c.l.bf16 %v842_v36 }
  0xbb   :  { %v440_v46 = vadd.f32 %v696_v35, %v344_v44  ;;  %v448_v47 = vadd.f32 %v712_v37, %v352_v45  ;;  %v846_v37 = vld [vmem:[%s1165_s4 + $0x70] sm:$0xff]  }
  0xbc   :  { %v487_v12 = vmax.f32 %v455_v2, 0.0  ;;  %v495_v13 = vmax.f32 %v463_v3, 0.0  ;;  %v747_v45 = vunpack.c.l.bf16 %v846_v37 }
  0xbd   :  { %v472_v54 = vmax.f32 %v440_v46, 0.0  ;;  %v480_v55 = vmax.f32 %v448_v47, 0.0  ;;  %v268_v56 = vpop.f32.mrf.mxu2  ;;  %v288_v57 = vpop.f32.mrf.mxu3 }
  0xbe   :  { %v324_v58 = vmul.f32 %v994_v24, %v268_v56  ;;  %v332_v60 = vmul.f32 %v994_v24, %v288_v57  ;;  %v231_v62 = vpop.f32.mrf.mxu0  ;;  %v251_v63 = vpop.f32.mrf.mxu1 }
  0xbf   :  { %v761_v0 = vpack.c.bf16 %v472_v54, %v471_v52  ;;  %v781_v1 = vpack.c.bf16 %v480_v55, %v479_v53  ;;  %v309_v6 = vmul.f32 %v994_v24, %v231_v62  ;;  %v317_v7 = vmul.f32 %v994_v24, %v251_v63 }
  0xc0   :  { %v360_v4 = vadd.f32 %v1000_v28, %v324_v58  ;;  %v368_v5 = vadd.f32 %v1000_v28, %v332_v60  ;;  %v732_v53 = vunpack.c.h.bf16 %v842_v36  ;;  %v748_v55 = vunpack.c.h.bf16 %v846_v37 }
  0xc1   :  { %848 = vst [vmem:[%s1166_s5 + $0x8] sm:$0xff] %v761_v0   ;;  %v345_v16 = vadd.f32 %v1000_v28, %v309_v6  ;;  %v353_v18 = vadd.f32 %v1000_v28, %v317_v7 }
  0xc2   :  { %852 = vst [vmem:[%s1166_s5 + $0x28] sm:$0xff] %v781_v1   ;;  %v456_v8 = vadd.f32 %v728_v59, %v360_v4  ;;  %v464_v9 = vadd.f32 %v744_v61, %v368_v5  ;;  %v835_v4 = vld [vmem:[%s1165_s4 + $0x18] sm:$0xff]  }
  0xc3   :  { %v441_v34 = vadd.f32 %v699_v17, %v345_v16  ;;  %v449_v35 = vadd.f32 %v715_v19, %v353_v18  ;;  %v839_v5 = vld [vmem:[%s1165_s4 + $0x38] sm:$0xff]   ;;  %v703_v11 = vunpack.c.l.bf16 %v835_v4 }
  0xc4   :  { %v488_v14 = vmax.f32 %v456_v8, 0.0  ;;  %v496_v15 = vmax.f32 %v464_v9, 0.0 }
  0xc5   :  { %v271_v20 = vpop.f32.mrf.mxu2  ;;  %v291_v21 = vpop.f32.mrf.mxu3  ;;  %v473_v46 = vmax.f32 %v441_v34, 0.0  ;;  %v481_v47 = vmax.f32 %v449_v35, 0.0 }
  0xc6   :  { %v801_v22 = vpack.c.bf16 %v488_v14, %v487_v12  ;;  %v821_v23 = vpack.c.bf16 %v496_v15, %v495_v13  ;;  %v233_v25 = vpop.f32.mrf.mxu0  ;;  %v253_v26 = vpop.f32.mrf.mxu1  ;;  %v325_v32 = vmul.f32 %v994_v24, %v271_v20  ;;  %v333_v33 = vmul.f32 %v994_v24, %v291_v21 }
  0xc7   :  { %v310_v27 = vmul.f32 %v994_v24, %v233_v25  ;;  %v318_v30 = vmul.f32 %v994_v24, %v253_v26  ;;  %v719_v13 = vunpack.c.l.bf16 %v839_v5  ;;  %v704_v21 = vunpack.c.h.bf16 %v835_v4 }
  0xc8   :  { %856 = vst [vmem:[%s1166_s5 + $0x48] sm:$0xff] %v801_v22   ;;  %v361_v42 = vadd.f32 %v1000_v28, %v325_v32  ;;  %v369_v44 = vadd.f32 %v1000_v28, %v333_v33 }
  0xc9   :  { %860 = vst [vmem:[%s1166_s5 + $0x68] sm:$0xff] %v821_v23   ;;  %v346_v38 = vadd.f32 %v1000_v28, %v310_v27  ;;  %v354_v39 = vadd.f32 %v1000_v28, %v318_v30  ;;  %v720_v23 = vunpack.c.h.bf16 %v839_v5  ;;  %v843_v30 = vld [vmem:[%s1165_s4 + $0x58] sm:$0xff]  }
  0xca   :  { %v457_v60 = vadd.f32 %v731_v43, %v361_v42  ;;  %v465_v61 = vadd.f32 %v747_v45, %v369_v44  ;;  %v735_v37 = vunpack.c.l.bf16 %v843_v30 }
  0xcb   :  { %v442_v40 = vadd.f32 %v700_v29, %v346_v38  ;;  %v450_v41 = vadd.f32 %v716_v31, %v354_v39  ;;  %v847_v31 = vld [vmem:[%s1165_s4 + $0x78] sm:$0xff]  }
  0xcc   :  { %v489_v6 = vmax.f32 %v457_v60, 0.0  ;;  %v497_v7 = vmax.f32 %v465_v61, 0.0  ;;  %v751_v39 = vunpack.c.l.bf16 %v847_v31 }
  0xcd   :  { %v474_v48 = vmax.f32 %v442_v40, 0.0  ;;  %v482_v49 = vmax.f32 %v450_v41, 0.0  ;;  %v273_v50 = vpop.f32.mrf.mxu2  ;;  %v293_v51 = vpop.f32.mrf.mxu3 }
  0xce   :  { %v326_v52 = vmul.f32 %v994_v24, %v273_v50  ;;  %v334_v54 = vmul.f32 %v994_v24, %v293_v51  ;;  %v236_v56 = vpop.f32.mrf.mxu0  ;;  %v256_v57 = vpop.f32.mrf.mxu1 }
  0xcf   :  { %v766_v58 = vpack.c.bf16 %v474_v48, %v473_v46  ;;  %v786_v59 = vpack.c.bf16 %v482_v49, %v481_v47  ;;  %v311_v0 = vmul.f32 %v994_v24, %v236_v56  ;;  %v319_v1 = vmul.f32 %v994_v24, %v256_v57 }
  0xd0   :  { %v362_v62 = vadd.f32 %v1000_v28, %v326_v52  ;;  %v370_v63 = vadd.f32 %v1000_v28, %v334_v54  ;;  %v736_v47 = vunpack.c.h.bf16 %v843_v30  ;;  %v752_v49 = vunpack.c.h.bf16 %v847_v31 }
  0xd1   :  { %849 = vst [vmem:[%s1166_s5 + $0x10] sm:$0xff] %v766_v58   ;;  %v347_v10 = vadd.f32 %v1000_v28, %v311_v0  ;;  %v355_v12 = vadd.f32 %v1000_v28, %v319_v1 }
  0xd2   :  { %853 = vst [vmem:[%s1166_s5 + $0x30] sm:$0xff] %v786_v59   ;;  %v458_v2 = vadd.f32 %v732_v53, %v362_v62  ;;  %v466_v3 = vadd.f32 %v748_v55, %v370_v63 }
  0xd3   :  { %v443_v27 = vadd.f32 %v703_v11, %v347_v10  ;;  %v451_v29 = vadd.f32 %v719_v13, %v355_v12 }
  0xd4   :  { %v490_v8 = vmax.f32 %v458_v2, 0.0  ;;  %v498_v9 = vmax.f32 %v466_v3, 0.0 }
  0xd5   :  { %v276_v14 = vpop.f32.mrf.mxu2  ;;  %v296_v15 = vpop.f32.mrf.mxu3  ;;  %v475_v40 = vmax.f32 %v443_v27, 0.0  ;;  %v483_v41 = vmax.f32 %v451_v29, 0.0 }
  0xd6   :  { %v806_v16 = vpack.c.bf16 %v490_v8, %v489_v6  ;;  %v826_v17 = vpack.c.bf16 %v498_v9, %v497_v7  ;;  %v238_v18 = vpop.f32.mrf.mxu0  ;;  %v258_v19 = vpop.f32.mrf.mxu1  ;;  %v327_v25 = vmul.f32 %v994_v24, %v276_v14  ;;  %v335_v26 = vmul.f32 %v994_v24, %v296_v15 }
  0xd7   :  { %v312_v20 = vmul.f32 %v994_v24, %v238_v18  ;;  %v320_v22 = vmul.f32 %v994_v24, %v258_v19 }
  0xd8   :  { %857 = vst [vmem:[%s1166_s5 + $0x50] sm:$0xff] %v806_v16   ;;  %v363_v36 = vadd.f32 %v1000_v28, %v327_v25  ;;  %v371_v38 = vadd.f32 %v1000_v28, %v335_v26 }
  0xd9   :  { %861 = vst [vmem:[%s1166_s5 + $0x70] sm:$0xff] %v826_v17   ;;  %v348_v32 = vadd.f32 %v1000_v28, %v312_v20  ;;  %v356_v33 = vadd.f32 %v1000_v28, %v320_v22 }
  0xda   :  { %v459_v52 = vadd.f32 %v735_v37, %v363_v36  ;;  %v467_v53 = vadd.f32 %v751_v39, %v371_v38 }
  0xdb   :  { %v444_v34 = vadd.f32 %v704_v21, %v348_v32  ;;  %v452_v35 = vadd.f32 %v720_v23, %v356_v33 }
  0xdc   :  { %v499_v58 = vmax.f32 %v467_v53, 0.0 }
  0xdd   :  { %v476_v42 = vmax.f32 %v444_v34, 0.0  ;;  %v484_v43 = vmax.f32 %v452_v35, 0.0  ;;  %v278_v44 = vpop.f32.mrf.mxu2  ;;  %v298_v45 = vpop.f32.mrf.mxu3 }
  0xde   :  { %v328_v46 = vmul.f32 %v994_v24, %v278_v44  ;;  %v336_v48 = vmul.f32 %v994_v24, %v298_v45  ;;  %v491_v24 = vmax.f32 %v459_v52, 0.0 }
  0xdf   :  { %v771_v50 = vpack.c.bf16 %v476_v42, %v475_v40  ;;  %v791_v51 = vpack.c.bf16 %v484_v43, %v483_v41 }
  0xe0   :  { %v364_v54 = vadd.f32 %v1000_v28, %v328_v46  ;;  %v372_v55 = vadd.f32 %v1000_v28, %v336_v48 }
  0xe1   :  { %850 = vst [vmem:[%s1166_s5 + $0x18] sm:$0xff] %v771_v50  }
  0xe2   :  { %854 = vst [vmem:[%s1166_s5 + $0x38] sm:$0xff] %v791_v51   ;;  %v460_v56 = vadd.f32 %v736_v47, %v364_v54  ;;  %v468_v57 = vadd.f32 %v752_v49, %v372_v55 }
  0xe4   :  { %v492_v59 = vmax.f32 %v460_v56, 0.0  ;;  %v500_v60 = vmax.f32 %v468_v57, 0.0 }
  0xe6   :  { %v811_v61 = vpack.c.bf16 %v492_v59, %v491_v24  ;;  %v831_v62 = vpack.c.bf16 %v500_v60, %v499_v58 }
  0xe8   :  { %858 = vst [vmem:[%s1166_s5 + $0x58] sm:$0xff] %v811_v61  }
  0xe9   :  { %862 = vst [vmem:[%s1166_s5 + $0x78] sm:$0xff] %v831_v62  }

// kernel: _forward_jit.23
= control target key start
LH: loop header
LB: loop body
LE: loop exit
PB: predicated region body
PF: predicated region fallthrough
CT: control target
= control target key end

     0   :  { %s382_s1 = inlined_call_operand.vmem [shape: bf16[128,128], index: 1, kind: input, shape index: {}]   ;;  %s383_s2 = inlined_call_operand.vmem [shape: f32[1,128], index: 2, kind: input, shape index: {}]   ;;  %s384_s3 = inlined_call_operand.vmem [shape: f32[1,128], index: 3, kind: input, shape index: {}]   ;;  %s385_s0 = inlined_call_operand.vmem [shape: bf16[64,128], index: 0, kind: input, shape index: {}]   ;;  %s386_s4 = inlined_call_operand.vmem [shape: bf16[64,128], index: 4, kind: output, shape index: {}]  }
   0x1   :  { %v253_v0 = vld [vmem:[%s382_s1 + $0x38] sm:$0xff]  ;;  %v252_v1 = vld [vmem:[%s382_s1 + $0x30] sm:$0xff]  ;;  %v251_v2 = vld [vmem:[%s382_s1 + $0x28] sm:$0xff] }
   0x2   :  { %113 = vmatpush.bf16.msra.mxu0 %v253_v0  ;;  %277 = vmatpush.bf16.msra.mxu1 %v253_v0  ;;  %v250_v3 = vld [vmem:[%s382_s1 + $0x20] sm:$0xff]  ;;  %v249_v4 = vld [vmem:[%s382_s1 + $0x18] sm:$0xff]  ;;  %v248_v5 = vld [vmem:[%s382_s1 + $0x10] sm:$0xff] }
   0x3   :  { %278 = vmatpush.bf16.msra.mxu2 %v253_v0  ;;  %279 = vmatpush.bf16.msra.mxu3 %v253_v0  ;;  %v247_v6 = vld [vmem:[%s382_s1 + $0x8] sm:$0xff]  ;;  %v246_v7 = vld [vmem:[%s382_s1] sm:$0xff]  ;;  %v244_v10 = vld [vmem:[%s385_s0 + $0x10] sm:$0xff] }
   0x4   :  { %v242_v8 = vld [vmem:[%s385_s0] sm:$0xff]  ;;  %v243_v9 = vld [vmem:[%s385_s0 + $0x8] sm:$0xff]  ;;  %v245_v11 = vld [vmem:[%s385_s0 + $0x18] sm:$0xff] }
   0x5   :  { %v301_v14 = vld [vmem:[%s383_s2] ss:$0 sm:$0xff] }
   0x6   :  { %114 = vmatpush.bf16.msra.mxu0 %v252_v1  ;;  %280 = vmatpush.bf16.msra.mxu1 %v252_v1  ;;  %v302_v16 = vld [vmem:[%s384_s3] ss:$0 sm:$0xff] }
   0x7   :  { %281 = vmatpush.bf16.msra.mxu2 %v252_v1  ;;  %282 = vmatpush.bf16.msra.mxu3 %v252_v1 }
   0xa   :  { %115 = vmatpush.bf16.msra.mxu0 %v251_v2  ;;  %283 = vmatpush.bf16.msra.mxu1 %v251_v2 }
   0xb   :  { %284 = vmatpush.bf16.msra.mxu2 %v251_v2  ;;  %285 = vmatpush.bf16.msra.mxu3 %v251_v2 }
   0xe   :  { %116 = vmatpush.bf16.msra.mxu0 %v250_v3  ;;  %286 = vmatpush.bf16.msra.mxu1 %v250_v3 }
   0xf   :  { %287 = vmatpush.bf16.msra.mxu2 %v250_v3  ;;  %288 = vmatpush.bf16.msra.mxu3 %v250_v3 }
  0x12   :  { %117 = vmatpush.bf16.msra.mxu0 %v249_v4  ;;  %289 = vmatpush.bf16.msra.mxu1 %v249_v4 }
  0x13   :  { %290 = vmatpush.bf16.msra.mxu2 %v249_v4  ;;  %291 = vmatpush.bf16.msra.mxu3 %v249_v4 }
  0x16   :  { %118 = vmatpush.bf16.msra.mxu0 %v248_v5  ;;  %292 = vmatpush.bf16.msra.mxu1 %v248_v5 }
  0x17   :  { %293 = vmatpush.bf16.msra.mxu2 %v248_v5  ;;  %294 = vmatpush.bf16.msra.mxu3 %v248_v5 }
  0x1a   :  { %119 = vmatpush.bf16.msra.mxu0 %v247_v6  ;;  %295 = vmatpush.bf16.msra.mxu1 %v247_v6 }
  0x1b   :  { %296 = vmatpush.bf16.msra.mxu2 %v247_v6  ;;  %297 = vmatpush.bf16.msra.mxu3 %v247_v6 }
  0x1e   :  { %120 = vmatpush.bf16.msra.mxu0 %v246_v7  ;;  %298 = vmatpush.bf16.msra.mxu1 %v246_v7 }
  0x1f   :  { %299 = vmatpush.bf16.msra.mxu2 %v246_v7  ;;  %300 = vmatpush.bf16.msra.mxu3 %v246_v7 }
  0x21   :  { %121 = vmatmul.bf16.vlgmr.msra.gmra.mxu0 %v242_v8  ;;  %126 = vmatmul.bf16.vlgmr.msra.gmra.mxu1 %v243_v9 }
  0x22   :  { %131 = vmatmul.bf16.vlgmr.msra.gmra.mxu2 %v244_v10  ;;  %136 = vmatmul.bf16.vlgmr.msra.gmra.mxu3 %v245_v11 }
  0x9e   :  { %v122_v12 = vpop.f32.mrf.mxu0  ;;  %v127_v13 = vpop.f32.mrf.mxu1 }
  0x9f   :  { %v146_v15 = vmul.f32 %v301_v14, %v122_v12  ;;  %v148_v17 = vmul.f32 %v301_v14, %v127_v13 }
  0xa1   :  { %v158_v22 = vadd.f32 %v302_v16, %v146_v15  ;;  %v160_v23 = vadd.f32 %v302_v16, %v148_v17 }
  0xa3   :  { %v166_v30 = vmax.f32 %v158_v22, 0.0  ;;  %v168_v31 = vmax.f32 %v160_v23, 0.0 }
  0xa5   :  { %v132_v18 = vpop.f32.mrf.mxu2  ;;  %v137_v19 = vpop.f32.mrf.mxu3 }
  0xa6   :  { %v124_v20 = vpop.f32.mrf.mxu0  ;;  %v129_v21 = vpop.f32.mrf.mxu1  ;;  %v150_v28 = vmul.f32 %v301_v14, %v132_v18  ;;  %v152_v29 = vmul.f32 %v301_v14, %v137_v19 }
  0xa7   :  { %v147_v24 = vmul.f32 %v301_v14, %v124_v20  ;;  %v149_v25 = vmul.f32 %v301_v14, %v129_v21 }
  0xa8   :  { %v162_v38 = vadd.f32 %v302_v16, %v150_v28  ;;  %v164_v39 = vadd.f32 %v302_v16, %v152_v29 }
  0xa9   :  { %v159_v26 = vadd.f32 %v302_v16, %v147_v24  ;;  %v161_v27 = vadd.f32 %v302_v16, %v149_v25 }
  0xaa   :  { %v170_v44 = vmax.f32 %v162_v38, 0.0  ;;  %v172_v45 = vmax.f32 %v164_v39, 0.0 }
  0xab   :  { %v167_v32 = vmax.f32 %v159_v26, 0.0  ;;  %v169_v33 = vmax.f32 %v161_v27, 0.0 }
  0xad   :  { %v257_v34 = vpack.c.bf16 %v167_v32, %v166_v30  ;;  %v262_v35 = vpack.c.bf16 %v169_v33, %v168_v31  ;;  %v134_v36 = vpop.f32.mrf.mxu2  ;;  %v139_v37 = vpop.f32.mrf.mxu3 }
  0xae   :  { %v151_v40 = vmul.f32 %v301_v14, %v134_v36  ;;  %v153_v41 = vmul.f32 %v301_v14, %v139_v37 }
  0xaf   :  { %258 = vst [vmem:[%s386_s4] sm:$0xff] %v257_v34  }
  0xb0   :  { %274 = vst [vmem:[%s386_s4 + $0x8] sm:$0xff] %v262_v35   ;;  %v163_v42 = vadd.f32 %v302_v16, %v151_v40  ;;  %v165_v43 = vadd.f32 %v302_v16, %v153_v41 }
  0xb2   :  { %v171_v46 = vmax.f32 %v163_v42, 0.0  ;;  %v173_v47 = vmax.f32 %v165_v43, 0.0 }
  0xb4   :  { %v267_v48 = vpack.c.bf16 %v171_v46, %v170_v44  ;;  %v272_v49 = vpack.c.bf16 %v173_v47, %v172_v45 }
  0xb6   :  { %275 = vst [vmem:[%s386_s4 + $0x10] sm:$0xff] %v267_v48  }
  0xb7   :  { %276 = vst [vmem:[%s386_s4 + $0x18] sm:$0xff] %v272_v49  }

// kernel: _forward_jit.25
= control target key start
LH: loop header
LB: loop body
LE: loop exit
PB: predicated region body
PF: predicated region fallthrough
CT: control target
= control target key end

     0   :  { %s445_s1 = inlined_call_operand.vmem [shape: bf16[128,128], index: 1, kind: input, shape index: {}]   ;;  %s446_s2 = inlined_call_operand.vmem [shape: f32[1,128], index: 2, kind: input, shape index: {}]   ;;  %s447_s3 = inlined_call_operand.vmem [shape: f32[1,128], index: 3, kind: input, shape index: {}]   ;;  %s448_s0 = inlined_call_operand.vmem [shape: bf16[64,128], index: 0, kind: input, shape index: {}]   ;;  %s449_s4 = inlined_call_operand.vmem [shape: bf16[64,128], index: 4, kind: input, shape index: {}]   ;;  %s450_s5 = inlined_call_operand.vmem [shape: bf16[64,128], index: 5, kind: output, shape index: {}]  }
   0x1   :  { %v280_v0 = vld [vmem:[%s445_s1 + $0x38] sm:$0xff]  ;;  %v279_v1 = vld [vmem:[%s445_s1 + $0x30] sm:$0xff]  ;;  %v278_v2 = vld [vmem:[%s445_s1 + $0x28] sm:$0xff] }
   0x2   :  { %116 = vmatpush.bf16.msra.mxu0 %v280_v0  ;;  %323 = vmatpush.bf16.msra.mxu1 %v280_v0  ;;  %v277_v3 = vld [vmem:[%s445_s1 + $0x20] sm:$0xff]  ;;  %v276_v4 = vld [vmem:[%s445_s1 + $0x18] sm:$0xff]  ;;  %v275_v5 = vld [vmem:[%s445_s1 + $0x10] sm:$0xff] }
   0x3   :  { %324 = vmatpush.bf16.msra.mxu2 %v280_v0  ;;  %325 = vmatpush.bf16.msra.mxu3 %v280_v0  ;;  %v274_v6 = vld [vmem:[%s445_s1 + $0x8] sm:$0xff]  ;;  %v273_v7 = vld [vmem:[%s445_s1] sm:$0xff]  ;;  %v271_v10 = vld [vmem:[%s448_s0 + $0x10] sm:$0xff] }
   0x4   :  { %v269_v8 = vld [vmem:[%s448_s0] sm:$0xff]  ;;  %v270_v9 = vld [vmem:[%s448_s0 + $0x8] sm:$0xff]  ;;  %v272_v11 = vld [vmem:[%s448_s0 + $0x18] sm:$0xff] }
   0x5   :  { %v347_v12 = vld [vmem:[%s446_s2] ss:$0 sm:$0xff]  ;;  %v317_v19 = vld [vmem:[%s449_s4 + $0x8] sm:$0xff]   ;;  %v318_v36 = vld [vmem:[%s449_s4 + $0x10] sm:$0xff]  }
   0x6   :  { %117 = vmatpush.bf16.msra.mxu0 %v279_v1  ;;  %326 = vmatpush.bf16.msra.mxu1 %v279_v1  ;;  %v348_v16 = vld [vmem:[%s447_s3] ss:$0 sm:$0xff]  ;;  %v287_v23 = vunpack.c.l.bf16 %v317_v19  ;;  %v288_v31 = vunpack.c.h.bf16 %v317_v19  ;;  %v319_v37 = vld [vmem:[%s449_s4 + $0x18] sm:$0xff]   ;;  %v291_v43 = vunpack.c.l.bf16 %v318_v36  ;;  %v292_v53 = vunpack.c.h.bf16 %v318_v36 }
   0x7   :  { %327 = vmatpush.bf16.msra.mxu2 %v279_v1  ;;  %328 = vmatpush.bf16.msra.mxu3 %v279_v1  ;;  %v282_v18 = vld [vmem:[%s449_s4] sm:$0xff]   ;;  %v295_v45 = vunpack.c.l.bf16 %v319_v37  ;;  %v296_v55 = vunpack.c.h.bf16 %v319_v37 }
   0x8   :  { %v283_v21 = vunpack.c.l.bf16 %v282_v18  ;;  %v284_v29 = vunpack.c.h.bf16 %v282_v18 }
   0xa   :  { %118 = vmatpush.bf16.msra.mxu0 %v278_v2  ;;  %329 = vmatpush.bf16.msra.mxu1 %v278_v2 }
   0xb   :  { %330 = vmatpush.bf16.msra.mxu2 %v278_v2  ;;  %331 = vmatpush.bf16.msra.mxu3 %v278_v2 }
   0xe   :  { %119 = vmatpush.bf16.msra.mxu0 %v277_v3  ;;  %332 = vmatpush.bf16.msra.mxu1 %v277_v3 }
   0xf   :  { %333 = vmatpush.bf16.msra.mxu2 %v277_v3  ;;  %334 = vmatpush.bf16.msra.mxu3 %v277_v3 }
  0x12   :  { %120 = vmatpush.bf16.msra.mxu0 %v276_v4  ;;  %335 = vmatpush.bf16.msra.mxu1 %v276_v4 }
  0x13   :  { %336 = vmatpush.bf16.msra.mxu2 %v276_v4  ;;  %337 = vmatpush.bf16.msra.mxu3 %v276_v4 }
  0x16   :  { %121 = vmatpush.bf16.msra.mxu0 %v275_v5  ;;  %338 = vmatpush.bf16.msra.mxu1 %v275_v5 }
  0x17   :  { %339 = vmatpush.bf16.msra.mxu2 %v275_v5  ;;  %340 = vmatpush.bf16.msra.mxu3 %v275_v5 }
  0x1a   :  { %122 = vmatpush.bf16.msra.mxu0 %v274_v6  ;;  %341 = vmatpush.bf16.msra.mxu1 %v274_v6 }
  0x1b   :  { %342 = vmatpush.bf16.msra.mxu2 %v274_v6  ;;  %343 = vmatpush.bf16.msra.mxu3 %v274_v6 }
  0x1e   :  { %123 = vmatpush.bf16.msra.mxu0 %v273_v7  ;;  %344 = vmatpush.bf16.msra.mxu1 %v273_v7 }
  0x1f   :  { %345 = vmatpush.bf16.msra.mxu2 %v273_v7  ;;  %346 = vmatpush.bf16.msra.mxu3 %v273_v7 }
  0x21   :  { %124 = vmatmul.bf16.vlgmr.msra.gmra.mxu0 %v269_v8  ;;  %129 = vmatmul.bf16.vlgmr.msra.gmra.mxu1 %v270_v9 }
  0x22   :  { %134 = vmatmul.bf16.vlgmr.msra.gmra.mxu2 %v271_v10  ;;  %139 = vmatmul.bf16.vlgmr.msra.gmra.mxu3 %v272_v11 }
  0x9e   :  { %v125_v13 = vpop.f32.mrf.mxu0  ;;  %v130_v14 = vpop.f32.mrf.mxu1 }
  0x9f   :  { %v149_v15 = vmul.f32 %v347_v12, %v125_v13  ;;  %v151_v17 = vmul.f32 %v347_v12, %v130_v14 }
  0xa1   :  { %v161_v20 = vadd.f32 %v348_v16, %v149_v15  ;;  %v163_v22 = vadd.f32 %v348_v16, %v151_v17 }
  0xa3   :  { %v185_v34 = vadd.f32 %v283_v21, %v161_v20  ;;  %v187_v35 = vadd.f32 %v287_v23, %v163_v22 }
  0xa5   :  { %v135_v24 = vpop.f32.mrf.mxu2  ;;  %v140_v25 = vpop.f32.mrf.mxu3  ;;  %v193_v46 = vmax.f32 %v185_v34, 0.0  ;;  %v195_v47 = vmax.f32 %v187_v35, 0.0 }
  0xa6   :  { %v127_v26 = vpop.f32.mrf.mxu0  ;;  %v132_v27 = vpop.f32.mrf.mxu1  ;;  %v153_v32 = vmul.f32 %v347_v12, %v135_v24  ;;  %v155_v33 = vmul.f32 %v347_v12, %v140_v25 }
  0xa7   :  { %v150_v28 = vmul.f32 %v347_v12, %v127_v26  ;;  %v152_v30 = vmul.f32 %v347_v12, %v132_v27 }
  0xa8   :  { %v165_v42 = vadd.f32 %v348_v16, %v153_v32  ;;  %v167_v44 = vadd.f32 %v348_v16, %v155_v33 }
  0xa9   :  { %v162_v38 = vadd.f32 %v348_v16, %v150_v28  ;;  %v164_v39 = vadd.f32 %v348_v16, %v152_v30 }
  0xaa   :  { %v189_v58 = vadd.f32 %v291_v43, %v165_v42  ;;  %v191_v59 = vadd.f32 %v295_v45, %v167_v44 }
  0xab   :  { %v186_v40 = vadd.f32 %v284_v29, %v162_v38  ;;  %v188_v41 = vadd.f32 %v288_v31, %v164_v39 }
  0xac   :  { %v197_v0 = vmax.f32 %v189_v58, 0.0  ;;  %v199_v1 = vmax.f32 %v191_v59, 0.0 }
  0xad   :  { %v194_v48 = vmax.f32 %v186_v40, 0.0  ;;  %v196_v49 = vmax.f32 %v188_v41, 0.0  ;;  %v137_v50 = vpop.f32.mrf.mxu2  ;;  %v142_v51 = vpop.f32.mrf.mxu3 }
  0xae   :  { %v154_v52 = vmul.f32 %v347_v12, %v137_v50  ;;  %v156_v54 = vmul.f32 %v347_v12, %v142_v51 }
  0xaf   :  { %v300_v56 = vpack.c.bf16 %v194_v48, %v193_v46  ;;  %v305_v57 = vpack.c.bf16 %v196_v49, %v195_v47 }
  0xb0   :  { %v166_v60 = vadd.f32 %v348_v16, %v154_v52  ;;  %v168_v61 = vadd.f32 %v348_v16, %v156_v54 }
  0xb1   :  { %301 = vst [vmem:[%s450_s5] sm:$0xff] %v300_v56  }
  0xb2   :  { %320 = vst [vmem:[%s450_s5 + $0x8] sm:$0xff] %v305_v57   ;;  %v190_v62 = vadd.f32 %v292_v53, %v166_v60  ;;  %v192_v63 = vadd.f32 %v296_v55, %v168_v61 }
  0xb4   :  { %v198_v2 = vmax.f32 %v190_v62, 0.0  ;;  %v200_v3 = vmax.f32 %v192_v63, 0.0 }
  0xb6   :  { %v310_v4 = vpack.c.bf16 %v198_v2, %v197_v0  ;;  %v315_v5 = vpack.c.bf16 %v200_v3, %v199_v1 }
  0xb8   :  { %321 = vst [vmem:[%s450_s5 + $0x10] sm:$0xff] %v310_v4  }
  0xb9   :  { %322 = vst [vmem:[%s450_s5 + $0x18] sm:$0xff] %v315_v5  }

// kernel: _forward_jit.26
= control target key start
LH: loop header
LB: loop body
LE: loop exit
PB: predicated region body
PF: predicated region fallthrough
CT: control target
= control target key end

     0   :  { %s238_s1 = inlined_call_operand.vmem [shape: bf16[128,128], index: 1, kind: input, shape index: {}]   ;;  %s239_s2 = inlined_call_operand.vmem [shape: f32[1,128], index: 2, kind: input, shape index: {}]   ;;  %s240_s3 = inlined_call_operand.vmem [shape: f32[1,128], index: 3, kind: input, shape index: {}]   ;;  %s241_s0 = inlined_call_operand.vmem [shape: bf16[16,128], index: 0, kind: input, shape index: {}]   ;;  %s242_s4 = inlined_call_operand.vmem [shape: bf16[16,128], index: 4, kind: output, shape index: {}]  }
   0x1   :  { %v169_v0 = vld [vmem:[%s238_s1 + $0x38] sm:$0xff]  ;;  %v168_v1 = vld [vmem:[%s238_s1 + $0x30] sm:$0xff]  ;;  %v167_v2 = vld [vmem:[%s238_s1 + $0x28] sm:$0xff] }
   0x2   :  { %89 = vmatpush.bf16.msra.mxu0 %v169_v0  ;;  %v166_v3 = vld [vmem:[%s238_s1 + $0x20] sm:$0xff]  ;;  %v165_v4 = vld [vmem:[%s238_s1 + $0x18] sm:$0xff]  ;;  %v164_v5 = vld [vmem:[%s238_s1 + $0x10] sm:$0xff] }
   0x3   :  { %v163_v6 = vld [vmem:[%s238_s1 + $0x8] sm:$0xff]  ;;  %v162_v7 = vld [vmem:[%s238_s1] sm:$0xff] }
   0x4   :  { %v161_v8 = vld [vmem:[%s241_s0] sm:$0xff] }
   0x5   :  { %v175_v10 = vld [vmem:[%s239_s2] ss:$0 sm:$0xff] }
   0x6   :  { %90 = vmatpush.bf16.msra.mxu0 %v168_v1  ;;  %v176_v12 = vld [vmem:[%s240_s3] ss:$0 sm:$0xff] }
   0xa   :  { %91 = vmatpush.bf16.msra.mxu0 %v167_v2 }
   0xe   :  { %92 = vmatpush.bf16.msra.mxu0 %v166_v3 }
  0x12   :  { %93 = vmatpush.bf16.msra.mxu0 %v165_v4 }
  0x16   :  { %94 = vmatpush.bf16.msra.mxu0 %v164_v5 }
  0x1a   :  { %95 = vmatpush.bf16.msra.mxu0 %v163_v6 }
  0x1e   :  { %96 = vmatpush.bf16.msra.mxu0 %v162_v7 }
  0x21   :  { %97 = vmatmul.bf16.vlgmr.msra.gmra.mxu0 %v161_v8 }
  0x9e   :  { %v98_v9 = vpop.f32.mrf.mxu0 }
  0x9f   :  { %v107_v11 = vmul.f32 %v175_v10, %v98_v9 }
  0xa1   :  { %v113_v14 = vadd.f32 %v176_v12, %v107_v11 }
  0xa3   :  { %v115_v17 = vmax.f32 %v113_v14, 0.0 }
  0xa6   :  { %v100_v13 = vpop.f32.mrf.mxu0 }
  0xa7   :  { %v108_v15 = vmul.f32 %v175_v10, %v100_v13 }
  0xa9   :  { %v114_v16 = vadd.f32 %v176_v12, %v108_v15 }
  0xab   :  { %v116_v18 = vmax.f32 %v114_v16, 0.0 }
  0xad   :  { %v173_v19 = vpack.c.bf16 %v116_v18, %v115_v17 }
  0xaf   :  { %174 = vst [vmem:[%s242_s4] sm:$0xff] %v173_v19  }

// kernel: _forward_jit.27
= control target key start
LH: loop header
LB: loop body
LE: loop exit
PB: predicated region body
PF: predicated region fallthrough
CT: control target
= control target key end

     0   :  { %s398_s1 = inlined_call_operand.vmem [shape: bf16[256,128], index: 1, kind: input, shape index: {}]   ;;  %s399_s0 = inlined_call_operand.vmem [shape: bf16[16,256], index: 0, kind: input, shape index: {}]   ;;  %s400_s2 = inlined_call_operand.vmem [shape: f32[1,128], index: 2, kind: input, shape index: {}]   ;;  %s401_s3 = inlined_call_operand.vmem [shape: f32[1,128], index: 3, kind: input, shape index: {}]   ;;  %s402_s4 = inlined_call_operand.vmem [shape: bf16[16,128], index: 4, kind: output, shape index: {}]  }
   0x1   :  { %v288_v0 = vld [vmem:[%s398_s1 + $0x38] sm:$0xff]  ;;  %v287_v2 = vld [vmem:[%s398_s1 + $0x30] sm:$0xff]  ;;  %v286_v4 = vld [vmem:[%s398_s1 + $0x28] sm:$0xff] }
   0x2   :  { %v296_v1 = vld [vmem:[%s398_s1 + $0x78] sm:$0xff]  ;;  %157 = vmatpush.bf16.msra.mxu0 %v288_v0  ;;  %v295_v3 = vld [vmem:[%s398_s1 + $0x70] sm:$0xff]  ;;  %v294_v5 = vld [vmem:[%s398_s1 + $0x68] sm:$0xff] }
   0x3   :  { %171 = vmatpush.bf16.msra.mxu1 %v296_v1  ;;  %v285_v6 = vld [vmem:[%s398_s1 + $0x20] sm:$0xff]  ;;  %v284_v8 = vld [vmem:[%s398_s1 + $0x18] sm:$0xff]  ;;  %v283_v10 = vld [vmem:[%s398_s1 + $0x10] sm:$0xff] }
   0x4   :  { %v293_v7 = vld [vmem:[%s398_s1 + $0x60] sm:$0xff]  ;;  %v292_v9 = vld [vmem:[%s398_s1 + $0x58] sm:$0xff]  ;;  %v291_v11 = vld [vmem:[%s398_s1 + $0x50] sm:$0xff] }
   0x5   :  { %v282_v12 = vld [vmem:[%s398_s1 + $0x8] sm:$0xff]  ;;  %v281_v14 = vld [vmem:[%s398_s1] sm:$0xff] }
   0x6   :  { %158 = vmatpush.bf16.msra.mxu0 %v287_v2  ;;  %v290_v13 = vld [vmem:[%s398_s1 + $0x48] sm:$0xff]  ;;  %v289_v15 = vld [vmem:[%s398_s1 + $0x40] sm:$0xff] }
   0x7   :  { %172 = vmatpush.bf16.msra.mxu1 %v295_v3  ;;  %v209_v16 = vld [vmem:[%s399_s0] sm:$0xf]  ;;  %v280_v17 = vld [vmem:[%s399_s0 + $0x4] sm:$0xf0]  ;;  %v279_v18 = vld [vmem:[%s399_s0 + $0x4] sm:$0xf] }
   0x8   :  { %v211_v19 = vld [vmem:[%s399_s0 + $0x8] sm:$0xf0]  ;;  %v210_v20 = vor.u32 %v280_v17, %v209_v16  ;;  %v302_v25 = vld [vmem:[%s400_s2] ss:$0 sm:$0xff] }
   0x9   :  { %v214_v21 = vor.u32 %v279_v18, %v211_v19  ;;  %v303_v27 = vld [vmem:[%s401_s3] ss:$0 sm:$0xff] }
   0xa   :  { %159 = vmatpush.bf16.msra.mxu0 %v286_v4 }
   0xb   :  { %173 = vmatpush.bf16.msra.mxu1 %v294_v5 }
   0xe   :  { %160 = vmatpush.bf16.msra.mxu0 %v285_v6 }
   0xf   :  { %174 = vmatpush.bf16.msra.mxu1 %v293_v7 }
  0x12   :  { %161 = vmatpush.bf16.msra.mxu0 %v284_v8 }
  0x13   :  { %175 = vmatpush.bf16.msra.mxu1 %v292_v9 }
  0x16   :  { %162 = vmatpush.bf16.msra.mxu0 %v283_v10 }
  0x17   :  { %176 = vmatpush.bf16.msra.mxu1 %v291_v11 }
  0x1a   :  { %163 = vmatpush.bf16.msra.mxu0 %v282_v12 }
  0x1b   :  { %177 = vmatpush.bf16.msra.mxu1 %v290_v13 }
  0x1e   :  { %164 = vmatpush.bf16.msra.mxu0 %v281_v14 }
  0x1f   :  { %178 = vmatpush.bf16.msra.mxu1 %v289_v15 }
  0x21   :  { %165 = vmatmul.bf16.vlgmr.msra.gmra.mxu0 %v210_v20 }
  0x22   :  { %179 = vmatmul.bf16.vlgmr.msra.gmra.mxu1 %v214_v21 }
  0x9e   :  { %v166_v22 = vpop.f32.mrf.mxu0 }
  0x9f   :  { %v180_v23 = vpop.f32.mrf.mxu1 }
  0xa0   :  { %v181_v24 = vadd.f32 %v180_v23, %v166_v22 }
  0xa2   :  { %v189_v26 = vmul.f32 %v302_v25, %v181_v24 }
  0xa4   :  { %v195_v31 = vadd.f32 %v303_v27, %v189_v26 }
  0xa6   :  { %v168_v28 = vpop.f32.mrf.mxu0  ;;  %v197_v34 = vmax.f32 %v195_v31, 0.0 }
  0xa7   :  { %v182_v29 = vpop.f32.mrf.mxu1 }
  0xa8   :  { %v183_v30 = vadd.f32 %v182_v29, %v168_v28 }
  0xaa   :  { %v190_v32 = vmul.f32 %v302_v25, %v183_v30 }
  0xac   :  { %v196_v33 = vadd.f32 %v303_v27, %v190_v32 }
  0xae   :  { %v198_v35 = vmax.f32 %v196_v33, 0.0 }
  0xb0   :  { %v300_v36 = vpack.c.bf16 %v198_v35, %v197_v34 }
  0xb2   :  { %301 = vst [vmem:[%s402_s4] sm:$0xff] %v300_v36  }

// kernel: _forward_jit.29
= control target key start
LH: loop header
LB: loop body
LE: loop exit
PB: predicated region body
PF: predicated region fallthrough
CT: control target
= control target key end

     0   :  { %s215_s1 = inlined_call_operand.vmem [shape: bf16[128,128], index: 1, kind: input, shape index: {}]   ;;  %s216_s2 = inlined_call_operand.vmem [shape: f32[1,128], index: 2, kind: input, shape index: {}]   ;;  %s217_s3 = inlined_call_operand.vmem [shape: f32[1,128], index: 3, kind: input, shape index: {}]   ;;  %s218_s0 = inlined_call_operand.vmem [shape: bf16[8,128], index: 0, kind: input, shape index: {}]   ;;  %s219_s4 = inlined_call_operand.vmem [shape: bf16[8,128], index: 4, kind: output, shape index: {}]  }
   0x1   :  { %v151_v0 = vld [vmem:[%s215_s1 + $0x38] sm:$0xff]  ;;  %v150_v1 = vld [vmem:[%s215_s1 + $0x30] sm:$0xff]  ;;  %v149_v2 = vld [vmem:[%s215_s1 + $0x28] sm:$0xff] }
   0x2   :  { %82 = vmatpush.bf16.msra.mxu0 %v151_v0  ;;  %v148_v3 = vld [vmem:[%s215_s1 + $0x20] sm:$0xff]  ;;  %v147_v4 = vld [vmem:[%s215_s1 + $0x18] sm:$0xff]  ;;  %v146_v5 = vld [vmem:[%s215_s1 + $0x10] sm:$0xff] }
   0x3   :  { %v145_v6 = vld [vmem:[%s215_s1 + $0x8] sm:$0xff]  ;;  %v144_v7 = vld [vmem:[%s215_s1] sm:$0xff] }
   0x4   :  { %v17_v8 = vld [vmem:[%s218_s0] sm:$0xf] }
   0x5   :  { %v152_v9 = vld [vmem:[%s216_s2] ss:$0 sm:$0xff] }
   0x6   :  { %83 = vmatpush.bf16.msra.mxu0 %v150_v1  ;;  %v153_v10 = vld [vmem:[%s217_s3] ss:$0 sm:$0xff] }
   0xa   :  { %84 = vmatpush.bf16.msra.mxu0 %v149_v2 }
   0xe   :  { %85 = vmatpush.bf16.msra.mxu0 %v148_v3 }
  0x12   :  { %86 = vmatpush.bf16.msra.mxu0 %v147_v4 }
  0x16   :  { %87 = vmatpush.bf16.msra.mxu0 %v146_v5 }
  0x1a   :  { %88 = vmatpush.bf16.msra.mxu0 %v145_v6 }
  0x1e   :  { %89 = vmatpush.bf16.msra.mxu0 %v144_v7 }
  0x21   :  { %90 = vmatmul.bf16.vlgmr.msra.gmra.mxu0 %v17_v8 }
  0x9e   :  { %v91_v11 = vpop.f32.mrf.mxu0 }
  0x9f   :  { %v99_v12 = vmul.f32 %v152_v9, %v91_v11 }
  0xa1   :  { %v104_v13 = vadd.f32 %v153_v10, %v99_v12 }
  0xa3   :  { %v105_v14 = vmax.f32 %v104_v13, 0.0 }
  0xa5   :  { %v106_v15 = vpack.c.bf16 %v105_v14, %v105_v14 }
  0xa6   :  { %v93_v16 = vpop.f32.mrf.mxu0 }
  0xa7   :  { %107 = vst [vmem:[%s219_s4] sm:$0xf] %v106_v15 }

// kernel: _forward_jit.28
= control target key start
LH: loop header
LB: loop body
LE: loop exit
PB: predicated region body
PF: predicated region fallthrough
CT: control target
= control target key end

     0   :  { %s419_s1 = inlined_call_operand.vmem [shape: bf16[256,128], index: 1, kind: input, shape index: {}]   ;;  %s420_s0 = inlined_call_operand.vmem [shape: bf16[16,256], index: 0, kind: input, shape index: {}]   ;;  %s421_s2 = inlined_call_operand.vmem [shape: f32[1,128], index: 2, kind: input, shape index: {}]   ;;  %s422_s3 = inlined_call_operand.vmem [shape: f32[1,128], index: 3, kind: input, shape index: {}]   ;;  %s423_s4 = inlined_call_operand.vmem [shape: bf16[16,128], index: 4, kind: input, shape index: {}]   ;;  %s424_s5 = inlined_call_operand.vmem [shape: bf16[16,128], index: 5, kind: output, shape index: {}]  }
   0x1   :  { %v297_v0 = vld [vmem:[%s419_s1 + $0x38] sm:$0xff]  ;;  %v296_v2 = vld [vmem:[%s419_s1 + $0x30] sm:$0xff]  ;;  %v295_v4 = vld [vmem:[%s419_s1 + $0x28] sm:$0xff] }
   0x2   :  { %v305_v1 = vld [vmem:[%s419_s1 + $0x78] sm:$0xff]  ;;  %160 = vmatpush.bf16.msra.mxu0 %v297_v0  ;;  %v304_v3 = vld [vmem:[%s419_s1 + $0x70] sm:$0xff]  ;;  %v303_v5 = vld [vmem:[%s419_s1 + $0x68] sm:$0xff] }
   0x3   :  { %174 = vmatpush.bf16.msra.mxu1 %v305_v1  ;;  %v294_v6 = vld [vmem:[%s419_s1 + $0x20] sm:$0xff]  ;;  %v293_v8 = vld [vmem:[%s419_s1 + $0x18] sm:$0xff]  ;;  %v292_v10 = vld [vmem:[%s419_s1 + $0x10] sm:$0xff] }
   0x4   :  { %v302_v7 = vld [vmem:[%s419_s1 + $0x60] sm:$0xff]  ;;  %v301_v9 = vld [vmem:[%s419_s1 + $0x58] sm:$0xff]  ;;  %v300_v11 = vld [vmem:[%s419_s1 + $0x50] sm:$0xff] }
   0x5   :  { %v291_v12 = vld [vmem:[%s419_s1 + $0x8] sm:$0xff]  ;;  %v290_v14 = vld [vmem:[%s419_s1] sm:$0xff] }
   0x6   :  { %161 = vmatpush.bf16.msra.mxu0 %v296_v2  ;;  %v299_v13 = vld [vmem:[%s419_s1 + $0x48] sm:$0xff]  ;;  %v298_v15 = vld [vmem:[%s419_s1 + $0x40] sm:$0xff] }
   0x7   :  { %175 = vmatpush.bf16.msra.mxu1 %v304_v3  ;;  %v218_v16 = vld [vmem:[%s420_s0] sm:$0xf]  ;;  %v289_v17 = vld [vmem:[%s420_s0 + $0x4] sm:$0xf0]  ;;  %v288_v18 = vld [vmem:[%s420_s0 + $0x4] sm:$0xf] }
   0x8   :  { %v220_v19 = vld [vmem:[%s420_s0 + $0x8] sm:$0xf0]  ;;  %v219_v20 = vor.u32 %v289_v17, %v218_v16  ;;  %v315_v25 = vld [vmem:[%s421_s2] ss:$0 sm:$0xff] }
   0x9   :  { %v223_v21 = vor.u32 %v288_v18, %v220_v19  ;;  %v316_v27 = vld [vmem:[%s422_s3] ss:$0 sm:$0xff] }
   0xa   :  { %162 = vmatpush.bf16.msra.mxu0 %v295_v4  ;;  %v307_v28 = vld [vmem:[%s423_s4] sm:$0xff]  }
   0xb   :  { %176 = vmatpush.bf16.msra.mxu1 %v303_v5  ;;  %v308_v32 = vunpack.c.l.bf16 %v307_v28  ;;  %v309_v35 = vunpack.c.h.bf16 %v307_v28 }
   0xe   :  { %163 = vmatpush.bf16.msra.mxu0 %v294_v6 }
   0xf   :  { %177 = vmatpush.bf16.msra.mxu1 %v302_v7 }
  0x12   :  { %164 = vmatpush.bf16.msra.mxu0 %v293_v8 }
  0x13   :  { %178 = vmatpush.bf16.msra.mxu1 %v301_v9 }
  0x16   :  { %165 = vmatpush.bf16.msra.mxu0 %v292_v10 }
  0x17   :  { %179 = vmatpush.bf16.msra.mxu1 %v300_v11 }
  0x1a   :  { %166 = vmatpush.bf16.msra.mxu0 %v291_v12 }
  0x1b   :  { %180 = vmatpush.bf16.msra.mxu1 %v299_v13 }
  0x1e   :  { %167 = vmatpush.bf16.msra.mxu0 %v290_v14 }
  0x1f   :  { %181 = vmatpush.bf16.msra.mxu1 %v298_v15 }
  0x21   :  { %168 = vmatmul.bf16.vlgmr.msra.gmra.mxu0 %v219_v20 }
  0x22   :  { %182 = vmatmul.bf16.vlgmr.msra.gmra.mxu1 %v223_v21 }
  0x9e   :  { %v169_v22 = vpop.f32.mrf.mxu0 }
  0x9f   :  { %v183_v23 = vpop.f32.mrf.mxu1 }
  0xa0   :  { %v184_v24 = vadd.f32 %v183_v23, %v169_v22 }
  0xa2   :  { %v192_v26 = vmul.f32 %v315_v25, %v184_v24 }
  0xa4   :  { %v198_v31 = vadd.f32 %v316_v27, %v192_v26 }
  0xa6   :  { %v171_v29 = vpop.f32.mrf.mxu0  ;;  %v204_v36 = vadd.f32 %v308_v32, %v198_v31 }
  0xa7   :  { %v185_v30 = vpop.f32.mrf.mxu1 }
  0xa8   :  { %v186_v33 = vadd.f32 %v185_v30, %v171_v29  ;;  %v206_v39 = vmax.f32 %v204_v36, 0.0 }
  0xaa   :  { %v193_v34 = vmul.f32 %v315_v25, %v186_v33 }
  0xac   :  { %v199_v37 = vadd.f32 %v316_v27, %v193_v34 }
  0xae   :  { %v205_v38 = vadd.f32 %v309_v35, %v199_v37 }
  0xb0   :  { %v207_v40 = vmax.f32 %v205_v38, 0.0 }
  0xb2   :  { %v313_v41 = vpack.c.bf16 %v207_v40, %v206_v39 }
  0xb4   :  { %314 = vst [vmem:[%s424_s5] sm:$0xff] %v313_v41  }

// kernel: _forward_jit.30
= control target key start
LH: loop header
LB: loop body
LE: loop exit
PB: predicated region body
PF: predicated region fallthrough
CT: control target
= control target key end

     0   :  { %s656_s1 = inlined_call_operand.vmem [shape: bf16[512,128], index: 1, kind: input, shape index: {}]   ;;  %s657_s0 = inlined_call_operand.vmem [shape: bf16[8,512], index: 0, kind: input, shape index: {}]   ;;  %s658_s2 = inlined_call_operand.vmem [shape: f32[1,128], index: 2, kind: input, shape index: {}]   ;;  %s659_s3 = inlined_call_operand.vmem [shape: f32[1,128], index: 3, kind: input, shape index: {}]   ;;  %s660_s4 = inlined_call_operand.vmem [shape: bf16[8,128], index: 4, kind: output, shape index: {}]  }
   0x1   :  { %v493_v0 = vld [vmem:[%s656_s1 + $0x38] sm:$0xff]  ;;  %v492_v4 = vld [vmem:[%s656_s1 + $0x30] sm:$0xff]  ;;  %v491_v8 = vld [vmem:[%s656_s1 + $0x28] sm:$0xff] }
   0x2   :  { %v501_v1 = vld [vmem:[%s656_s1 + $0x78] sm:$0xff]  ;;  %289 = vmatpush.bf16.msra.mxu0 %v493_v0  ;;  %v500_v5 = vld [vmem:[%s656_s1 + $0x70] sm:$0xff]  ;;  %v499_v9 = vld [vmem:[%s656_s1 + $0x68] sm:$0xff] }
   0x3   :  { %v509_v2 = vld [vmem:[%s656_s1 + $0xb8] sm:$0xff]  ;;  %302 = vmatpush.bf16.msra.mxu1 %v501_v1  ;;  %v508_v6 = vld [vmem:[%s656_s1 + $0xb0] sm:$0xff]  ;;  %v507_v10 = vld [vmem:[%s656_s1 + $0xa8] sm:$0xff] }
   0x4   :  { %v517_v3 = vld [vmem:[%s656_s1 + $0xf8] sm:$0xff]  ;;  %315 = vmatpush.bf16.msra.mxu2 %v509_v2  ;;  %v516_v7 = vld [vmem:[%s656_s1 + $0xf0] sm:$0xff]  ;;  %v515_v11 = vld [vmem:[%s656_s1 + $0xe8] sm:$0xff] }
   0x5   :  { %328 = vmatpush.bf16.msra.mxu3 %v517_v3  ;;  %v490_v12 = vld [vmem:[%s656_s1 + $0x20] sm:$0xff]  ;;  %v489_v16 = vld [vmem:[%s656_s1 + $0x18] sm:$0xff]  ;;  %v488_v20 = vld [vmem:[%s656_s1 + $0x10] sm:$0xff] }
   0x6   :  { %290 = vmatpush.bf16.msra.mxu0 %v492_v4  ;;  %v498_v13 = vld [vmem:[%s656_s1 + $0x60] sm:$0xff]  ;;  %v497_v17 = vld [vmem:[%s656_s1 + $0x58] sm:$0xff]  ;;  %v496_v21 = vld [vmem:[%s656_s1 + $0x50] sm:$0xff] }
   0x7   :  { %303 = vmatpush.bf16.msra.mxu1 %v500_v5  ;;  %v506_v14 = vld [vmem:[%s656_s1 + $0xa0] sm:$0xff]  ;;  %v505_v18 = vld [vmem:[%s656_s1 + $0x98] sm:$0xff]  ;;  %v504_v22 = vld [vmem:[%s656_s1 + $0x90] sm:$0xff] }
   0x8   :  { %316 = vmatpush.bf16.msra.mxu2 %v508_v6  ;;  %v514_v15 = vld [vmem:[%s656_s1 + $0xe0] sm:$0xff]  ;;  %v513_v19 = vld [vmem:[%s656_s1 + $0xd8] sm:$0xff]  ;;  %v512_v23 = vld [vmem:[%s656_s1 + $0xd0] sm:$0xff] }
   0x9   :  { %329 = vmatpush.bf16.msra.mxu3 %v516_v7  ;;  %v487_v24 = vld [vmem:[%s656_s1 + $0x8] sm:$0xff]  ;;  %v17_v26 = vld [vmem:[%s657_s0] sm:$0xff] }
   0xa   :  { %291 = vmatpush.bf16.msra.mxu0 %v491_v8  ;;  %v495_v25 = vld [vmem:[%s656_s1 + $0x48] sm:$0xff]  ;;  %v85_v30 = vunpack.c.l.b16 %v17_v26  ;;  %v86_v31 = vunpack.c.h.b16 %v17_v26  ;;  %v486_v32 = vld [vmem:[%s656_s1] sm:$0xff] }
   0xb   :  { %304 = vmatpush.bf16.msra.mxu1 %v499_v9  ;;  %v503_v27 = vld [vmem:[%s656_s1 + $0x88] sm:$0xff]  ;;  %v494_v33 = vld [vmem:[%s656_s1 + $0x40] sm:$0xff] }
   0xc   :  { %317 = vmatpush.bf16.msra.mxu2 %v507_v10  ;;  %v511_v28 = vld [vmem:[%s656_s1 + $0xc8] sm:$0xff]  ;;  %v502_v36 = vld [vmem:[%s656_s1 + $0x80] sm:$0xff]  ;;  %v89_v38 = vpack.c.b16 %v85_v30, %v85_v30  ;;  %v90_v39 = vpack.c.b16 %v86_v31, %v86_v31 }
   0xd   :  { %330 = vmatpush.bf16.msra.mxu3 %v515_v11  ;;  %v18_v29 = vld [vmem:[%s657_s0 + $0x8] sm:$0xff]  ;;  %v510_v37 = vld [vmem:[%s656_s1 + $0xc0] sm:$0xff] }
   0xe   :  { %292 = vmatpush.bf16.msra.mxu0 %v490_v12  ;;  %v87_v34 = vunpack.c.l.b16 %v18_v29  ;;  %v88_v35 = vunpack.c.h.b16 %v18_v29  ;;  %v518_v48 = vld [vmem:[%s658_s2] ss:$0 sm:$0xff] }
   0xf   :  { %305 = vmatpush.bf16.msra.mxu1 %v498_v13  ;;  %v519_v52 = vld [vmem:[%s659_s3] ss:$0 sm:$0xff] }
  0x10   :  { %318 = vmatpush.bf16.msra.mxu2 %v506_v14  ;;  %v91_v40 = vpack.c.b16 %v87_v34, %v87_v34  ;;  %v92_v41 = vpack.c.b16 %v88_v35, %v88_v35 }
  0x11   :  { %331 = vmatpush.bf16.msra.mxu3 %v514_v15 }
  0x12   :  { %293 = vmatpush.bf16.msra.mxu0 %v489_v16 }
  0x13   :  { %306 = vmatpush.bf16.msra.mxu1 %v497_v17 }
  0x14   :  { %319 = vmatpush.bf16.msra.mxu2 %v505_v18 }
  0x15   :  { %332 = vmatpush.bf16.msra.mxu3 %v513_v19 }
  0x16   :  { %294 = vmatpush.bf16.msra.mxu0 %v488_v20 }
  0x17   :  { %307 = vmatpush.bf16.msra.mxu1 %v496_v21 }
  0x18   :  { %320 = vmatpush.bf16.msra.mxu2 %v504_v22 }
  0x19   :  { %333 = vmatpush.bf16.msra.mxu3 %v512_v23 }
  0x1a   :  { %295 = vmatpush.bf16.msra.mxu0 %v487_v24 }
  0x1b   :  { %308 = vmatpush.bf16.msra.mxu1 %v495_v25 }
  0x1c   :  { %321 = vmatpush.bf16.msra.mxu2 %v503_v27 }
  0x1d   :  { %334 = vmatpush.bf16.msra.mxu3 %v511_v28 }
  0x1e   :  { %296 = vmatpush.bf16.msra.mxu0 %v486_v32 }
  0x1f   :  { %309 = vmatpush.bf16.msra.mxu1 %v494_v33 }
  0x20   :  { %322 = vmatpush.bf16.msra.mxu2 %v502_v36 }
  0x21   :  { %335 = vmatpush.bf16.msra.mxu3 %v510_v37  ;;  %297 = vmatmul.bf16.vlgmr.msra.gmra.mxu0 %v89_v38 }
  0x22   :  { %310 = vmatmul.bf16.vlgmr.msra.gmra.mxu1 %v90_v39 }
  0x23   :  { %323 = vmatmul.bf16.vlgmr.msra.gmra.mxu2 %v91_v40 }
  0x24   :  { %336 = vmatmul.bf16.vlgmr.msra.gmra.mxu3 %v92_v41 }
  0x9e   :  { %v298_v42 = vpop.f32.mrf.mxu0 }
  0x9f   :  { %v311_v43 = vpop.f32.mrf.mxu1 }
  0xa0   :  { %v312_v44 = vadd.f32 %v311_v43, %v298_v42 }
  0xa6   :  { %v324_v45 = vpop.f32.mrf.mxu2  ;;  %v300_v49 = vpop.f32.mrf.mxu0 }
  0xa7   :  { %v337_v46 = vpop.f32.mrf.mxu3  ;;  %v325_v47 = vadd.f32 %v324_v45, %v312_v44  ;;  %v313_v50 = vpop.f32.mrf.mxu1 }
  0xa9   :  { %v338_v51 = vadd.f32 %v337_v46, %v325_v47 }
  0xab   :  { %v345_v53 = vmul.f32 %v518_v48, %v338_v51 }
  0xad   :  { %v350_v54 = vadd.f32 %v519_v52, %v345_v53 }
  0xae   :  { %v326_v55 = vpop.f32.mrf.mxu2 }
  0xaf   :  { %v339_v56 = vpop.f32.mrf.mxu3  ;;  %v351_v57 = vmax.f32 %v350_v54, 0.0 }
  0xb1   :  { %v352_v58 = vpack.c.bf16 %v351_v57, %v351_v57 }
  0xb3   :  { %353 = vst [vmem:[%s660_s4] sm:$0xf] %v352_v58 }

// kernel: _forward_jit.32
= control target key start
LH: loop header
LB: loop body
LE: loop exit
PB: predicated region body
PF: predicated region fallthrough
CT: control target
= control target key end

     0   :  { %s363_s1 = inlined_call_operand.vmem [shape: bf16[256,128], index: 1, kind: input, shape index: {}]   ;;  %s364_s0 = inlined_call_operand.vmem [shape: bf16[8,256], index: 0, kind: input, shape index: {}]   ;;  %s365_s2 = inlined_call_operand.vmem [shape: f32[1,128], index: 2, kind: input, shape index: {}]   ;;  %s366_s3 = inlined_call_operand.vmem [shape: f32[1,128], index: 3, kind: input, shape index: {}]   ;;  %s367_s4 = inlined_call_operand.vmem [shape: bf16[8,128], index: 4, kind: output, shape index: {}]  }
   0x1   :  { %v267_v0 = vld [vmem:[%s363_s1 + $0x38] sm:$0xff]  ;;  %v266_v2 = vld [vmem:[%s363_s1 + $0x30] sm:$0xff]  ;;  %v265_v4 = vld [vmem:[%s363_s1 + $0x28] sm:$0xff] }
   0x2   :  { %v275_v1 = vld [vmem:[%s363_s1 + $0x78] sm:$0xff]  ;;  %153 = vmatpush.bf16.msra.mxu0 %v267_v0  ;;  %v274_v3 = vld [vmem:[%s363_s1 + $0x70] sm:$0xff]  ;;  %v273_v5 = vld [vmem:[%s363_s1 + $0x68] sm:$0xff] }
   0x3   :  { %166 = vmatpush.bf16.msra.mxu1 %v275_v1  ;;  %v264_v6 = vld [vmem:[%s363_s1 + $0x20] sm:$0xff]  ;;  %v263_v8 = vld [vmem:[%s363_s1 + $0x18] sm:$0xff]  ;;  %v262_v10 = vld [vmem:[%s363_s1 + $0x10] sm:$0xff] }
   0x4   :  { %v272_v7 = vld [vmem:[%s363_s1 + $0x60] sm:$0xff]  ;;  %v271_v9 = vld [vmem:[%s363_s1 + $0x58] sm:$0xff]  ;;  %v270_v11 = vld [vmem:[%s363_s1 + $0x50] sm:$0xff] }
   0x5   :  { %v261_v12 = vld [vmem:[%s363_s1 + $0x8] sm:$0xff]  ;;  %v17_v14 = vld [vmem:[%s364_s0] sm:$0xff] }
   0x6   :  { %154 = vmatpush.bf16.msra.mxu0 %v266_v2  ;;  %v269_v13 = vld [vmem:[%s363_s1 + $0x48] sm:$0xff]  ;;  %v51_v15 = vunpack.c.l.b16 %v17_v14  ;;  %v52_v16 = vunpack.c.h.b16 %v17_v14  ;;  %v260_v17 = vld [vmem:[%s363_s1] sm:$0xff] }
   0x7   :  { %167 = vmatpush.bf16.msra.mxu1 %v274_v3  ;;  %v268_v18 = vld [vmem:[%s363_s1 + $0x40] sm:$0xff] }
   0x8   :  { %v53_v19 = vpack.c.b16 %v51_v15, %v51_v15  ;;  %v54_v20 = vpack.c.b16 %v52_v16, %v52_v16  ;;  %v276_v21 = vld [vmem:[%s365_s2] ss:$0 sm:$0xff] }
   0x9   :  { %v277_v25 = vld [vmem:[%s366_s3] ss:$0 sm:$0xff] }
   0xa   :  { %155 = vmatpush.bf16.msra.mxu0 %v265_v4 }
   0xb   :  { %168 = vmatpush.bf16.msra.mxu1 %v273_v5 }
   0xe   :  { %156 = vmatpush.bf16.msra.mxu0 %v264_v6 }
   0xf   :  { %169 = vmatpush.bf16.msra.mxu1 %v272_v7 }
  0x12   :  { %157 = vmatpush.bf16.msra.mxu0 %v263_v8 }
  0x13   :  { %170 = vmatpush.bf16.msra.mxu1 %v271_v9 }
  0x16   :  { %158 = vmatpush.bf16.msra.mxu0 %v262_v10 }
  0x17   :  { %171 = vmatpush.bf16.msra.mxu1 %v270_v11 }
  0x1a   :  { %159 = vmatpush.bf16.msra.mxu0 %v261_v12 }
  0x1b   :  { %172 = vmatpush.bf16.msra.mxu1 %v269_v13 }
  0x1e   :  { %160 = vmatpush.bf16.msra.mxu0 %v260_v17 }
  0x1f   :  { %173 = vmatpush.bf16.msra.mxu1 %v268_v18 }
  0x21   :  { %161 = vmatmul.bf16.vlgmr.msra.gmra.mxu0 %v53_v19 }
  0x22   :  { %174 = vmatmul.bf16.vlgmr.msra.gmra.mxu1 %v54_v20 }
  0x9e   :  { %v162_v22 = vpop.f32.mrf.mxu0 }
  0x9f   :  { %v175_v23 = vpop.f32.mrf.mxu1 }
  0xa0   :  { %v176_v24 = vadd.f32 %v175_v23, %v162_v22 }
  0xa2   :  { %v183_v26 = vmul.f32 %v276_v21, %v176_v24 }
  0xa4   :  { %v188_v27 = vadd.f32 %v277_v25, %v183_v26 }
  0xa6   :  { %v189_v28 = vmax.f32 %v188_v27, 0.0  ;;  %v164_v29 = vpop.f32.mrf.mxu0 }
  0xa7   :  { %v177_v30 = vpop.f32.mrf.mxu1 }
  0xa8   :  { %v190_v31 = vpack.c.bf16 %v189_v28, %v189_v28 }
  0xaa   :  { %191 = vst [vmem:[%s367_s4] sm:$0xf] %v190_v31 }

// kernel: _forward_jit.31
= control target key start
LH: loop header
LB: loop body
LE: loop exit
PB: predicated region body
PF: predicated region fallthrough
CT: control target
= control target key end

     0   :  { %s670_s1 = inlined_call_operand.vmem [shape: bf16[512,128], index: 1, kind: input, shape index: {}]   ;;  %s671_s0 = inlined_call_operand.vmem [shape: bf16[8,512], index: 0, kind: input, shape index: {}]   ;;  %s672_s2 = inlined_call_operand.vmem [shape: f32[1,128], index: 2, kind: input, shape index: {}]   ;;  %s673_s3 = inlined_call_operand.vmem [shape: f32[1,128], index: 3, kind: input, shape index: {}]   ;;  %s674_s4 = inlined_call_operand.vmem [shape: bf16[8,128], index: 4, kind: input, shape index: {}]   ;;  %s675_s5 = inlined_call_operand.vmem [shape: bf16[8,128], index: 5, kind: output, shape index: {}]  }
   0x1   :  { %v499_v0 = vld [vmem:[%s670_s1 + $0x38] sm:$0xff]  ;;  %v498_v4 = vld [vmem:[%s670_s1 + $0x30] sm:$0xff]  ;;  %v497_v8 = vld [vmem:[%s670_s1 + $0x28] sm:$0xff] }
   0x2   :  { %v507_v1 = vld [vmem:[%s670_s1 + $0x78] sm:$0xff]  ;;  %292 = vmatpush.bf16.msra.mxu0 %v499_v0  ;;  %v506_v5 = vld [vmem:[%s670_s1 + $0x70] sm:$0xff]  ;;  %v505_v9 = vld [vmem:[%s670_s1 + $0x68] sm:$0xff] }
   0x3   :  { %v515_v2 = vld [vmem:[%s670_s1 + $0xb8] sm:$0xff]  ;;  %305 = vmatpush.bf16.msra.mxu1 %v507_v1  ;;  %v514_v6 = vld [vmem:[%s670_s1 + $0xb0] sm:$0xff]  ;;  %v513_v10 = vld [vmem:[%s670_s1 + $0xa8] sm:$0xff] }
   0x4   :  { %v523_v3 = vld [vmem:[%s670_s1 + $0xf8] sm:$0xff]  ;;  %318 = vmatpush.bf16.msra.mxu2 %v515_v2  ;;  %v522_v7 = vld [vmem:[%s670_s1 + $0xf0] sm:$0xff]  ;;  %v521_v11 = vld [vmem:[%s670_s1 + $0xe8] sm:$0xff] }
   0x5   :  { %331 = vmatpush.bf16.msra.mxu3 %v523_v3  ;;  %v496_v12 = vld [vmem:[%s670_s1 + $0x20] sm:$0xff]  ;;  %v495_v16 = vld [vmem:[%s670_s1 + $0x18] sm:$0xff]  ;;  %v494_v20 = vld [vmem:[%s670_s1 + $0x10] sm:$0xff] }
   0x6   :  { %293 = vmatpush.bf16.msra.mxu0 %v498_v4  ;;  %v504_v13 = vld [vmem:[%s670_s1 + $0x60] sm:$0xff]  ;;  %v503_v17 = vld [vmem:[%s670_s1 + $0x58] sm:$0xff]  ;;  %v502_v21 = vld [vmem:[%s670_s1 + $0x50] sm:$0xff] }
   0x7   :  { %306 = vmatpush.bf16.msra.mxu1 %v506_v5  ;;  %v512_v14 = vld [vmem:[%s670_s1 + $0xa0] sm:$0xff]  ;;  %v511_v18 = vld [vmem:[%s670_s1 + $0x98] sm:$0xff]  ;;  %v510_v22 = vld [vmem:[%s670_s1 + $0x90] sm:$0xff] }
   0x8   :  { %319 = vmatpush.bf16.msra.mxu2 %v514_v6  ;;  %v520_v15 = vld [vmem:[%s670_s1 + $0xe0] sm:$0xff]  ;;  %v519_v19 = vld [vmem:[%s670_s1 + $0xd8] sm:$0xff]  ;;  %v518_v23 = vld [vmem:[%s670_s1 + $0xd0] sm:$0xff] }
   0x9   :  { %332 = vmatpush.bf16.msra.mxu3 %v522_v7  ;;  %v493_v24 = vld [vmem:[%s670_s1 + $0x8] sm:$0xff]  ;;  %v20_v26 = vld [vmem:[%s671_s0] sm:$0xff] }
   0xa   :  { %294 = vmatpush.bf16.msra.mxu0 %v497_v8  ;;  %v501_v25 = vld [vmem:[%s670_s1 + $0x48] sm:$0xff]  ;;  %v88_v30 = vunpack.c.l.b16 %v20_v26  ;;  %v89_v31 = vunpack.c.h.b16 %v20_v26  ;;  %v492_v32 = vld [vmem:[%s670_s1] sm:$0xff] }
   0xb   :  { %307 = vmatpush.bf16.msra.mxu1 %v505_v9  ;;  %v509_v27 = vld [vmem:[%s670_s1 + $0x88] sm:$0xff]  ;;  %v500_v33 = vld [vmem:[%s670_s1 + $0x40] sm:$0xff] }
   0xc   :  { %320 = vmatpush.bf16.msra.mxu2 %v513_v10  ;;  %v517_v28 = vld [vmem:[%s670_s1 + $0xc8] sm:$0xff]  ;;  %v508_v36 = vld [vmem:[%s670_s1 + $0x80] sm:$0xff]  ;;  %v92_v38 = vpack.c.b16 %v88_v30, %v88_v30  ;;  %v93_v39 = vpack.c.b16 %v89_v31, %v89_v31 }
   0xd   :  { %333 = vmatpush.bf16.msra.mxu3 %v521_v11  ;;  %v21_v29 = vld [vmem:[%s671_s0 + $0x8] sm:$0xff]  ;;  %v516_v37 = vld [vmem:[%s670_s1 + $0xc0] sm:$0xff] }
   0xe   :  { %295 = vmatpush.bf16.msra.mxu0 %v496_v12  ;;  %v90_v34 = vunpack.c.l.b16 %v21_v29  ;;  %v91_v35 = vunpack.c.h.b16 %v21_v29  ;;  %v524_v48 = vld [vmem:[%s672_s2] ss:$0 sm:$0xff] }
   0xf   :  { %308 = vmatpush.bf16.msra.mxu1 %v504_v13  ;;  %v354_v51 = vld [vmem:[%s674_s4] sm:$0xf] }
  0x10   :  { %321 = vmatpush.bf16.msra.mxu2 %v512_v14  ;;  %v94_v40 = vpack.c.b16 %v90_v34, %v90_v34  ;;  %v95_v41 = vpack.c.b16 %v91_v35, %v91_v35  ;;  %v525_v53 = vld [vmem:[%s673_s3] ss:$0 sm:$0xff]  ;;  %v355_v55 = vunpack.c.l.bf16 %v354_v51 }
  0x11   :  { %334 = vmatpush.bf16.msra.mxu3 %v520_v15 }
  0x12   :  { %296 = vmatpush.bf16.msra.mxu0 %v495_v16 }
  0x13   :  { %309 = vmatpush.bf16.msra.mxu1 %v503_v17 }
  0x14   :  { %322 = vmatpush.bf16.msra.mxu2 %v511_v18 }
  0x15   :  { %335 = vmatpush.bf16.msra.mxu3 %v519_v19 }
  0x16   :  { %297 = vmatpush.bf16.msra.mxu0 %v494_v20 }
  0x17   :  { %310 = vmatpush.bf16.msra.mxu1 %v502_v21 }
  0x18   :  { %323 = vmatpush.bf16.msra.mxu2 %v510_v22 }
  0x19   :  { %336 = vmatpush.bf16.msra.mxu3 %v518_v23 }
  0x1a   :  { %298 = vmatpush.bf16.msra.mxu0 %v493_v24 }
  0x1b   :  { %311 = vmatpush.bf16.msra.mxu1 %v501_v25 }
  0x1c   :  { %324 = vmatpush.bf16.msra.mxu2 %v509_v27 }
  0x1d   :  { %337 = vmatpush.bf16.msra.mxu3 %v517_v28 }
  0x1e   :  { %299 = vmatpush.bf16.msra.mxu0 %v492_v32 }
  0x1f   :  { %312 = vmatpush.bf16.msra.mxu1 %v500_v33 }
  0x20   :  { %325 = vmatpush.bf16.msra.mxu2 %v508_v36 }
  0x21   :  { %338 = vmatpush.bf16.msra.mxu3 %v516_v37  ;;  %300 = vmatmul.bf16.vlgmr.msra.gmra.mxu0 %v92_v38 }
  0x22   :  { %313 = vmatmul.bf16.vlgmr.msra.gmra.mxu1 %v93_v39 }
  0x23   :  { %326 = vmatmul.bf16.vlgmr.msra.gmra.mxu2 %v94_v40 }
  0x24   :  { %339 = vmatmul.bf16.vlgmr.msra.gmra.mxu3 %v95_v41 }
  0x9e   :  { %v301_v42 = vpop.f32.mrf.mxu0 }
  0x9f   :  { %v314_v43 = vpop.f32.mrf.mxu1 }
  0xa0   :  { %v315_v44 = vadd.f32 %v314_v43, %v301_v42 }
  0xa6   :  { %v327_v45 = vpop.f32.mrf.mxu2  ;;  %v303_v49 = vpop.f32.mrf.mxu0 }
  0xa7   :  { %v340_v46 = vpop.f32.mrf.mxu3  ;;  %v328_v47 = vadd.f32 %v327_v45, %v315_v44  ;;  %v316_v50 = vpop.f32.mrf.mxu1 }
  0xa9   :  { %v341_v52 = vadd.f32 %v340_v46, %v328_v47 }
  0xab   :  { %v348_v54 = vmul.f32 %v524_v48, %v341_v52 }
  0xad   :  { %v353_v56 = vadd.f32 %v525_v53, %v348_v54 }
  0xae   :  { %v329_v57 = vpop.f32.mrf.mxu2 }
  0xaf   :  { %v342_v58 = vpop.f32.mrf.mxu3  ;;  %v356_v59 = vadd.f32 %v355_v55, %v353_v56 }
  0xb1   :  { %v357_v60 = vmax.f32 %v356_v59, 0.0 }
  0xb3   :  { %v358_v61 = vpack.c.bf16 %v357_v60, %v357_v60 }
  0xb5   :  { %359 = vst [vmem:[%s675_s5] sm:$0xf] %v358_v61 }

// kernel: _forward_jit.34
= control target key start
LH: loop header
LB: loop body
LE: loop exit
PB: predicated region body
PF: predicated region fallthrough
CT: control target
= control target key end

     0   :  { %s334_s1 = inlined_call_operand.vmem [shape: bf16[128,128], index: 1, kind: input, shape index: {}]   ;;  %s335_s2 = inlined_call_operand.vmem [shape: f32[1,128], index: 2, kind: input, shape index: {}]   ;;  %s336_s3 = inlined_call_operand.vmem [shape: f32[1,128], index: 3, kind: input, shape index: {}]   ;;  %s337_s0 = inlined_call_operand.vmem [shape: bf16[48,128], index: 0, kind: input, shape index: {}]   ;;  %s338_s4 = inlined_call_operand.vmem [shape: bf16[48,128], index: 4, kind: output, shape index: {}]  }
   0x1   :  { %v225_v0 = vld [vmem:[%s334_s1 + $0x38] sm:$0xff]  ;;  %v224_v1 = vld [vmem:[%s334_s1 + $0x30] sm:$0xff]  ;;  %v223_v2 = vld [vmem:[%s334_s1 + $0x28] sm:$0xff] }
   0x2   :  { %105 = vmatpush.bf16.msra.mxu0 %v225_v0  ;;  %243 = vmatpush.bf16.msra.mxu1 %v225_v0  ;;  %v222_v3 = vld [vmem:[%s334_s1 + $0x20] sm:$0xff]  ;;  %v221_v4 = vld [vmem:[%s334_s1 + $0x18] sm:$0xff]  ;;  %v220_v5 = vld [vmem:[%s334_s1 + $0x10] sm:$0xff] }
   0x3   :  { %244 = vmatpush.bf16.msra.mxu2 %v225_v0  ;;  %v219_v6 = vld [vmem:[%s334_s1 + $0x8] sm:$0xff]  ;;  %v218_v7 = vld [vmem:[%s334_s1] sm:$0xff]  ;;  %v217_v10 = vld [vmem:[%s337_s0 + $0x10] sm:$0xff] }
   0x4   :  { %v215_v8 = vld [vmem:[%s337_s0] sm:$0xff]  ;;  %v216_v9 = vld [vmem:[%s337_s0 + $0x8] sm:$0xff] }
   0x5   :  { %v259_v13 = vld [vmem:[%s335_s2] ss:$0 sm:$0xff] }
   0x6   :  { %106 = vmatpush.bf16.msra.mxu0 %v224_v1  ;;  %245 = vmatpush.bf16.msra.mxu1 %v224_v1  ;;  %v260_v15 = vld [vmem:[%s336_s3] ss:$0 sm:$0xff] }
   0x7   :  { %246 = vmatpush.bf16.msra.mxu2 %v224_v1 }
   0xa   :  { %107 = vmatpush.bf16.msra.mxu0 %v223_v2  ;;  %247 = vmatpush.bf16.msra.mxu1 %v223_v2 }
   0xb   :  { %248 = vmatpush.bf16.msra.mxu2 %v223_v2 }
   0xe   :  { %108 = vmatpush.bf16.msra.mxu0 %v222_v3  ;;  %249 = vmatpush.bf16.msra.mxu1 %v222_v3 }
   0xf   :  { %250 = vmatpush.bf16.msra.mxu2 %v222_v3 }
  0x12   :  { %109 = vmatpush.bf16.msra.mxu0 %v221_v4  ;;  %251 = vmatpush.bf16.msra.mxu1 %v221_v4 }
  0x13   :  { %252 = vmatpush.bf16.msra.mxu2 %v221_v4 }
  0x16   :  { %110 = vmatpush.bf16.msra.mxu0 %v220_v5  ;;  %253 = vmatpush.bf16.msra.mxu1 %v220_v5 }
  0x17   :  { %254 = vmatpush.bf16.msra.mxu2 %v220_v5 }
  0x1a   :  { %111 = vmatpush.bf16.msra.mxu0 %v219_v6  ;;  %255 = vmatpush.bf16.msra.mxu1 %v219_v6 }
  0x1b   :  { %256 = vmatpush.bf16.msra.mxu2 %v219_v6 }
  0x1e   :  { %112 = vmatpush.bf16.msra.mxu0 %v218_v7  ;;  %257 = vmatpush.bf16.msra.mxu1 %v218_v7 }
  0x1f   :  { %258 = vmatpush.bf16.msra.mxu2 %v218_v7 }
  0x21   :  { %113 = vmatmul.bf16.vlgmr.msra.gmra.mxu0 %v215_v8  ;;  %118 = vmatmul.bf16.vlgmr.msra.gmra.mxu1 %v216_v9 }
  0x22   :  { %123 = vmatmul.bf16.vlgmr.msra.gmra.mxu2 %v217_v10 }
  0x9e   :  { %v114_v11 = vpop.f32.mrf.mxu0  ;;  %v119_v12 = vpop.f32.mrf.mxu1 }
  0x9f   :  { %v133_v14 = vmul.f32 %v259_v13, %v114_v11  ;;  %v135_v16 = vmul.f32 %v259_v13, %v119_v12 }
  0xa1   :  { %v143_v20 = vadd.f32 %v260_v15, %v133_v14  ;;  %v145_v21 = vadd.f32 %v260_v15, %v135_v16 }
  0xa3   :  { %v149_v27 = vmax.f32 %v143_v20, 0.0  ;;  %v151_v28 = vmax.f32 %v145_v21, 0.0 }
  0xa5   :  { %v124_v17 = vpop.f32.mrf.mxu2 }
  0xa6   :  { %v116_v18 = vpop.f32.mrf.mxu0  ;;  %v121_v19 = vpop.f32.mrf.mxu1  ;;  %v137_v26 = vmul.f32 %v259_v13, %v124_v17 }
  0xa7   :  { %v134_v22 = vmul.f32 %v259_v13, %v116_v18  ;;  %v136_v23 = vmul.f32 %v259_v13, %v121_v19 }
  0xa8   :  { %v147_v34 = vadd.f32 %v260_v15, %v137_v26 }
  0xa9   :  { %v144_v24 = vadd.f32 %v260_v15, %v134_v22  ;;  %v146_v25 = vadd.f32 %v260_v15, %v136_v23 }
  0xaa   :  { %v153_v37 = vmax.f32 %v147_v34, 0.0 }
  0xab   :  { %v150_v29 = vmax.f32 %v144_v24, 0.0  ;;  %v152_v30 = vmax.f32 %v146_v25, 0.0 }
  0xad   :  { %v229_v31 = vpack.c.bf16 %v150_v29, %v149_v27  ;;  %v234_v32 = vpack.c.bf16 %v152_v30, %v151_v28  ;;  %v126_v33 = vpop.f32.mrf.mxu2 }
  0xae   :  { %v138_v35 = vmul.f32 %v259_v13, %v126_v33 }
  0xaf   :  { %230 = vst [vmem:[%s338_s4] sm:$0xff] %v229_v31  }
  0xb0   :  { %241 = vst [vmem:[%s338_s4 + $0x8] sm:$0xff] %v234_v32   ;;  %v148_v36 = vadd.f32 %v260_v15, %v138_v35 }
  0xb2   :  { %v154_v38 = vmax.f32 %v148_v36, 0.0 }
  0xb4   :  { %v239_v39 = vpack.c.bf16 %v154_v38, %v153_v37 }
  0xb6   :  { %242 = vst [vmem:[%s338_s4 + $0x10] sm:$0xff] %v239_v39  }

// kernel: _forward_jit.35
= control target key start
LH: loop header
LB: loop body
LE: loop exit
PB: predicated region body
PF: predicated region fallthrough
CT: control target
= control target key end

     0   :  { %s383_s1 = inlined_call_operand.vmem [shape: bf16[128,128], index: 1, kind: input, shape index: {}]   ;;  %s384_s2 = inlined_call_operand.vmem [shape: f32[1,128], index: 2, kind: input, shape index: {}]   ;;  %s385_s3 = inlined_call_operand.vmem [shape: f32[1,128], index: 3, kind: input, shape index: {}]   ;;  %s386_s0 = inlined_call_operand.vmem [shape: bf16[48,128], index: 0, kind: input, shape index: {}]   ;;  %s387_s4 = inlined_call_operand.vmem [shape: bf16[48,128], index: 4, kind: input, shape index: {}]   ;;  %s388_s5 = inlined_call_operand.vmem [shape: bf16[48,128], index: 5, kind: output, shape index: {}]  }
   0x1   :  { %v246_v0 = vld [vmem:[%s383_s1 + $0x38] sm:$0xff]  ;;  %v245_v1 = vld [vmem:[%s383_s1 + $0x30] sm:$0xff]  ;;  %v244_v2 = vld [vmem:[%s383_s1 + $0x28] sm:$0xff] }
   0x2   :  { %108 = vmatpush.bf16.msra.mxu0 %v246_v0  ;;  %278 = vmatpush.bf16.msra.mxu1 %v246_v0  ;;  %v243_v3 = vld [vmem:[%s383_s1 + $0x20] sm:$0xff]  ;;  %v242_v4 = vld [vmem:[%s383_s1 + $0x18] sm:$0xff]  ;;  %v241_v5 = vld [vmem:[%s383_s1 + $0x10] sm:$0xff] }
   0x3   :  { %279 = vmatpush.bf16.msra.mxu2 %v246_v0  ;;  %v240_v6 = vld [vmem:[%s383_s1 + $0x8] sm:$0xff]  ;;  %v239_v7 = vld [vmem:[%s383_s1] sm:$0xff]  ;;  %v238_v10 = vld [vmem:[%s386_s0 + $0x10] sm:$0xff] }
   0x4   :  { %v236_v8 = vld [vmem:[%s386_s0] sm:$0xff]  ;;  %v237_v9 = vld [vmem:[%s386_s0 + $0x8] sm:$0xff]  ;;  %v275_v33 = vld [vmem:[%s387_s4 + $0x10] sm:$0xff]  }
   0x5   :  { %v294_v11 = vld [vmem:[%s384_s2] ss:$0 sm:$0xff]  ;;  %v274_v18 = vld [vmem:[%s387_s4 + $0x8] sm:$0xff]   ;;  %v257_v39 = vunpack.c.l.bf16 %v275_v33  ;;  %v258_v46 = vunpack.c.h.bf16 %v275_v33 }
   0x6   :  { %109 = vmatpush.bf16.msra.mxu0 %v245_v1  ;;  %280 = vmatpush.bf16.msra.mxu1 %v245_v1  ;;  %v295_v15 = vld [vmem:[%s385_s3] ss:$0 sm:$0xff]  ;;  %v253_v22 = vunpack.c.l.bf16 %v274_v18  ;;  %v254_v29 = vunpack.c.h.bf16 %v274_v18 }
   0x7   :  { %281 = vmatpush.bf16.msra.mxu2 %v245_v1  ;;  %v248_v17 = vld [vmem:[%s387_s4] sm:$0xff]  }
   0x8   :  { %v249_v20 = vunpack.c.l.bf16 %v248_v17  ;;  %v250_v27 = vunpack.c.h.bf16 %v248_v17 }
   0xa   :  { %110 = vmatpush.bf16.msra.mxu0 %v244_v2  ;;  %282 = vmatpush.bf16.msra.mxu1 %v244_v2 }
   0xb   :  { %283 = vmatpush.bf16.msra.mxu2 %v244_v2 }
   0xe   :  { %111 = vmatpush.bf16.msra.mxu0 %v243_v3  ;;  %284 = vmatpush.bf16.msra.mxu1 %v243_v3 }
   0xf   :  { %285 = vmatpush.bf16.msra.mxu2 %v243_v3 }
  0x12   :  { %112 = vmatpush.bf16.msra.mxu0 %v242_v4  ;;  %286 = vmatpush.bf16.msra.mxu1 %v242_v4 }
  0x13   :  { %287 = vmatpush.bf16.msra.mxu2 %v242_v4 }
  0x16   :  { %113 = vmatpush.bf16.msra.mxu0 %v241_v5  ;;  %288 = vmatpush.bf16.msra.mxu1 %v241_v5 }
  0x17   :  { %289 = vmatpush.bf16.msra.mxu2 %v241_v5 }
  0x1a   :  { %114 = vmatpush.bf16.msra.mxu0 %v240_v6  ;;  %290 = vmatpush.bf16.msra.mxu1 %v240_v6 }
  0x1b   :  { %291 = vmatpush.bf16.msra.mxu2 %v240_v6 }
  0x1e   :  { %115 = vmatpush.bf16.msra.mxu0 %v239_v7  ;;  %292 = vmatpush.bf16.msra.mxu1 %v239_v7 }
  0x1f   :  { %293 = vmatpush.bf16.msra.mxu2 %v239_v7 }
  0x21   :  { %116 = vmatmul.bf16.vlgmr.msra.gmra.mxu0 %v236_v8  ;;  %121 = vmatmul.bf16.vlgmr.msra.gmra.mxu1 %v237_v9 }
  0x22   :  { %126 = vmatmul.bf16.vlgmr.msra.gmra.mxu2 %v238_v10 }
  0x9e   :  { %v117_v12 = vpop.f32.mrf.mxu0  ;;  %v122_v13 = vpop.f32.mrf.mxu1 }
  0x9f   :  { %v136_v14 = vmul.f32 %v294_v11, %v117_v12  ;;  %v138_v16 = vmul.f32 %v294_v11, %v122_v13 }
  0xa1   :  { %v146_v19 = vadd.f32 %v295_v15, %v136_v14  ;;  %v148_v21 = vadd.f32 %v295_v15, %v138_v16 }
  0xa3   :  { %v164_v31 = vadd.f32 %v249_v20, %v146_v19  ;;  %v166_v32 = vadd.f32 %v253_v22, %v148_v21 }
  0xa5   :  { %v127_v23 = vpop.f32.mrf.mxu2  ;;  %v170_v40 = vmax.f32 %v164_v31, 0.0  ;;  %v172_v41 = vmax.f32 %v166_v32, 0.0 }
  0xa6   :  { %v119_v24 = vpop.f32.mrf.mxu0  ;;  %v124_v25 = vpop.f32.mrf.mxu1  ;;  %v140_v30 = vmul.f32 %v294_v11, %v127_v23 }
  0xa7   :  { %v137_v26 = vmul.f32 %v294_v11, %v119_v24  ;;  %v139_v28 = vmul.f32 %v294_v11, %v124_v25 }
  0xa8   :  { %v150_v38 = vadd.f32 %v295_v15, %v140_v30 }
  0xa9   :  { %v147_v34 = vadd.f32 %v295_v15, %v137_v26  ;;  %v149_v35 = vadd.f32 %v295_v15, %v139_v28 }
  0xaa   :  { %v168_v49 = vadd.f32 %v257_v39, %v150_v38 }
  0xab   :  { %v165_v36 = vadd.f32 %v250_v27, %v147_v34  ;;  %v167_v37 = vadd.f32 %v254_v29, %v149_v35 }
  0xac   :  { %v174_v52 = vmax.f32 %v168_v49, 0.0 }
  0xad   :  { %v171_v42 = vmax.f32 %v165_v36, 0.0  ;;  %v173_v43 = vmax.f32 %v167_v37, 0.0  ;;  %v129_v44 = vpop.f32.mrf.mxu2 }
  0xae   :  { %v141_v45 = vmul.f32 %v294_v11, %v129_v44 }
  0xaf   :  { %v262_v47 = vpack.c.bf16 %v171_v42, %v170_v40  ;;  %v267_v48 = vpack.c.bf16 %v173_v43, %v172_v41 }
  0xb0   :  { %v151_v50 = vadd.f32 %v295_v15, %v141_v45 }
  0xb1   :  { %263 = vst [vmem:[%s388_s5] sm:$0xff] %v262_v47  }
  0xb2   :  { %276 = vst [vmem:[%s388_s5 + $0x8] sm:$0xff] %v267_v48   ;;  %v169_v51 = vadd.f32 %v258_v46, %v151_v50 }
  0xb4   :  { %v175_v53 = vmax.f32 %v169_v51, 0.0 }
  0xb6   :  { %v272_v54 = vpack.c.bf16 %v175_v53, %v174_v52 }
  0xb8   :  { %277 = vst [vmem:[%s388_s5 + $0x10] sm:$0xff] %v272_v54  }

// kernel: _forward_jit.38
= control target key start
LH: loop header
LB: loop body
LE: loop exit
PB: predicated region body
PF: predicated region fallthrough
CT: control target
= control target key end

     0   :  { %s259_s1 = inlined_call_operand.vmem [shape: bf16[128,128], index: 1, kind: input, shape index: {}]   ;;  %s260_s2 = inlined_call_operand.vmem [shape: f32[1,128], index: 2, kind: input, shape index: {}]   ;;  %s261_s3 = inlined_call_operand.vmem [shape: f32[1,128], index: 3, kind: input, shape index: {}]   ;;  %s262_s0 = inlined_call_operand.vmem [shape: bf16[16,128], index: 0, kind: input, shape index: {}]   ;;  %s263_s4 = inlined_call_operand.vmem [shape: bf16[16,128], index: 4, kind: input, shape index: {}]   ;;  %s264_s5 = inlined_call_operand.vmem [shape: bf16[16,128], index: 5, kind: output, shape index: {}]  }
   0x1   :  { %v178_v0 = vld [vmem:[%s259_s1 + $0x38] sm:$0xff]  ;;  %v177_v1 = vld [vmem:[%s259_s1 + $0x30] sm:$0xff]  ;;  %v176_v2 = vld [vmem:[%s259_s1 + $0x28] sm:$0xff] }
   0x2   :  { %92 = vmatpush.bf16.msra.mxu0 %v178_v0  ;;  %v175_v3 = vld [vmem:[%s259_s1 + $0x20] sm:$0xff]  ;;  %v174_v4 = vld [vmem:[%s259_s1 + $0x18] sm:$0xff]  ;;  %v173_v5 = vld [vmem:[%s259_s1 + $0x10] sm:$0xff] }
   0x3   :  { %v172_v6 = vld [vmem:[%s259_s1 + $0x8] sm:$0xff]  ;;  %v171_v7 = vld [vmem:[%s259_s1] sm:$0xff] }
   0x4   :  { %v170_v8 = vld [vmem:[%s262_s0] sm:$0xff] }
   0x5   :  { %v188_v9 = vld [vmem:[%s260_s2] ss:$0 sm:$0xff] }
   0x6   :  { %93 = vmatpush.bf16.msra.mxu0 %v177_v1  ;;  %v189_v12 = vld [vmem:[%s261_s3] ss:$0 sm:$0xff] }
   0x7   :  { %v180_v13 = vld [vmem:[%s263_s4] sm:$0xff]  }
   0x8   :  { %v181_v15 = vunpack.c.l.bf16 %v180_v13  ;;  %v182_v18 = vunpack.c.h.bf16 %v180_v13 }
   0xa   :  { %94 = vmatpush.bf16.msra.mxu0 %v176_v2 }
   0xe   :  { %95 = vmatpush.bf16.msra.mxu0 %v175_v3 }
  0x12   :  { %96 = vmatpush.bf16.msra.mxu0 %v174_v4 }
  0x16   :  { %97 = vmatpush.bf16.msra.mxu0 %v173_v5 }
  0x1a   :  { %98 = vmatpush.bf16.msra.mxu0 %v172_v6 }
  0x1e   :  { %99 = vmatpush.bf16.msra.mxu0 %v171_v7 }
  0x21   :  { %100 = vmatmul.bf16.vlgmr.msra.gmra.mxu0 %v170_v8 }
  0x9e   :  { %v101_v10 = vpop.f32.mrf.mxu0 }
  0x9f   :  { %v110_v11 = vmul.f32 %v188_v9, %v101_v10 }
  0xa1   :  { %v116_v14 = vadd.f32 %v189_v12, %v110_v11 }
  0xa3   :  { %v122_v19 = vadd.f32 %v181_v15, %v116_v14 }
  0xa5   :  { %v124_v22 = vmax.f32 %v122_v19, 0.0 }
  0xa6   :  { %v103_v16 = vpop.f32.mrf.mxu0 }
  0xa7   :  { %v111_v17 = vmul.f32 %v188_v9, %v103_v16 }
  0xa9   :  { %v117_v20 = vadd.f32 %v189_v12, %v111_v17 }
  0xab   :  { %v123_v21 = vadd.f32 %v182_v18, %v117_v20 }
  0xad   :  { %v125_v23 = vmax.f32 %v123_v21, 0.0 }
  0xaf   :  { %v186_v24 = vpack.c.bf16 %v125_v23, %v124_v22 }
  0xb1   :  { %187 = vst [vmem:[%s264_s5] sm:$0xff] %v186_v24  }

// kernel: _forward_jit.41
= control target key start
LH: loop header
LB: loop body
LE: loop exit
PB: predicated region body
PF: predicated region fallthrough
CT: control target
= control target key end

     0   :  { %s214_s1 = inlined_call_operand.vmem [shape: bf16[128,128], index: 1, kind: input, shape index: {}]   ;;  %s215_s2 = inlined_call_operand.vmem [shape: f32[1,128], index: 2, kind: input, shape index: {}]   ;;  %s216_s3 = inlined_call_operand.vmem [shape: f32[1,128], index: 3, kind: input, shape index: {}]   ;;  %s217_s0 = inlined_call_operand.vmem [shape: bf16[8,128], index: 0, kind: input, shape index: {}]   ;;  %s218_s4 = inlined_call_operand.vmem [shape: f32[8,128], index: 4, kind: output, shape index: {}]  }
   0x1   :  { %v150_v0 = vld [vmem:[%s214_s1 + $0x38] sm:$0xff]  ;;  %v149_v1 = vld [vmem:[%s214_s1 + $0x30] sm:$0xff]  ;;  %v148_v2 = vld [vmem:[%s214_s1 + $0x28] sm:$0xff] }
   0x2   :  { %82 = vmatpush.bf16.msra.mxu0 %v150_v0  ;;  %v147_v3 = vld [vmem:[%s214_s1 + $0x20] sm:$0xff]  ;;  %v146_v4 = vld [vmem:[%s214_s1 + $0x18] sm:$0xff]  ;;  %v145_v5 = vld [vmem:[%s214_s1 + $0x10] sm:$0xff] }
   0x3   :  { %v144_v6 = vld [vmem:[%s214_s1 + $0x8] sm:$0xff]  ;;  %v143_v7 = vld [vmem:[%s214_s1] sm:$0xff] }
   0x4   :  { %v17_v8 = vld [vmem:[%s217_s0] sm:$0xf] }
   0x5   :  { %v151_v9 = vld [vmem:[%s215_s2] ss:$0 sm:$0xff] }
   0x6   :  { %83 = vmatpush.bf16.msra.mxu0 %v149_v1  ;;  %v152_v10 = vld [vmem:[%s216_s3] ss:$0 sm:$0xff] }
   0xa   :  { %84 = vmatpush.bf16.msra.mxu0 %v148_v2 }
   0xe   :  { %85 = vmatpush.bf16.msra.mxu0 %v147_v3 }
  0x12   :  { %86 = vmatpush.bf16.msra.mxu0 %v146_v4 }
  0x16   :  { %87 = vmatpush.bf16.msra.mxu0 %v145_v5 }
  0x1a   :  { %88 = vmatpush.bf16.msra.mxu0 %v144_v6 }
  0x1e   :  { %89 = vmatpush.bf16.msra.mxu0 %v143_v7 }
  0x21   :  { %90 = vmatmul.bf16.vlgmr.msra.gmra.mxu0 %v17_v8 }
  0x9e   :  { %v91_v11 = vpop.f32.mrf.mxu0 }
  0x9f   :  { %v99_v12 = vmul.f32 %v151_v9, %v91_v11 }
  0xa1   :  { %v104_v13 = vadd.f32 %v152_v10, %v99_v12 }
  0xa3   :  { %v105_v14 = vmax.f32 %v104_v13, 0.0 }
  0xa5   :  { %106 = vst [vmem:[%s218_s4] sm:$0xff] %v105_v14 }
  0xa6   :  { %v93_v15 = vpop.f32.mrf.mxu0 }

</bundles_post_ra>
